<compile_context>
chip_gen: v7x
topology: tpu7x:2x2x1
jax: 0.10.0
libtpu: 0.0.40
codegen_flags: <defaults>
</compile_context>

<pallas_src>
import functools

import jax
import jax.numpy as jnp
from jax.experimental import pallas as pl
from jax.experimental.pallas import tpu as pltpu


def _round_up(x, m):
    return ((x + m - 1) // m) * m


# ----------------------------- LSTM block kernels -----------------------------

def _lstm_block_body(x_ref, wih_ref, whh_ref, b_ref, hid_ref, h_scr, c_scr):
    """Process one block of TT time steps. Grid axis 0 = time blocks (sequential).

    x_ref:   (TT, Bp, Dp)  padded inputs for this time block
    wih_ref: (Dp, 4Hp)     W_ih^T (resident, gate-block padded)
    whh_ref: (Hp, 4Hp)     W_hh^T (resident, gate-block padded)
    b_ref:   (1, 4Hp)      b_ih + b_hh (gate-block padded)
    hid_ref: (TT, Bp, Hp)  hidden outputs for this time block
    h_scr, c_scr: (Bp, Hp) carried state in VMEM scratch
    """
    tb = pl.program_id(0)

    @pl.when(tb == 0)
    def _():
        h_scr[...] = jnp.zeros_like(h_scr)
        c_scr[...] = jnp.zeros_like(c_scr)

    TT, Bp, Dp = x_ref.shape
    Hp = h_scr.shape[1]

    # Hoisted input projection: one big MXU matmul for the whole time block, so the
    # serial per-step loop below only carries the h @ W_hh matmul.
    xg = jnp.dot(x_ref[...].reshape(TT * Bp, Dp), wih_ref[...],
                 preferred_element_type=jnp.float32) + b_ref[...]        # (TT*Bp, 4Hp)

    whh = whh_ref[...]
    h = h_scr[...]
    c = c_scr[...]
    for s in range(TT):  # static unroll (TT is small); only h @ W_hh per step
        gates = xg[s * Bp:(s + 1) * Bp, :] + jnp.dot(
            h, whh, preferred_element_type=jnp.float32)                  # (Bp, 4Hp)
        # PyTorch gate order i, f, g, o. Hp is a multiple of 128, so these slices
        # are lane-aligned (free) vreg views.
        i = jax.nn.sigmoid(gates[:, 0 * Hp:1 * Hp])
        f = jax.nn.sigmoid(gates[:, 1 * Hp:2 * Hp])
        g = jnp.tanh(gates[:, 2 * Hp:3 * Hp])
        o = jax.nn.sigmoid(gates[:, 3 * Hp:4 * Hp])
        c = f * c + i * g
        h = o * jnp.tanh(c)
        hid_ref[s] = h
    h_scr[...] = h
    c_scr[...] = c


def _lstm_block_kernel(x_ref, wih_ref, whh_ref, b_ref, hid_ref, h_scr, c_scr):
    _lstm_block_body(x_ref, wih_ref, whh_ref, b_ref, hid_ref, h_scr, c_scr)


def _lstm_block_pred_kernel(x_ref, wih_ref, whh_ref, b_ref, pw_ref, pb_ref,
                            hid_ref, logit_ref, h_scr, c_scr):
    _lstm_block_body(x_ref, wih_ref, whh_ref, b_ref, hid_ref, h_scr, c_scr)
    # Fused Linear head: logits for the block while the hidden block is still in VMEM.
    TT, Bp, Hp = hid_ref.shape
    Op = pw_ref.shape[1]
    logits = jnp.dot(hid_ref[...].reshape(TT * Bp, Hp), pw_ref[...],
                     preferred_element_type=jnp.float32) + pb_ref[...]
    logit_ref[...] = logits.reshape(TT, Bp, Op)


# ------------------------------- layer wrappers --------------------------------

def _lstm_in_specs(TT, Bp, Dp, Hp):
    # TODO(synk): for large H on v7x (64 MiB VMEM), single-buffer the resident
    # weights (pipeline_mode=pl.Buffered(1)), cast them to bf16, or tile the 4H axis.
    return [
        pl.BlockSpec((TT, Bp, Dp), lambda t: (t, 0, 0)),   # x time block
        pl.BlockSpec((Dp, 4 * Hp), lambda t: (0, 0)),      # W_ih^T (resident)
        pl.BlockSpec((Hp, 4 * Hp), lambda t: (0, 0)),      # W_hh^T (resident)
        pl.BlockSpec((1, 4 * Hp), lambda t: (0, 0)),       # b_ih + b_hh
    ]


def lstm_layer(x_tbd, wih_t, whh_t, bias, *, time_block):
    """x_tbd: (Tp, Bp, Dp) time-major padded. Returns (Tp, Bp, Hp)."""
    Tp, Bp, Dp = x_tbd.shape
    Hp = whh_t.shape[0]
    return pl.pallas_call(
        _lstm_block_kernel,
        out_shape=jax.ShapeDtypeStruct((Tp, Bp, Hp), jnp.float32),
        grid_spec=pltpu.PrefetchScalarGridSpec(
            num_scalar_prefetch=0,
            grid=(Tp // time_block,),
            in_specs=_lstm_in_specs(time_block, Bp, Dp, Hp),
            out_specs=pl.BlockSpec((time_block, Bp, Hp), lambda t: (t, 0, 0)),
            scratch_shapes=[pltpu.VMEM((Bp, Hp), jnp.float32),   # h carry
                            pltpu.VMEM((Bp, Hp), jnp.float32)],  # c carry
        ),
        compiler_params=pltpu.CompilerParams(
            dimension_semantics=("arbitrary",),   # recurrence must stay sequential
        ),
    )(x_tbd, wih_t, whh_t, bias)


def lstm_layer_pred(x_tbd, wih_t, whh_t, bias, pred_w_t, pred_b, *, time_block):
    """Last layer: also computes the Linear head in the kernel epilogue."""
    Tp, Bp, Dp = x_tbd.shape
    Hp = whh_t.shape[0]
    Op = pred_w_t.shape[1]
    return pl.pallas_call(
        _lstm_block_pred_kernel,
        out_shape=(jax.ShapeDtypeStruct((Tp, Bp, Hp), jnp.float32),
                   jax.ShapeDtypeStruct((Tp, Bp, Op), jnp.float32)),
        grid_spec=pltpu.PrefetchScalarGridSpec(
            num_scalar_prefetch=0,
            grid=(Tp // time_block,),
            in_specs=_lstm_in_specs(time_block, Bp, Dp, Hp) + [
                pl.BlockSpec((Hp, Op), lambda t: (0, 0)),   # pred W^T (resident)
                pl.BlockSpec((1, Op), lambda t: (0, 0)),    # pred bias
            ],
            out_specs=[pl.BlockSpec((time_block, Bp, Hp), lambda t: (t, 0, 0)),
                       pl.BlockSpec((time_block, Bp, Op), lambda t: (t, 0, 0))],
            scratch_shapes=[pltpu.VMEM((Bp, Hp), jnp.float32),
                            pltpu.VMEM((Bp, Hp), jnp.float32)],
        ),
        compiler_params=pltpu.CompilerParams(
            dimension_semantics=("arbitrary",),
        ),
    )(x_tbd, wih_t, whh_t, bias, pred_w_t, pred_b)


# ----------------------------------- FrmLstm ------------------------------------

def _pad_gate_cols(w, H, Hp):
    """w: (rows, 4H), PyTorch gate order [i,f,g,o] -> (rows, 4Hp), each gate padded."""
    if Hp == H:
        return w
    parts = [jnp.pad(w[:, k * H:(k + 1) * H], ((0, 0), (0, Hp - H))) for k in range(4)]
    return jnp.concatenate(parts, axis=1)


def frm_lstm_forward(feat, lstm_params, pred_w, pred_b, *, time_block=16):
    """feat: (B, T, input_size) batch_first (as in the PyTorch module).

    lstm_params: list of (w_ih (4H,D), w_hh (4H,H), b_ih (4H,), b_hh (4H,)) per layer
    pred_w: (O, H), pred_b: (O,)
    Returns (hidden (B,T,H), logits (B,T,O)).
    """
    B, T, D_in = feat.shape
    H = lstm_params[0][1].shape[1]
    O = pred_w.shape[0]

    Bp = _round_up(B, 8)            # f32 sublane count
    Hp = _round_up(H, 128)          # lane-dense hidden / gate blocks
    Op = _round_up(O, 128)          # lane-dense logits store
    Dp0 = _round_up(D_in, 128)
    TT = min(time_block, T)
    Tp = _round_up(T, TT)           # trailing padded time steps are causal-safe, dropped

    x = jnp.transpose(feat.astype(jnp.float32), (1, 0, 2))        # time-major (T,B,D)
    x = jnp.pad(x, ((0, Tp - T), (0, Bp - B), (0, Dp0 - D_in)))

    num_layers = len(lstm_params)
    hid_p = logit_p = None
    for layer, (w_ih, w_hh, b_ih, b_hh) in enumerate(lstm_params):
        D_l = w_ih.shape[1]
        Dp_l = Dp0 if layer == 0 else Hp
        # TODO(synk): optionally cast padded weights to bfloat16 (keep f32 accumulation)
        # for 2x MXU throughput on v6e/v7x; kept f32 here for exact reference parity.
        wih_p = _pad_gate_cols(jnp.pad(w_ih.T, ((0, Dp_l - D_l), (0, 0))), H, Hp)
        whh_p = _pad_gate_cols(jnp.pad(w_hh.T, ((0, Hp - H), (0, 0))), H, Hp)
        bias_p = _pad_gate_cols((b_ih + b_hh).reshape(1, 4 * H), H, Hp)
        if layer == num_layers - 1:
            pw_p = jnp.pad(pred_w.T, ((0, Hp - H), (0, Op - O)))
            pb_p = jnp.pad(pred_b.reshape(1, O), ((0, 0), (0, Op - O)))
            hid_p, logit_p = lstm_layer_pred(x, wih_p, whh_p, bias_p, pw_p, pb_p,
                                             time_block=TT)
        else:
            # TODO(synk): chain all layers inside one pallas_call (stacked weights +
            # layer grid axis) to drop the (Tp,Bp,Hp) HBM round trip per layer boundary.
            x = lstm_layer(x, wih_p, whh_p, bias_p, time_block=TT)

    hidden = jnp.transpose(hid_p[:T, :B, :H], (1, 0, 2))           # (B, T, H)
    logits = jnp.transpose(logit_p[:T, :B, :O], (1, 0, 2))         # (B, T, O)
    return hidden, logits


# ------------------------------ pure-JAX reference ----------------------------

def frm_lstm_reference(feat, lstm_params, pred_w, pred_b):
    B = feat.shape[0]
    x = feat
    for (w_ih, w_hh, b_ih, b_hh) in lstm_params:
        H = w_hh.shape[1]

        def step(carry, xt):
            h, c = carry
            gates = xt @ w_ih.T + h @ w_hh.T + b_ih + b_hh
            i, f, g, o = jnp.split(gates, 4, axis=-1)
            c = jax.nn.sigmoid(f) * c + jax.nn.sigmoid(i) * jnp.tanh(g)
            h = jax.nn.sigmoid(o) * jnp.tanh(c)
            return (h, c), h

        h0 = jnp.zeros((B, H), jnp.float32)
        c0 = jnp.zeros((B, H), jnp.float32)
        _, hs = jax.lax.scan(step, (h0, c0), jnp.transpose(x, (1, 0, 2)))
        x = jnp.transpose(hs, (1, 0, 2))
    hidden = x
    logits = hidden @ pred_w.T + pred_b
    return hidden, logits


# ----------------------------------- main --------------------------------------

if __name__ == "__main__":
    B, T = 2, 8
    input_size, hidden_size, output_size, num_layers = 16, 32, 10, 2

    key = jax.random.PRNGKey(0)
    k_feat, key = jax.random.split(key)
    feat = jax.random.normal(k_feat, (B, T, input_size), dtype=jnp.float32)

    # Deterministic PyTorch-style uniform(-1/sqrt(H), 1/sqrt(H)) init, PyTorch layout.
    bound = 1.0 / (hidden_size ** 0.5)
    lstm_params = []
    for layer in range(num_layers):
        D = input_size if layer == 0 else hidden_size
        k1, k2, k3, k4, key = jax.random.split(key, 5)
        w_ih = jax.random.uniform(k1, (4 * hidden_size, D), jnp.float32, -bound, bound)
        w_hh = jax.random.uniform(k2, (4 * hidden_size, hidden_size), jnp.float32, -bound, bound)
        b_ih = jax.random.uniform(k3, (4 * hidden_size,), jnp.float32, -bound, bound)
        b_hh = jax.random.uniform(k4, (4 * hidden_size,), jnp.float32, -bound, bound)
        lstm_params.append((w_ih, w_hh, b_ih, b_hh))

    k5, k6, key = jax.random.split(key, 3)
    pred_w = jax.random.uniform(k5, (output_size, hidden_size), jnp.float32, -bound, bound)
    pred_b = jax.random.uniform(k6, (output_size,), jnp.float32, -bound, bound)

    fwd = jax.jit(functools.partial(frm_lstm_forward, time_block=16))
    hidden, logits = fwd(feat, lstm_params, pred_w, pred_b)
    jax.block_until_ready((hidden, logits))

    # Sanity check against a pure-JAX reference.
    hidden_ref, logits_ref = frm_lstm_reference(feat, lstm_params, pred_w, pred_b)
    assert hidden.shape == (B, T, hidden_size)
    assert logits.shape == (B, T, output_size)
    assert jnp.allclose(hidden, hidden_ref, atol=1e-4), "hidden mismatch"
    assert jnp.allclose(logits, logits_ref, atol=1e-4), "logits mismatch"

    print("KERNEL_OK")
</pallas_src>

<mosaic_0001>
module attributes {stable_mosaic.version = 11 : i64} {
  func.func @_lstm_block_kernel(%arg0: i32, %arg1: memref<8x8x128xf32, #tpu.memory_space<vmem>>, %arg2: memref<128x512xf32, #tpu.memory_space<vmem>>, %arg3: memref<128x512xf32, #tpu.memory_space<vmem>>, %arg4: memref<1x512xf32, #tpu.memory_space<vmem>>, %arg5: memref<8x8x128xf32, #tpu.memory_space<vmem>>, %arg6: memref<8x128xf32, #tpu.memory_space<vmem>>, %arg7: memref<8x128xf32, #tpu.memory_space<vmem>>) attributes {dimension_semantics = [#tpu.dimension_semantics<arbitrary>], iteration_bounds = array<i64: 1>, scalar_prefetch = 0 : i64, scratch_operands = 2 : i64, tpu.core_type = #tpu.core_type<tc>, window_params = [{transform_indices = @transform_0, window_bounds = array<i64: 8, 8, 128>}, {pipeline_mode = #tpu.pipeline_mode<synchronous>, transform_indices = @transform_1, window_bounds = array<i64: 128, 512>}, {pipeline_mode = #tpu.pipeline_mode<synchronous>, transform_indices = @transform_2, window_bounds = array<i64: 128, 512>}, {pipeline_mode = #tpu.pipeline_mode<synchronous>, transform_indices = @transform_3, window_bounds = array<i64: 1, 512>}, {transform_indices = @transform_4, window_bounds = array<i64: 8, 8, 128>}]} {
    %c0_i32 = arith.constant 0 : i32
    %0 = arith.cmpi eq, %arg0, %c0_i32 : i32
    %1 = arith.extui %0 : i1 to i32
    %c0_i32_0 = arith.constant 0 : i32
    %2 = arith.cmpi ne, %1, %c0_i32_0 : i32
    scf.if %2 {
      %cst_66 = arith.constant 0.000000e+00 : f32
      %263 = vector.broadcast %cst_66 : f32 to vector<8x128xf32>
      %c0_67 = arith.constant 0 : index
      %c0_68 = arith.constant 0 : index
      %264 = vector.load %arg6[%c0_67, %c0_68] : memref<8x128xf32, #tpu.memory_space<vmem>>, vector<8x128xf32>
      tpu.vector_store %arg6[%c0_67, %c0_68], %263 {strides = array<i32>} : memref<8x128xf32, #tpu.memory_space<vmem>>, vector<8x128xf32>,
      %cst_69 = arith.constant 0.000000e+00 : f32
      %265 = vector.broadcast %cst_69 : f32 to vector<8x128xf32>
      %c0_70 = arith.constant 0 : index
      %c0_71 = arith.constant 0 : index
      %266 = vector.load %arg7[%c0_70, %c0_71] : memref<8x128xf32, #tpu.memory_space<vmem>>, vector<8x128xf32>
      tpu.vector_store %arg7[%c0_70, %c0_71], %265 {strides = array<i32>} : memref<8x128xf32, #tpu.memory_space<vmem>>, vector<8x128xf32>,
    } else {
    }
    %c0 = arith.constant 0 : index
    %c0_1 = arith.constant 0 : index
    %c0_2 = arith.constant 0 : index
    %3 = vector.load %arg1[%c0, %c0_1, %c0_2] : memref<8x8x128xf32, #tpu.memory_space<vmem>>, vector<8x8x128xf32>
    %4 = vector.shape_cast %3 : vector<8x8x128xf32> to vector<64x128xf32>
    %c0_3 = arith.constant 0 : index
    %c0_4 = arith.constant 0 : index
    %5 = vector.load %arg2[%c0_3, %c0_4] : memref<128x512xf32, #tpu.memory_space<vmem>>, vector<128x512xf32>
    %cst = arith.constant dense<0.000000e+00> : vector<64x512xf32>
    %6 = tpu.matmul %4, %5, %cst {dimension_numbers = #tpu.dot_dimension_numbers<[1], [0], [0], [1], [0, 0, 1, 1], [], []>} : vector<64x128xf32>, vector<128x512xf32>, vector<64x512xf32> -> vector<64x512xf32>
    %c0_5 = arith.constant 0 : index
    %c0_6 = arith.constant 0 : index
    %7 = vector.load %arg4[%c0_5, %c0_6] : memref<1x512xf32, #tpu.memory_space<vmem>>, vector<1x512xf32>
    %8 = vector.broadcast %7 : vector<1x512xf32> to vector<64x512xf32>
    %9 = arith.addf %6, %8 : vector<64x512xf32>
    %c0_7 = arith.constant 0 : index
    %c0_8 = arith.constant 0 : index
    %10 = vector.load %arg3[%c0_7, %c0_8] : memref<128x512xf32, #tpu.memory_space<vmem>>, vector<128x512xf32>
    %c0_9 = arith.constant 0 : index
    %c0_10 = arith.constant 0 : index
    %11 = vector.load %arg6[%c0_9, %c0_10] : memref<8x128xf32, #tpu.memory_space<vmem>>, vector<8x128xf32>
    %c0_11 = arith.constant 0 : index
    %c0_12 = arith.constant 0 : index
    %12 = vector.load %arg7[%c0_11, %c0_12] : memref<8x128xf32, #tpu.memory_space<vmem>>, vector<8x128xf32>
    %13 = vector.extract_strided_slice %9 {offsets = [0, 0], sizes = [8, 512], strides = [1, 1]} : vector<64x512xf32> to vector<8x512xf32>
    %cst_13 = arith.constant dense<0.000000e+00> : vector<8x512xf32>
    %14 = tpu.matmul %11, %10, %cst_13 {dimension_numbers = #tpu.dot_dimension_numbers<[1], [0], [0], [1], [0, 0, 1, 1], [], []>} : vector<8x128xf32>, vector<128x512xf32>, vector<8x512xf32> -> vector<8x512xf32>
    %15 = arith.addf %13, %14 : vector<8x512xf32>
    %16 = vector.extract_strided_slice %15 {offsets = [0, 0], sizes = [8, 128], strides = [1, 1]} : vector<8x512xf32> to vector<8x128xf32>
    %17 = arith.negf %16 : vector<8x128xf32>
    %18 = math.exp %17 : vector<8x128xf32>
    %cst_14 = arith.constant 1.000000e+00 : f32
    %19 = vector.broadcast %cst_14 : f32 to vector<8x128xf32>
    %20 = arith.addf %19, %18 : vector<8x128xf32>
    %21 = arith.divf %19, %20 : vector<8x128xf32>
    %22 = vector.extract_strided_slice %15 {offsets = [0, 128], sizes = [8, 128], strides = [1, 1]} : vector<8x512xf32> to vector<8x128xf32>
    %23 = arith.negf %22 : vector<8x128xf32>
    %24 = math.exp %23 : vector<8x128xf32>
    %cst_15 = arith.constant 1.000000e+00 : f32
    %25 = vector.broadcast %cst_15 : f32 to vector<8x128xf32>
    %26 = arith.addf %25, %24 : vector<8x128xf32>
    %27 = arith.divf %25, %26 : vector<8x128xf32>
    %28 = vector.extract_strided_slice %15 {offsets = [0, 256], sizes = [8, 128], strides = [1, 1]} : vector<8x512xf32> to vector<8x128xf32>
    %29 = math.tanh %28 : vector<8x128xf32>
    %30 = vector.extract_strided_slice %15 {offsets = [0, 384], sizes = [8, 128], strides = [1, 1]} : vector<8x512xf32> to vector<8x128xf32>
    %31 = arith.negf %30 : vector<8x128xf32>
    %32 = math.exp %31 : vector<8x128xf32>
    %cst_16 = arith.constant 1.000000e+00 : f32
    %33 = vector.broadcast %cst_16 : f32 to vector<8x128xf32>
    %34 = arith.addf %33, %32 : vector<8x128xf32>
    %35 = arith.divf %33, %34 : vector<8x128xf32>
    %36 = arith.mulf %27, %12 : vector<8x128xf32>
    %37 = arith.mulf %21, %29 : vector<8x128xf32>
    %38 = arith.addf %36, %37 : vector<8x128xf32>
    %39 = math.tanh %38 : vector<8x128xf32>
    %40 = arith.mulf %35, %39 : vector<8x128xf32>
    %c0_17 = arith.constant 0 : index
    %c0_18 = arith.constant 0 : index
    %c0_19 = arith.constant 0 : index
    %41 = vector.load %arg5[%c0_17, %c0_18, %c0_19] : memref<8x8x128xf32, #tpu.memory_space<vmem>>, vector<1x8x128xf32>
    %42 = vector.shape_cast %41 : vector<1x8x128xf32> to vector<8x128xf32>
    %43 = vector.shape_cast %40 : vector<8x128xf32> to vector<1x8x128xf32>
    tpu.vector_store %arg5[%c0_17, %c0_18, %c0_19], %43 {strides = array<i32>} : memref<8x8x128xf32, #tpu.memory_space<vmem>>, vector<1x8x128xf32>,
    %44 = vector.extract_strided_slice %9 {offsets = [8, 0], sizes = [8, 512], strides = [1, 1]} : vector<64x512xf32> to vector<8x512xf32>
    %cst_20 = arith.constant dense<0.000000e+00> : vector<8x512xf32>
    %45 = tpu.matmul %40, %10, %cst_20 {dimension_numbers = #tpu.dot_dimension_numbers<[1], [0], [0], [1], [0, 0, 1, 1], [], []>} : vector<8x128xf32>, vector<128x512xf32>, vector<8x512xf32> -> vector<8x512xf32>
    %46 = arith.addf %44, %45 : vector<8x512xf32>
    %47 = vector.extract_strided_slice %46 {offsets = [0, 0], sizes = [8, 128], strides = [1, 1]} : vector<8x512xf32> to vector<8x128xf32>
    %48 = arith.negf %47 : vector<8x128xf32>
    %49 = math.exp %48 : vector<8x128xf32>
    %cst_21 = arith.constant 1.000000e+00 : f32
    %50 = vector.broadcast %cst_21 : f32 to vector<8x128xf32>
    %51 = arith.addf %50, %49 : vector<8x128xf32>
    %52 = arith.divf %50, %51 : vector<8x128xf32>
    %53 = vector.extract_strided_slice %46 {offsets = [0, 128], sizes = [8, 128], strides = [1, 1]} : vector<8x512xf32> to vector<8x128xf32>
    %54 = arith.negf %53 : vector<8x128xf32>
    %55 = math.exp %54 : vector<8x128xf32>
    %cst_22 = arith.constant 1.000000e+00 : f32
    %56 = vector.broadcast %cst_22 : f32 to vector<8x128xf32>
    %57 = arith.addf %56, %55 : vector<8x128xf32>
    %58 = arith.divf %56, %57 : vector<8x128xf32>
    %59 = vector.extract_strided_slice %46 {offsets = [0, 256], sizes = [8, 128], strides = [1, 1]} : vector<8x512xf32> to vector<8x128xf32>
    %60 = math.tanh %59 : vector<8x128xf32>
    %61 = vector.extract_strided_slice %46 {offsets = [0, 384], sizes = [8, 128], strides = [1, 1]} : vector<8x512xf32> to vector<8x128xf32>
    %62 = arith.negf %61 : vector<8x128xf32>
    %63 = math.exp %62 : vector<8x128xf32>
    %cst_23 = arith.constant 1.000000e+00 : f32
    %64 = vector.broadcast %cst_23 : f32 to vector<8x128xf32>
    %65 = arith.addf %64, %63 : vector<8x128xf32>
    %66 = arith.divf %64, %65 : vector<8x128xf32>
    %67 = arith.mulf %58, %38 : vector<8x128xf32>
    %68 = arith.mulf %52, %60 : vector<8x128xf32>
    %69 = arith.addf %67, %68 : vector<8x128xf32>
    %70 = math.tanh %69 : vector<8x128xf32>
    %71 = arith.mulf %66, %70 : vector<8x128xf32>
    %c1 = arith.constant 1 : index
    %c0_24 = arith.constant 0 : index
    %c0_25 = arith.constant 0 : index
    %72 = vector.load %arg5[%c1, %c0_24, %c0_25] : memref<8x8x128xf32, #tpu.memory_space<vmem>>, vector<1x8x128xf32>
    %73 = vector.shape_cast %72 : vector<1x8x128xf32> to vector<8x128xf32>
    %74 = vector.shape_cast %71 : vector<8x128xf32> to vector<1x8x128xf32>
    tpu.vector_store %arg5[%c1, %c0_24, %c0_25], %74 {strides = array<i32>} : memref<8x8x128xf32, #tpu.memory_space<vmem>>, vector<1x8x128xf32>,
    %75 = vector.extract_strided_slice %9 {offsets = [16, 0], sizes = [8, 512], strides = [1, 1]} : vector<64x512xf32> to vector<8x512xf32>
    %cst_26 = arith.constant dense<0.000000e+00> : vector<8x512xf32>
    %76 = tpu.matmul %71, %10, %cst_26 {dimension_numbers = #tpu.dot_dimension_numbers<[1], [0], [0], [1], [0, 0, 1, 1], [], []>} : vector<8x128xf32>, vector<128x512xf32>, vector<8x512xf32> -> vector<8x512xf32>
    %77 = arith.addf %75, %76 : vector<8x512xf32>
    %78 = vector.extract_strided_slice %77 {offsets = [0, 0], sizes = [8, 128], strides = [1, 1]} : vector<8x512xf32> to vector<8x128xf32>
    %79 = arith.negf %78 : vector<8x128xf32>
    %80 = math.exp %79 : vector<8x128xf32>
    %cst_27 = arith.constant 1.000000e+00 : f32
    %81 = vector.broadcast %cst_27 : f32 to vector<8x128xf32>
    %82 = arith.addf %81, %80 : vector<8x128xf32>
    %83 = arith.divf %81, %82 : vector<8x128xf32>
    %84 = vector.extract_strided_slice %77 {offsets = [0, 128], sizes = [8, 128], strides = [1, 1]} : vector<8x512xf32> to vector<8x128xf32>
    %85 = arith.negf %84 : vector<8x128xf32>
    %86 = math.exp %85 : vector<8x128xf32>
    %cst_28 = arith.constant 1.000000e+00 : f32
    %87 = vector.broadcast %cst_28 : f32 to vector<8x128xf32>
    %88 = arith.addf %87, %86 : vector<8x128xf32>
    %89 = arith.divf %87, %88 : vector<8x128xf32>
    %90 = vector.extract_strided_slice %77 {offsets = [0, 256], sizes = [8, 128], strides = [1, 1]} : vector<8x512xf32> to vector<8x128xf32>
    %91 = math.tanh %90 : vector<8x128xf32>
    %92 = vector.extract_strided_slice %77 {offsets = [0, 384], sizes = [8, 128], strides = [1, 1]} : vector<8x512xf32> to vector<8x128xf32>
    %93 = arith.negf %92 : vector<8x128xf32>
    %94 = math.exp %93 : vector<8x128xf32>
    %cst_29 = arith.constant 1.000000e+00 : f32
    %95 = vector.broadcast %cst_29 : f32 to vector<8x128xf32>
    %96 = arith.addf %95, %94 : vector<8x128xf32>
    %97 = arith.divf %95, %96 : vector<8x128xf32>
    %98 = arith.mulf %89, %69 : vector<8x128xf32>
    %99 = arith.mulf %83, %91 : vector<8x128xf32>
    %100 = arith.addf %98, %99 : vector<8x128xf32>
    %101 = math.tanh %100 : vector<8x128xf32>
    %102 = arith.mulf %97, %101 : vector<8x128xf32>
    %c2 = arith.constant 2 : index
    %c0_30 = arith.constant 0 : index
    %c0_31 = arith.constant 0 : index
    %103 = vector.load %arg5[%c2, %c0_30, %c0_31] : memref<8x8x128xf32, #tpu.memory_space<vmem>>, vector<1x8x128xf32>
    %104 = vector.shape_cast %103 : vector<1x8x128xf32> to vector<8x128xf32>
    %105 = vector.shape_cast %102 : vector<8x128xf32> to vector<1x8x128xf32>
    tpu.vector_store %arg5[%c2, %c0_30, %c0_31], %105 {strides = array<i32>} : memref<8x8x128xf32, #tpu.memory_space<vmem>>, vector<1x8x128xf32>,
    %106 = vector.extract_strided_slice %9 {offsets = [24, 0], sizes = [8, 512], strides = [1, 1]} : vector<64x512xf32> to vector<8x512xf32>
    %cst_32 = arith.constant dense<0.000000e+00> : vector<8x512xf32>
    %107 = tpu.matmul %102, %10, %cst_32 {dimension_numbers = #tpu.dot_dimension_numbers<[1], [0], [0], [1], [0, 0, 1, 1], [], []>} : vector<8x128xf32>, vector<128x512xf32>, vector<8x512xf32> -> vector<8x512xf32>
    %108 = arith.addf %106, %107 : vector<8x512xf32>
    %109 = vector.extract_strided_slice %108 {offsets = [0, 0], sizes = [8, 128], strides = [1, 1]} : vector<8x512xf32> to vector<8x128xf32>
    %110 = arith.negf %109 : vector<8x128xf32>
    %111 = math.exp %110 : vector<8x128xf32>
    %cst_33 = arith.constant 1.000000e+00 : f32
    %112 = vector.broadcast %cst_33 : f32 to vector<8x128xf32>
    %113 = arith.addf %112, %111 : vector<8x128xf32>
    %114 = arith.divf %112, %113 : vector<8x128xf32>
    %115 = vector.extract_strided_slice %108 {offsets = [0, 128], sizes = [8, 128], strides = [1, 1]} : vector<8x512xf32> to vector<8x128xf32>
    %116 = arith.negf %115 : vector<8x128xf32>
    %117 = math.exp %116 : vector<8x128xf32>
    %cst_34 = arith.constant 1.000000e+00 : f32
    %118 = vector.broadcast %cst_34 : f32 to vector<8x128xf32>
    %119 = arith.addf %118, %117 : vector<8x128xf32>
    %120 = arith.divf %118, %119 : vector<8x128xf32>
    %121 = vector.extract_strided_slice %108 {offsets = [0, 256], sizes = [8, 128], strides = [1, 1]} : vector<8x512xf32> to vector<8x128xf32>
    %122 = math.tanh %121 : vector<8x128xf32>
    %123 = vector.extract_strided_slice %108 {offsets = [0, 384], sizes = [8, 128], strides = [1, 1]} : vector<8x512xf32> to vector<8x128xf32>
    %124 = arith.negf %123 : vector<8x128xf32>
    %125 = math.exp %124 : vector<8x128xf32>
    %cst_35 = arith.constant 1.000000e+00 : f32
    %126 = vector.broadcast %cst_35 : f32 to vector<8x128xf32>
    %127 = arith.addf %126, %125 : vector<8x128xf32>
    %128 = arith.divf %126, %127 : vector<8x128xf32>
    %129 = arith.mulf %120, %100 : vector<8x128xf32>
    %130 = arith.mulf %114, %122 : vector<8x128xf32>
    %131 = arith.addf %129, %130 : vector<8x128xf32>
    %132 = math.tanh %131 : vector<8x128xf32>
    %133 = arith.mulf %128, %132 : vector<8x128xf32>
    %c3 = arith.constant 3 : index
    %c0_36 = arith.constant 0 : index
    %c0_37 = arith.constant 0 : index
    %134 = vector.load %arg5[%c3, %c0_36, %c0_37] : memref<8x8x128xf32, #tpu.memory_space<vmem>>, vector<1x8x128xf32>
    %135 = vector.shape_cast %134 : vector<1x8x128xf32> to vector<8x128xf32>
    %136 = vector.shape_cast %133 : vector<8x128xf32> to vector<1x8x128xf32>
    tpu.vector_store %arg5[%c3, %c0_36, %c0_37], %136 {strides = array<i32>} : memref<8x8x128xf32, #tpu.memory_space<vmem>>, vector<1x8x128xf32>,
    %137 = vector.extract_strided_slice %9 {offsets = [32, 0], sizes = [8, 512], strides = [1, 1]} : vector<64x512xf32> to vector<8x512xf32>
    %cst_38 = arith.constant dense<0.000000e+00> : vector<8x512xf32>
    %138 = tpu.matmul %133, %10, %cst_38 {dimension_numbers = #tpu.dot_dimension_numbers<[1], [0], [0], [1], [0, 0, 1, 1], [], []>} : vector<8x128xf32>, vector<128x512xf32>, vector<8x512xf32> -> vector<8x512xf32>
    %139 = arith.addf %137, %138 : vector<8x512xf32>
    %140 = vector.extract_strided_slice %139 {offsets = [0, 0], sizes = [8, 128], strides = [1, 1]} : vector<8x512xf32> to vector<8x128xf32>
    %141 = arith.negf %140 : vector<8x128xf32>
    %142 = math.exp %141 : vector<8x128xf32>
    %cst_39 = arith.constant 1.000000e+00 : f32
    %143 = vector.broadcast %cst_39 : f32 to vector<8x128xf32>
    %144 = arith.addf %143, %142 : vector<8x128xf32>
    %145 = arith.divf %143, %144 : vector<8x128xf32>
    %146 = vector.extract_strided_slice %139 {offsets = [0, 128], sizes = [8, 128], strides = [1, 1]} : vector<8x512xf32> to vector<8x128xf32>
    %147 = arith.negf %146 : vector<8x128xf32>
    %148 = math.exp %147 : vector<8x128xf32>
    %cst_40 = arith.constant 1.000000e+00 : f32
    %149 = vector.broadcast %cst_40 : f32 to vector<8x128xf32>
    %150 = arith.addf %149, %148 : vector<8x128xf32>
    %151 = arith.divf %149, %150 : vector<8x128xf32>
    %152 = vector.extract_strided_slice %139 {offsets = [0, 256], sizes = [8, 128], strides = [1, 1]} : vector<8x512xf32> to vector<8x128xf32>
    %153 = math.tanh %152 : vector<8x128xf32>
    %154 = vector.extract_strided_slice %139 {offsets = [0, 384], sizes = [8, 128], strides = [1, 1]} : vector<8x512xf32> to vector<8x128xf32>
    %155 = arith.negf %154 : vector<8x128xf32>
    %156 = math.exp %155 : vector<8x128xf32>
    %cst_41 = arith.constant 1.000000e+00 : f32
    %157 = vector.broadcast %cst_41 : f32 to vector<8x128xf32>
    %158 = arith.addf %157, %156 : vector<8x128xf32>
    %159 = arith.divf %157, %158 : vector<8x128xf32>
    %160 = arith.mulf %151, %131 : vector<8x128xf32>
    %161 = arith.mulf %145, %153 : vector<8x128xf32>
    %162 = arith.addf %160, %161 : vector<8x128xf32>
    %163 = math.tanh %162 : vector<8x128xf32>
    %164 = arith.mulf %159, %163 : vector<8x128xf32>
    %c4 = arith.constant 4 : index
    %c0_42 = arith.constant 0 : index
    %c0_43 = arith.constant 0 : index
    %165 = vector.load %arg5[%c4, %c0_42, %c0_43] : memref<8x8x128xf32, #tpu.memory_space<vmem>>, vector<1x8x128xf32>
    %166 = vector.shape_cast %165 : vector<1x8x128xf32> to vector<8x128xf32>
    %167 = vector.shape_cast %164 : vector<8x128xf32> to vector<1x8x128xf32>
    tpu.vector_store %arg5[%c4, %c0_42, %c0_43], %167 {strides = array<i32>} : memref<8x8x128xf32, #tpu.memory_space<vmem>>, vector<1x8x128xf32>,
    %168 = vector.extract_strided_slice %9 {offsets = [40, 0], sizes = [8, 512], strides = [1, 1]} : vector<64x512xf32> to vector<8x512xf32>
    %cst_44 = arith.constant dense<0.000000e+00> : vector<8x512xf32>
    %169 = tpu.matmul %164, %10, %cst_44 {dimension_numbers = #tpu.dot_dimension_numbers<[1], [0], [0], [1], [0, 0, 1, 1], [], []>} : vector<8x128xf32>, vector<128x512xf32>, vector<8x512xf32> -> vector<8x512xf32>
    %170 = arith.addf %168, %169 : vector<8x512xf32>
    %171 = vector.extract_strided_slice %170 {offsets = [0, 0], sizes = [8, 128], strides = [1, 1]} : vector<8x512xf32> to vector<8x128xf32>
    %172 = arith.negf %171 : vector<8x128xf32>
    %173 = math.exp %172 : vector<8x128xf32>
    %cst_45 = arith.constant 1.000000e+00 : f32
    %174 = vector.broadcast %cst_45 : f32 to vector<8x128xf32>
    %175 = arith.addf %174, %173 : vector<8x128xf32>
    %176 = arith.divf %174, %175 : vector<8x128xf32>
    %177 = vector.extract_strided_slice %170 {offsets = [0, 128], sizes = [8, 128], strides = [1, 1]} : vector<8x512xf32> to vector<8x128xf32>
    %178 = arith.negf %177 : vector<8x128xf32>
    %179 = math.exp %178 : vector<8x128xf32>
    %cst_46 = arith.constant 1.000000e+00 : f32
    %180 = vector.broadcast %cst_46 : f32 to vector<8x128xf32>
    %181 = arith.addf %180, %179 : vector<8x128xf32>
    %182 = arith.divf %180, %181 : vector<8x128xf32>
    %183 = vector.extract_strided_slice %170 {offsets = [0, 256], sizes = [8, 128], strides = [1, 1]} : vector<8x512xf32> to vector<8x128xf32>
    %184 = math.tanh %183 : vector<8x128xf32>
    %185 = vector.extract_strided_slice %170 {offsets = [0, 384], sizes = [8, 128], strides = [1, 1]} : vector<8x512xf32> to vector<8x128xf32>
    %186 = arith.negf %185 : vector<8x128xf32>
    %187 = math.exp %186 : vector<8x128xf32>
    %cst_47 = arith.constant 1.000000e+00 : f32
    %188 = vector.broadcast %cst_47 : f32 to vector<8x128xf32>
    %189 = arith.addf %188, %187 : vector<8x128xf32>
    %190 = arith.divf %188, %189 : vector<8x128xf32>
    %191 = arith.mulf %182, %162 : vector<8x128xf32>
    %192 = arith.mulf %176, %184 : vector<8x128xf32>
    %193 = arith.addf %191, %192 : vector<8x128xf32>
    %194 = math.tanh %193 : vector<8x128xf32>
    %195 = arith.mulf %190, %194 : vector<8x128xf32>
    %c5 = arith.constant 5 : index
    %c0_48 = arith.constant 0 : index
    %c0_49 = arith.constant 0 : index
    %196 = vector.load %arg5[%c5, %c0_48, %c0_49] : memref<8x8x128xf32, #tpu.memory_space<vmem>>, vector<1x8x128xf32>
    %197 = vector.shape_cast %196 : vector<1x8x128xf32> to vector<8x128xf32>
    %198 = vector.shape_cast %195 : vector<8x128xf32> to vector<1x8x128xf32>
    tpu.vector_store %arg5[%c5, %c0_48, %c0_49], %198 {strides = array<i32>} : memref<8x8x128xf32, #tpu.memory_space<vmem>>, vector<1x8x128xf32>,
    %199 = vector.extract_strided_slice %9 {offsets = [48, 0], sizes = [8, 512], strides = [1, 1]} : vector<64x512xf32> to vector<8x512xf32>
    %cst_50 = arith.constant dense<0.000000e+00> : vector<8x512xf32>
    %200 = tpu.matmul %195, %10, %cst_50 {dimension_numbers = #tpu.dot_dimension_numbers<[1], [0], [0], [1], [0, 0, 1, 1], [], []>} : vector<8x128xf32>, vector<128x512xf32>, vector<8x512xf32> -> vector<8x512xf32>
    %201 = arith.addf %199, %200 : vector<8x512xf32>
    %202 = vector.extract_strided_slice %201 {offsets = [0, 0], sizes = [8, 128], strides = [1, 1]} : vector<8x512xf32> to vector<8x128xf32>
    %203 = arith.negf %202 : vector<8x128xf32>
    %204 = math.exp %203 : vector<8x128xf32>
    %cst_51 = arith.constant 1.000000e+00 : f32
    %205 = vector.broadcast %cst_51 : f32 to vector<8x128xf32>
    %206 = arith.addf %205, %204 : vector<8x128xf32>
    %207 = arith.divf %205, %206 : vector<8x128xf32>
    %208 = vector.extract_strided_slice %201 {offsets = [0, 128], sizes = [8, 128], strides = [1, 1]} : vector<8x512xf32> to vector<8x128xf32>
    %209 = arith.negf %208 : vector<8x128xf32>
    %210 = math.exp %209 : vector<8x128xf32>
    %cst_52 = arith.constant 1.000000e+00 : f32
    %211 = vector.broadcast %cst_52 : f32 to vector<8x128xf32>
    %212 = arith.addf %211, %210 : vector<8x128xf32>
    %213 = arith.divf %211, %212 : vector<8x128xf32>
    %214 = vector.extract_strided_slice %201 {offsets = [0, 256], sizes = [8, 128], strides = [1, 1]} : vector<8x512xf32> to vector<8x128xf32>
    %215 = math.tanh %214 : vector<8x128xf32>
    %216 = vector.extract_strided_slice %201 {offsets = [0, 384], sizes = [8, 128], strides = [1, 1]} : vector<8x512xf32> to vector<8x128xf32>
    %217 = arith.negf %216 : vector<8x128xf32>
    %218 = math.exp %217 : vector<8x128xf32>
    %cst_53 = arith.constant 1.000000e+00 : f32
    %219 = vector.broadcast %cst_53 : f32 to vector<8x128xf32>
    %220 = arith.addf %219, %218 : vector<8x128xf32>
    %221 = arith.divf %219, %220 : vector<8x128xf32>
    %222 = arith.mulf %213, %193 : vector<8x128xf32>
    %223 = arith.mulf %207, %215 : vector<8x128xf32>
    %224 = arith.addf %222, %223 : vector<8x128xf32>
    %225 = math.tanh %224 : vector<8x128xf32>
    %226 = arith.mulf %221, %225 : vector<8x128xf32>
    %c6 = arith.constant 6 : index
    %c0_54 = arith.constant 0 : index
    %c0_55 = arith.constant 0 : index
    %227 = vector.load %arg5[%c6, %c0_54, %c0_55] : memref<8x8x128xf32, #tpu.memory_space<vmem>>, vector<1x8x128xf32>
    %228 = vector.shape_cast %227 : vector<1x8x128xf32> to vector<8x128xf32>
    %229 = vector.shape_cast %226 : vector<8x128xf32> to vector<1x8x128xf32>
    tpu.vector_store %arg5[%c6, %c0_54, %c0_55], %229 {strides = array<i32>} : memref<8x8x128xf32, #tpu.memory_space<vmem>>, vector<1x8x128xf32>,
    %230 = vector.extract_strided_slice %9 {offsets = [56, 0], sizes = [8, 512], strides = [1, 1]} : vector<64x512xf32> to vector<8x512xf32>
    %cst_56 = arith.constant dense<0.000000e+00> : vector<8x512xf32>
    %231 = tpu.matmul %226, %10, %cst_56 {dimension_numbers = #tpu.dot_dimension_numbers<[1], [0], [0], [1], [0, 0, 1, 1], [], []>} : vector<8x128xf32>, vector<128x512xf32>, vector<8x512xf32> -> vector<8x512xf32>
    %232 = arith.addf %230, %231 : vector<8x512xf32>
    %233 = vector.extract_strided_slice %232 {offsets = [0, 0], sizes = [8, 128], strides = [1, 1]} : vector<8x512xf32> to vector<8x128xf32>
    %234 = arith.negf %233 : vector<8x128xf32>
    %235 = math.exp %234 : vector<8x128xf32>
    %cst_57 = arith.constant 1.000000e+00 : f32
    %236 = vector.broadcast %cst_57 : f32 to vector<8x128xf32>
    %237 = arith.addf %236, %235 : vector<8x128xf32>
    %238 = arith.divf %236, %237 : vector<8x128xf32>
    %239 = vector.extract_strided_slice %232 {offsets = [0, 128], sizes = [8, 128], strides = [1, 1]} : vector<8x512xf32> to vector<8x128xf32>
    %240 = arith.negf %239 : vector<8x128xf32>
    %241 = math.exp %240 : vector<8x128xf32>
    %cst_58 = arith.constant 1.000000e+00 : f32
    %242 = vector.broadcast %cst_58 : f32 to vector<8x128xf32>
    %243 = arith.addf %242, %241 : vector<8x128xf32>
    %244 = arith.divf %242, %243 : vector<8x128xf32>
    %245 = vector.extract_strided_slice %232 {offsets = [0, 256], sizes = [8, 128], strides = [1, 1]} : vector<8x512xf32> to vector<8x128xf32>
    %246 = math.tanh %245 : vector<8x128xf32>
    %247 = vector.extract_strided_slice %232 {offsets = [0, 384], sizes = [8, 128], strides = [1, 1]} : vector<8x512xf32> to vector<8x128xf32>
    %248 = arith.negf %247 : vector<8x128xf32>
    %249 = math.exp %248 : vector<8x128xf32>
    %cst_59 = arith.constant 1.000000e+00 : f32
    %250 = vector.broadcast %cst_59 : f32 to vector<8x128xf32>
    %251 = arith.addf %250, %249 : vector<8x128xf32>
    %252 = arith.divf %250, %251 : vector<8x128xf32>
    %253 = arith.mulf %244, %224 : vector<8x128xf32>
    %254 = arith.mulf %238, %246 : vector<8x128xf32>
    %255 = arith.addf %253, %254 : vector<8x128xf32>
    %256 = math.tanh %255 : vector<8x128xf32>
    %257 = arith.mulf %252, %256 : vector<8x128xf32>
    %c7 = arith.constant 7 : index
    %c0_60 = arith.constant 0 : index
    %c0_61 = arith.constant 0 : index
    %258 = vector.load %arg5[%c7, %c0_60, %c0_61] : memref<8x8x128xf32, #tpu.memory_space<vmem>>, vector<1x8x128xf32>
    %259 = vector.shape_cast %258 : vector<1x8x128xf32> to vector<8x128xf32>
    %260 = vector.shape_cast %257 : vector<8x128xf32> to vector<1x8x128xf32>
    tpu.vector_store %arg5[%c7, %c0_60, %c0_61], %260 {strides = array<i32>} : memref<8x8x128xf32, #tpu.memory_space<vmem>>, vector<1x8x128xf32>,
    %c0_62 = arith.constant 0 : index
    %c0_63 = arith.constant 0 : index
    %261 = vector.load %arg6[%c0_62, %c0_63] : memref<8x128xf32, #tpu.memory_space<vmem>>, vector<8x128xf32>
    tpu.vector_store %arg6[%c0_62, %c0_63], %257 {strides = array<i32>} : memref<8x128xf32, #tpu.memory_space<vmem>>, vector<8x128xf32>,
    %c0_64 = arith.constant 0 : index
    %c0_65 = arith.constant 0 : index
    %262 = vector.load %arg7[%c0_64, %c0_65] : memref<8x128xf32, #tpu.memory_space<vmem>>, vector<8x128xf32>
    tpu.vector_store %arg7[%c0_64, %c0_65], %255 {strides = array<i32>} : memref<8x128xf32, #tpu.memory_space<vmem>>, vector<8x128xf32>,
    return
  }
  func.func @transform_0(%arg0: i32) -> (i32, i32, i32) {
    %c0_i32 = arith.constant 0 : i32
    %c0_i32_0 = arith.constant 0 : i32
    %c0_i32_1 = arith.constant 0 : i32
    return %arg0, %c0_i32, %c0_i32_0 : i32, i32, i32
  }
  func.func @transform_1(%arg0: i32) -> (i32, i32) {
    %c0_i32 = arith.constant 0 : i32
    %c0_i32_0 = arith.constant 0 : i32
    %c0_i32_1 = arith.constant 0 : i32
    return %c0_i32, %c0_i32_0 : i32, i32
  }
  func.func @transform_2(%arg0: i32) -> (i32, i32) {
    %c0_i32 = arith.constant 0 : i32
    %c0_i32_0 = arith.constant 0 : i32
    %c0_i32_1 = arith.constant 0 : i32
    return %c0_i32, %c0_i32_0 : i32, i32
  }
  func.func @transform_3(%arg0: i32) -> (i32, i32) {
    %c0_i32 = arith.constant 0 : i32
    %c0_i32_0 = arith.constant 0 : i32
    %c0_i32_1 = arith.constant 0 : i32
    return %c0_i32, %c0_i32_0 : i32, i32
  }
  func.func @transform_4(%arg0: i32) -> (i32, i32, i32) {
    %c0_i32 = arith.constant 0 : i32
    %c0_i32_0 = arith.constant 0 : i32
    %c0_i32_1 = arith.constant 0 : i32
    return %arg0, %c0_i32, %c0_i32_0 : i32, i32, i32
  }
}

module attributes {stable_mosaic.version = 11 : i64} {
  func.func @_lstm_block_pred_kernel(%arg0: i32, %arg1: memref<8x8x128xf32, #tpu.memory_space<vmem>>, %arg2: memref<128x512xf32, #tpu.memory_space<vmem>>, %arg3: memref<128x512xf32, #tpu.memory_space<vmem>>, %arg4: memref<1x512xf32, #tpu.memory_space<vmem>>, %arg5: memref<128x128xf32, #tpu.memory_space<vmem>>, %arg6: memref<1x128xf32, #tpu.memory_space<vmem>>, %arg7: memref<8x8x128xf32, #tpu.memory_space<vmem>>, %arg8: memref<8x8x128xf32, #tpu.memory_space<vmem>>, %arg9: memref<8x128xf32, #tpu.memory_space<vmem>>, %arg10: memref<8x128xf32, #tpu.memory_space<vmem>>) attributes {dimension_semantics = [#tpu.dimension_semantics<arbitrary>], iteration_bounds = array<i64: 1>, scalar_prefetch = 0 : i64, scratch_operands = 2 : i64, tpu.core_type = #tpu.core_type<tc>, window_params = [{transform_indices = @transform_0, window_bounds = array<i64: 8, 8, 128>}, {pipeline_mode = #tpu.pipeline_mode<synchronous>, transform_indices = @transform_1, window_bounds = array<i64: 128, 512>}, {pipeline_mode = #tpu.pipeline_mode<synchronous>, transform_indices = @transform_2, window_bounds = array<i64: 128, 512>}, {pipeline_mode = #tpu.pipeline_mode<synchronous>, transform_indices = @transform_3, window_bounds = array<i64: 1, 512>}, {pipeline_mode = #tpu.pipeline_mode<synchronous>, transform_indices = @transform_4, window_bounds = array<i64: 128, 128>}, {pipeline_mode = #tpu.pipeline_mode<synchronous>, transform_indices = @transform_5, window_bounds = array<i64: 1, 128>}, {transform_indices = @transform_6, window_bounds = array<i64: 8, 8, 128>}, {transform_indices = @transform_7, window_bounds = array<i64: 8, 8, 128>}]} {
    %c0_i32 = arith.constant 0 : i32
    %0 = arith.cmpi eq, %arg0, %c0_i32 : i32
    %1 = arith.extui %0 : i1 to i32
    %c0_i32_0 = arith.constant 0 : i32
    %2 = arith.cmpi ne, %1, %c0_i32_0 : i32
    scf.if %2 {
      %cst_77 = arith.constant 0.000000e+00 : f32
      %272 = vector.broadcast %cst_77 : f32 to vector<8x128xf32>
      %c0_78 = arith.constant 0 : index
      %c0_79 = arith.constant 0 : index
      %273 = vector.load %arg9[%c0_78, %c0_79] : memref<8x128xf32, #tpu.memory_space<vmem>>, vector<8x128xf32>
      tpu.vector_store %arg9[%c0_78, %c0_79], %272 {strides = array<i32>} : memref<8x128xf32, #tpu.memory_space<vmem>>, vector<8x128xf32>,
      %cst_80 = arith.constant 0.000000e+00 : f32
      %274 = vector.broadcast %cst_80 : f32 to vector<8x128xf32>
      %c0_81 = arith.constant 0 : index
      %c0_82 = arith.constant 0 : index
      %275 = vector.load %arg10[%c0_81, %c0_82] : memref<8x128xf32, #tpu.memory_space<vmem>>, vector<8x128xf32>
      tpu.vector_store %arg10[%c0_81, %c0_82], %274 {strides = array<i32>} : memref<8x128xf32, #tpu.memory_space<vmem>>, vector<8x128xf32>,
    } else {
    }
    %c0 = arith.constant 0 : index
    %c0_1 = arith.constant 0 : index
    %c0_2 = arith.constant 0 : index
    %3 = vector.load %arg1[%c0, %c0_1, %c0_2] : memref<8x8x128xf32, #tpu.memory_space<vmem>>, vector<8x8x128xf32>
    %4 = vector.shape_cast %3 : vector<8x8x128xf32> to vector<64x128xf32>
    %c0_3 = arith.constant 0 : index
    %c0_4 = arith.constant 0 : index
    %5 = vector.load %arg2[%c0_3, %c0_4] : memref<128x512xf32, #tpu.memory_space<vmem>>, vector<128x512xf32>
    %cst = arith.constant dense<0.000000e+00> : vector<64x512xf32>
    %6 = tpu.matmul %4, %5, %cst {dimension_numbers = #tpu.dot_dimension_numbers<[1], [0], [0], [1], [0, 0, 1, 1], [], []>} : vector<64x128xf32>, vector<128x512xf32>, vector<64x512xf32> -> vector<64x512xf32>
    %c0_5 = arith.constant 0 : index
    %c0_6 = arith.constant 0 : index
    %7 = vector.load %arg4[%c0_5, %c0_6] : memref<1x512xf32, #tpu.memory_space<vmem>>, vector<1x512xf32>
    %8 = vector.broadcast %7 : vector<1x512xf32> to vector<64x512xf32>
    %9 = arith.addf %6, %8 : vector<64x512xf32>
    %c0_7 = arith.constant 0 : index
    %c0_8 = arith.constant 0 : index
    %10 = vector.load %arg3[%c0_7, %c0_8] : memref<128x512xf32, #tpu.memory_space<vmem>>, vector<128x512xf32>
    %c0_9 = arith.constant 0 : index
    %c0_10 = arith.constant 0 : index
    %11 = vector.load %arg9[%c0_9, %c0_10] : memref<8x128xf32, #tpu.memory_space<vmem>>, vector<8x128xf32>
    %c0_11 = arith.constant 0 : index
    %c0_12 = arith.constant 0 : index
    %12 = vector.load %arg10[%c0_11, %c0_12] : memref<8x128xf32, #tpu.memory_space<vmem>>, vector<8x128xf32>
    %13 = vector.extract_strided_slice %9 {offsets = [0, 0], sizes = [8, 512], strides = [1, 1]} : vector<64x512xf32> to vector<8x512xf32>
    %cst_13 = arith.constant dense<0.000000e+00> : vector<8x512xf32>
    %14 = tpu.matmul %11, %10, %cst_13 {dimension_numbers = #tpu.dot_dimension_numbers<[1], [0], [0], [1], [0, 0, 1, 1], [], []>} : vector<8x128xf32>, vector<128x512xf32>, vector<8x512xf32> -> vector<8x512xf32>
    %15 = arith.addf %13, %14 : vector<8x512xf32>
    %16 = vector.extract_strided_slice %15 {offsets = [0, 0], sizes = [8, 128], strides = [1, 1]} : vector<8x512xf32> to vector<8x128xf32>
    %17 = arith.negf %16 : vector<8x128xf32>
    %18 = math.exp %17 : vector<8x128xf32>
    %cst_14 = arith.constant 1.000000e+00 : f32
    %19 = vector.broadcast %cst_14 : f32 to vector<8x128xf32>
    %20 = arith.addf %19, %18 : vector<8x128xf32>
    %21 = arith.divf %19, %20 : vector<8x128xf32>
    %22 = vector.extract_strided_slice %15 {offsets = [0, 128], sizes = [8, 128], strides = [1, 1]} : vector<8x512xf32> to vector<8x128xf32>
    %23 = arith.negf %22 : vector<8x128xf32>
    %24 = math.exp %23 : vector<8x128xf32>
    %cst_15 = arith.constant 1.000000e+00 : f32
    %25 = vector.broadcast %cst_15 : f32 to vector<8x128xf32>
    %26 = arith.addf %25, %24 : vector<8x128xf32>
    %27 = arith.divf %25, %26 : vector<8x128xf32>
    %28 = vector.extract_strided_slice %15 {offsets = [0, 256], sizes = [8, 128], strides = [1, 1]} : vector<8x512xf32> to vector<8x128xf32>
    %29 = math.tanh %28 : vector<8x128xf32>
    %30 = vector.extract_strided_slice %15 {offsets = [0, 384], sizes = [8, 128], strides = [1, 1]} : vector<8x512xf32> to vector<8x128xf32>
    %31 = arith.negf %30 : vector<8x128xf32>
    %32 = math.exp %31 : vector<8x128xf32>
    %cst_16 = arith.constant 1.000000e+00 : f32
    %33 = vector.broadcast %cst_16 : f32 to vector<8x128xf32>
    %34 = arith.addf %33, %32 : vector<8x128xf32>
    %35 = arith.divf %33, %34 : vector<8x128xf32>
    %36 = arith.mulf %27, %12 : vector<8x128xf32>
    %37 = arith.mulf %21, %29 : vector<8x128xf32>
    %38 = arith.addf %36, %37 : vector<8x128xf32>
    %39 = math.tanh %38 : vector<8x128xf32>
    %40 = arith.mulf %35, %39 : vector<8x128xf32>
    %c0_17 = arith.constant 0 : index
    %c0_18 = arith.constant 0 : index
    %c0_19 = arith.constant 0 : index
    %41 = vector.load %arg7[%c0_17, %c0_18, %c0_19] : memref<8x8x128xf32, #tpu.memory_space<vmem>>, vector<1x8x128xf32>
    %42 = vector.shape_cast %41 : vector<1x8x128xf32> to vector<8x128xf32>
    %43 = vector.shape_cast %40 : vector<8x128xf32> to vector<1x8x128xf32>
    tpu.vector_store %arg7[%c0_17, %c0_18, %c0_19], %43 {strides = array<i32>} : memref<8x8x128xf32, #tpu.memory_space<vmem>>, vector<1x8x128xf32>,
    %44 = vector.extract_strided_slice %9 {offsets = [8, 0], sizes = [8, 512], strides = [1, 1]} : vector<64x512xf32> to vector<8x512xf32>
    %cst_20 = arith.constant dense<0.000000e+00> : vector<8x512xf32>
    %45 = tpu.matmul %40, %10, %cst_20 {dimension_numbers = #tpu.dot_dimension_numbers<[1], [0], [0], [1], [0, 0, 1, 1], [], []>} : vector<8x128xf32>, vector<128x512xf32>, vector<8x512xf32> -> vector<8x512xf32>
    %46 = arith.addf %44, %45 : vector<8x512xf32>
    %47 = vector.extract_strided_slice %46 {offsets = [0, 0], sizes = [8, 128], strides = [1, 1]} : vector<8x512xf32> to vector<8x128xf32>
    %48 = arith.negf %47 : vector<8x128xf32>
    %49 = math.exp %48 : vector<8x128xf32>
    %cst_21 = arith.constant 1.000000e+00 : f32
    %50 = vector.broadcast %cst_21 : f32 to vector<8x128xf32>
    %51 = arith.addf %50, %49 : vector<8x128xf32>
    %52 = arith.divf %50, %51 : vector<8x128xf32>
    %53 = vector.extract_strided_slice %46 {offsets = [0, 128], sizes = [8, 128], strides = [1, 1]} : vector<8x512xf32> to vector<8x128xf32>
    %54 = arith.negf %53 : vector<8x128xf32>
    %55 = math.exp %54 : vector<8x128xf32>
    %cst_22 = arith.constant 1.000000e+00 : f32
    %56 = vector.broadcast %cst_22 : f32 to vector<8x128xf32>
    %57 = arith.addf %56, %55 : vector<8x128xf32>
    %58 = arith.divf %56, %57 : vector<8x128xf32>
    %59 = vector.extract_strided_slice %46 {offsets = [0, 256], sizes = [8, 128], strides = [1, 1]} : vector<8x512xf32> to vector<8x128xf32>
    %60 = math.tanh %59 : vector<8x128xf32>
    %61 = vector.extract_strided_slice %46 {offsets = [0, 384], sizes = [8, 128], strides = [1, 1]} : vector<8x512xf32> to vector<8x128xf32>
    %62 = arith.negf %61 : vector<8x128xf32>
    %63 = math.exp %62 : vector<8x128xf32>
    %cst_23 = arith.constant 1.000000e+00 : f32
    %64 = vector.broadcast %cst_23 : f32 to vector<8x128xf32>
    %65 = arith.addf %64, %63 : vector<8x128xf32>
    %66 = arith.divf %64, %65 : vector<8x128xf32>
    %67 = arith.mulf %58, %38 : vector<8x128xf32>
    %68 = arith.mulf %52, %60 : vector<8x128xf32>
    %69 = arith.addf %67, %68 : vector<8x128xf32>
    %70 = math.tanh %69 : vector<8x128xf32>
    %71 = arith.mulf %66, %70 : vector<8x128xf32>
    %c1 = arith.constant 1 : index
    %c0_24 = arith.constant 0 : index
    %c0_25 = arith.constant 0 : index
    %72 = vector.load %arg7[%c1, %c0_24, %c0_25] : memref<8x8x128xf32, #tpu.memory_space<vmem>>, vector<1x8x128xf32>
    %73 = vector.shape_cast %72 : vector<1x8x128xf32> to vector<8x128xf32>
    %74 = vector.shape_cast %71 : vector<8x128xf32> to vector<1x8x128xf32>
    tpu.vector_store %arg7[%c1, %c0_24, %c0_25], %74 {strides = array<i32>} : memref<8x8x128xf32, #tpu.memory_space<vmem>>, vector<1x8x128xf32>,
    %75 = vector.extract_strided_slice %9 {offsets = [16, 0], sizes = [8, 512], strides = [1, 1]} : vector<64x512xf32> to vector<8x512xf32>
    %cst_26 = arith.constant dense<0.000000e+00> : vector<8x512xf32>
    %76 = tpu.matmul %71, %10, %cst_26 {dimension_numbers = #tpu.dot_dimension_numbers<[1], [0], [0], [1], [0, 0, 1, 1], [], []>} : vector<8x128xf32>, vector<128x512xf32>, vector<8x512xf32> -> vector<8x512xf32>
    %77 = arith.addf %75, %76 : vector<8x512xf32>
    %78 = vector.extract_strided_slice %77 {offsets = [0, 0], sizes = [8, 128], strides = [1, 1]} : vector<8x512xf32> to vector<8x128xf32>
    %79 = arith.negf %78 : vector<8x128xf32>
    %80 = math.exp %79 : vector<8x128xf32>
    %cst_27 = arith.constant 1.000000e+00 : f32
    %81 = vector.broadcast %cst_27 : f32 to vector<8x128xf32>
    %82 = arith.addf %81, %80 : vector<8x128xf32>
    %83 = arith.divf %81, %82 : vector<8x128xf32>
    %84 = vector.extract_strided_slice %77 {offsets = [0, 128], sizes = [8, 128], strides = [1, 1]} : vector<8x512xf32> to vector<8x128xf32>
    %85 = arith.negf %84 : vector<8x128xf32>
    %86 = math.exp %85 : vector<8x128xf32>
    %cst_28 = arith.constant 1.000000e+00 : f32
    %87 = vector.broadcast %cst_28 : f32 to vector<8x128xf32>
    %88 = arith.addf %87, %86 : vector<8x128xf32>
    %89 = arith.divf %87, %88 : vector<8x128xf32>
    %90 = vector.extract_strided_slice %77 {offsets = [0, 256], sizes = [8, 128], strides = [1, 1]} : vector<8x512xf32> to vector<8x128xf32>
    %91 = math.tanh %90 : vector<8x128xf32>
    %92 = vector.extract_strided_slice %77 {offsets = [0, 384], sizes = [8, 128], strides = [1, 1]} : vector<8x512xf32> to vector<8x128xf32>
    %93 = arith.negf %92 : vector<8x128xf32>
    %94 = math.exp %93 : vector<8x128xf32>
    %cst_29 = arith.constant 1.000000e+00 : f32
    %95 = vector.broadcast %cst_29 : f32 to vector<8x128xf32>
    %96 = arith.addf %95, %94 : vector<8x128xf32>
    %97 = arith.divf %95, %96 : vector<8x128xf32>
    %98 = arith.mulf %89, %69 : vector<8x128xf32>
    %99 = arith.mulf %83, %91 : vector<8x128xf32>
    %100 = arith.addf %98, %99 : vector<8x128xf32>
    %101 = math.tanh %100 : vector<8x128xf32>
    %102 = arith.mulf %97, %101 : vector<8x128xf32>
    %c2 = arith.constant 2 : index
    %c0_30 = arith.constant 0 : index
    %c0_31 = arith.constant 0 : index
    %103 = vector.load %arg7[%c2, %c0_30, %c0_31] : memref<8x8x128xf32, #tpu.memory_space<vmem>>, vector<1x8x128xf32>
    %104 = vector.shape_cast %103 : vector<1x8x128xf32> to vector<8x128xf32>
    %105 = vector.shape_cast %102 : vector<8x128xf32> to vector<1x8x128xf32>
    tpu.vector_store %arg7[%c2, %c0_30, %c0_31], %105 {strides = array<i32>} : memref<8x8x128xf32, #tpu.memory_space<vmem>>, vector<1x8x128xf32>,
    %106 = vector.extract_strided_slice %9 {offsets = [24, 0], sizes = [8, 512], strides = [1, 1]} : vector<64x512xf32> to vector<8x512xf32>
    %cst_32 = arith.constant dense<0.000000e+00> : vector<8x512xf32>
    %107 = tpu.matmul %102, %10, %cst_32 {dimension_numbers = #tpu.dot_dimension_numbers<[1], [0], [0], [1], [0, 0, 1, 1], [], []>} : vector<8x128xf32>, vector<128x512xf32>, vector<8x512xf32> -> vector<8x512xf32>
    %108 = arith.addf %106, %107 : vector<8x512xf32>
    %109 = vector.extract_strided_slice %108 {offsets = [0, 0], sizes = [8, 128], strides = [1, 1]} : vector<8x512xf32> to vector<8x128xf32>
    %110 = arith.negf %109 : vector<8x128xf32>
    %111 = math.exp %110 : vector<8x128xf32>
    %cst_33 = arith.constant 1.000000e+00 : f32
    %112 = vector.broadcast %cst_33 : f32 to vector<8x128xf32>
    %113 = arith.addf %112, %111 : vector<8x128xf32>
    %114 = arith.divf %112, %113 : vector<8x128xf32>
    %115 = vector.extract_strided_slice %108 {offsets = [0, 128], sizes = [8, 128], strides = [1, 1]} : vector<8x512xf32> to vector<8x128xf32>
    %116 = arith.negf %115 : vector<8x128xf32>
    %117 = math.exp %116 : vector<8x128xf32>
    %cst_34 = arith.constant 1.000000e+00 : f32
    %118 = vector.broadcast %cst_34 : f32 to vector<8x128xf32>
    %119 = arith.addf %118, %117 : vector<8x128xf32>
    %120 = arith.divf %118, %119 : vector<8x128xf32>
    %121 = vector.extract_strided_slice %108 {offsets = [0, 256], sizes = [8, 128], strides = [1, 1]} : vector<8x512xf32> to vector<8x128xf32>
    %122 = math.tanh %121 : vector<8x128xf32>
    %123 = vector.extract_strided_slice %108 {offsets = [0, 384], sizes = [8, 128], strides = [1, 1]} : vector<8x512xf32> to vector<8x128xf32>
    %124 = arith.negf %123 : vector<8x128xf32>
    %125 = math.exp %124 : vector<8x128xf32>
    %cst_35 = arith.constant 1.000000e+00 : f32
    %126 = vector.broadcast %cst_35 : f32 to vector<8x128xf32>
    %127 = arith.addf %126, %125 : vector<8x128xf32>
    %128 = arith.divf %126, %127 : vector<8x128xf32>
    %129 = arith.mulf %120, %100 : vector<8x128xf32>
    %130 = arith.mulf %114, %122 : vector<8x128xf32>
    %131 = arith.addf %129, %130 : vector<8x128xf32>
    %132 = math.tanh %131 : vector<8x128xf32>
    %133 = arith.mulf %128, %132 : vector<8x128xf32>
    %c3 = arith.constant 3 : index
    %c0_36 = arith.constant 0 : index
    %c0_37 = arith.constant 0 : index
    %134 = vector.load %arg7[%c3, %c0_36, %c0_37] : memref<8x8x128xf32, #tpu.memory_space<vmem>>, vector<1x8x128xf32>
    %135 = vector.shape_cast %134 : vector<1x8x128xf32> to vector<8x128xf32>
    %136 = vector.shape_cast %133 : vector<8x128xf32> to vector<1x8x128xf32>
    tpu.vector_store %arg7[%c3, %c0_36, %c0_37], %136 {strides = array<i32>} : memref<8x8x128xf32, #tpu.memory_space<vmem>>, vector<1x8x128xf32>,
    %137 = vector.extract_strided_slice %9 {offsets = [32, 0], sizes = [8, 512], strides = [1, 1]} : vector<64x512xf32> to vector<8x512xf32>
    %cst_38 = arith.constant dense<0.000000e+00> : vector<8x512xf32>
    %138 = tpu.matmul %133, %10, %cst_38 {dimension_numbers = #tpu.dot_dimension_numbers<[1], [0], [0], [1], [0, 0, 1, 1], [], []>} : vector<8x128xf32>, vector<128x512xf32>, vector<8x512xf32> -> vector<8x512xf32>
    %139 = arith.addf %137, %138 : vector<8x512xf32>
    %140 = vector.extract_strided_slice %139 {offsets = [0, 0], sizes = [8, 128], strides = [1, 1]} : vector<8x512xf32> to vector<8x128xf32>
    %141 = arith.negf %140 : vector<8x128xf32>
    %142 = math.exp %141 : vector<8x128xf32>
    %cst_39 = arith.constant 1.000000e+00 : f32
    %143 = vector.broadcast %cst_39 : f32 to vector<8x128xf32>
    %144 = arith.addf %143, %142 : vector<8x128xf32>
    %145 = arith.divf %143, %144 : vector<8x128xf32>
    %146 = vector.extract_strided_slice %139 {offsets = [0, 128], sizes = [8, 128], strides = [1, 1]} : vector<8x512xf32> to vector<8x128xf32>
    %147 = arith.negf %146 : vector<8x128xf32>
    %148 = math.exp %147 : vector<8x128xf32>
    %cst_40 = arith.constant 1.000000e+00 : f32
    %149 = vector.broadcast %cst_40 : f32 to vector<8x128xf32>
    %150 = arith.addf %149, %148 : vector<8x128xf32>
    %151 = arith.divf %149, %150 : vector<8x128xf32>
    %152 = vector.extract_strided_slice %139 {offsets = [0, 256], sizes = [8, 128], strides = [1, 1]} : vector<8x512xf32> to vector<8x128xf32>
    %153 = math.tanh %152 : vector<8x128xf32>
    %154 = vector.extract_strided_slice %139 {offsets = [0, 384], sizes = [8, 128], strides = [1, 1]} : vector<8x512xf32> to vector<8x128xf32>
    %155 = arith.negf %154 : vector<8x128xf32>
    %156 = math.exp %155 : vector<8x128xf32>
    %cst_41 = arith.constant 1.000000e+00 : f32
    %157 = vector.broadcast %cst_41 : f32 to vector<8x128xf32>
    %158 = arith.addf %157, %156 : vector<8x128xf32>
    %159 = arith.divf %157, %158 : vector<8x128xf32>
    %160 = arith.mulf %151, %131 : vector<8x128xf32>
    %161 = arith.mulf %145, %153 : vector<8x128xf32>
    %162 = arith.addf %160, %161 : vector<8x128xf32>
    %163 = math.tanh %162 : vector<8x128xf32>
    %164 = arith.mulf %159, %163 : vector<8x128xf32>
    %c4 = arith.constant 4 : index
    %c0_42 = arith.constant 0 : index
    %c0_43 = arith.constant 0 : index
    %165 = vector.load %arg7[%c4, %c0_42, %c0_43] : memref<8x8x128xf32, #tpu.memory_space<vmem>>, vector<1x8x128xf32>
    %166 = vector.shape_cast %165 : vector<1x8x128xf32> to vector<8x128xf32>
    %167 = vector.shape_cast %164 : vector<8x128xf32> to vector<1x8x128xf32>
    tpu.vector_store %arg7[%c4, %c0_42, %c0_43], %167 {strides = array<i32>} : memref<8x8x128xf32, #tpu.memory_space<vmem>>, vector<1x8x128xf32>,
    %168 = vector.extract_strided_slice %9 {offsets = [40, 0], sizes = [8, 512], strides = [1, 1]} : vector<64x512xf32> to vector<8x512xf32>
    %cst_44 = arith.constant dense<0.000000e+00> : vector<8x512xf32>
    %169 = tpu.matmul %164, %10, %cst_44 {dimension_numbers = #tpu.dot_dimension_numbers<[1], [0], [0], [1], [0, 0, 1, 1], [], []>} : vector<8x128xf32>, vector<128x512xf32>, vector<8x512xf32> -> vector<8x512xf32>
    %170 = arith.addf %168, %169 : vector<8x512xf32>
    %171 = vector.extract_strided_slice %170 {offsets = [0, 0], sizes = [8, 128], strides = [1, 1]} : vector<8x512xf32> to vector<8x128xf32>
    %172 = arith.negf %171 : vector<8x128xf32>
    %173 = math.exp %172 : vector<8x128xf32>
    %cst_45 = arith.constant 1.000000e+00 : f32
    %174 = vector.broadcast %cst_45 : f32 to vector<8x128xf32>
    %175 = arith.addf %174, %173 : vector<8x128xf32>
    %176 = arith.divf %174, %175 : vector<8x128xf32>
    %177 = vector.extract_strided_slice %170 {offsets = [0, 128], sizes = [8, 128], strides = [1, 1]} : vector<8x512xf32> to vector<8x128xf32>
    %178 = arith.negf %177 : vector<8x128xf32>
    %179 = math.exp %178 : vector<8x128xf32>
    %cst_46 = arith.constant 1.000000e+00 : f32
    %180 = vector.broadcast %cst_46 : f32 to vector<8x128xf32>
    %181 = arith.addf %180, %179 : vector<8x128xf32>
    %182 = arith.divf %180, %181 : vector<8x128xf32>
    %183 = vector.extract_strided_slice %170 {offsets = [0, 256], sizes = [8, 128], strides = [1, 1]} : vector<8x512xf32> to vector<8x128xf32>
    %184 = math.tanh %183 : vector<8x128xf32>
    %185 = vector.extract_strided_slice %170 {offsets = [0, 384], sizes = [8, 128], strides = [1, 1]} : vector<8x512xf32> to vector<8x128xf32>
    %186 = arith.negf %185 : vector<8x128xf32>
    %187 = math.exp %186 : vector<8x128xf32>
    %cst_47 = arith.constant 1.000000e+00 : f32
    %188 = vector.broadcast %cst_47 : f32 to vector<8x128xf32>
    %189 = arith.addf %188, %187 : vector<8x128xf32>
    %190 = arith.divf %188, %189 : vector<8x128xf32>
    %191 = arith.mulf %182, %162 : vector<8x128xf32>
    %192 = arith.mulf %176, %184 : vector<8x128xf32>
    %193 = arith.addf %191, %192 : vector<8x128xf32>
    %194 = math.tanh %193 : vector<8x128xf32>
    %195 = arith.mulf %190, %194 : vector<8x128xf32>
    %c5 = arith.constant 5 : index
    %c0_48 = arith.constant 0 : index
    %c0_49 = arith.constant 0 : index
    %196 = vector.load %arg7[%c5, %c0_48, %c0_49] : memref<8x8x128xf32, #tpu.memory_space<vmem>>, vector<1x8x128xf32>
    %197 = vector.shape_cast %196 : vector<1x8x128xf32> to vector<8x128xf32>
    %198 = vector.shape_cast %195 : vector<8x128xf32> to vector<1x8x128xf32>
    tpu.vector_store %arg7[%c5, %c0_48, %c0_49], %198 {strides = array<i32>} : memref<8x8x128xf32, #tpu.memory_space<vmem>>, vector<1x8x128xf32>,
    %199 = vector.extract_strided_slice %9 {offsets = [48, 0], sizes = [8, 512], strides = [1, 1]} : vector<64x512xf32> to vector<8x512xf32>
    %cst_50 = arith.constant dense<0.000000e+00> : vector<8x512xf32>
    %200 = tpu.matmul %195, %10, %cst_50 {dimension_numbers = #tpu.dot_dimension_numbers<[1], [0], [0], [1], [0, 0, 1, 1], [], []>} : vector<8x128xf32>, vector<128x512xf32>, vector<8x512xf32> -> vector<8x512xf32>
    %201 = arith.addf %199, %200 : vector<8x512xf32>
    %202 = vector.extract_strided_slice %201 {offsets = [0, 0], sizes = [8, 128], strides = [1, 1]} : vector<8x512xf32> to vector<8x128xf32>
    %203 = arith.negf %202 : vector<8x128xf32>
    %204 = math.exp %203 : vector<8x128xf32>
    %cst_51 = arith.constant 1.000000e+00 : f32
    %205 = vector.broadcast %cst_51 : f32 to vector<8x128xf32>
    %206 = arith.addf %205, %204 : vector<8x128xf32>
    %207 = arith.divf %205, %206 : vector<8x128xf32>
    %208 = vector.extract_strided_slice %201 {offsets = [0, 128], sizes = [8, 128], strides = [1, 1]} : vector<8x512xf32> to vector<8x128xf32>
    %209 = arith.negf %208 : vector<8x128xf32>
    %210 = math.exp %209 : vector<8x128xf32>
    %cst_52 = arith.constant 1.000000e+00 : f32
    %211 = vector.broadcast %cst_52 : f32 to vector<8x128xf32>
    %212 = arith.addf %211, %210 : vector<8x128xf32>
    %213 = arith.divf %211, %212 : vector<8x128xf32>
    %214 = vector.extract_strided_slice %201 {offsets = [0, 256], sizes = [8, 128], strides = [1, 1]} : vector<8x512xf32> to vector<8x128xf32>
    %215 = math.tanh %214 : vector<8x128xf32>
    %216 = vector.extract_strided_slice %201 {offsets = [0, 384], sizes = [8, 128], strides = [1, 1]} : vector<8x512xf32> to vector<8x128xf32>
    %217 = arith.negf %216 : vector<8x128xf32>
    %218 = math.exp %217 : vector<8x128xf32>
    %cst_53 = arith.constant 1.000000e+00 : f32
    %219 = vector.broadcast %cst_53 : f32 to vector<8x128xf32>
    %220 = arith.addf %219, %218 : vector<8x128xf32>
    %221 = arith.divf %219, %220 : vector<8x128xf32>
    %222 = arith.mulf %213, %193 : vector<8x128xf32>
    %223 = arith.mulf %207, %215 : vector<8x128xf32>
    %224 = arith.addf %222, %223 : vector<8x128xf32>
    %225 = math.tanh %224 : vector<8x128xf32>
    %226 = arith.mulf %221, %225 : vector<8x128xf32>
    %c6 = arith.constant 6 : index
    %c0_54 = arith.constant 0 : index
    %c0_55 = arith.constant 0 : index
    %227 = vector.load %arg7[%c6, %c0_54, %c0_55] : memref<8x8x128xf32, #tpu.memory_space<vmem>>, vector<1x8x128xf32>
    %228 = vector.shape_cast %227 : vector<1x8x128xf32> to vector<8x128xf32>
    %229 = vector.shape_cast %226 : vector<8x128xf32> to vector<1x8x128xf32>
    tpu.vector_store %arg7[%c6, %c0_54, %c0_55], %229 {strides = array<i32>} : memref<8x8x128xf32, #tpu.memory_space<vmem>>, vector<1x8x128xf32>,
    %230 = vector.extract_strided_slice %9 {offsets = [56, 0], sizes = [8, 512], strides = [1, 1]} : vector<64x512xf32> to vector<8x512xf32>
    %cst_56 = arith.constant dense<0.000000e+00> : vector<8x512xf32>
    %231 = tpu.matmul %226, %10, %cst_56 {dimension_numbers = #tpu.dot_dimension_numbers<[1], [0], [0], [1], [0, 0, 1, 1], [], []>} : vector<8x128xf32>, vector<128x512xf32>, vector<8x512xf32> -> vector<8x512xf32>
    %232 = arith.addf %230, %231 : vector<8x512xf32>
    %233 = vector.extract_strided_slice %232 {offsets = [0, 0], sizes = [8, 128], strides = [1, 1]} : vector<8x512xf32> to vector<8x128xf32>
    %234 = arith.negf %233 : vector<8x128xf32>
    %235 = math.exp %234 : vector<8x128xf32>
    %cst_57 = arith.constant 1.000000e+00 : f32
    %236 = vector.broadcast %cst_57 : f32 to vector<8x128xf32>
    %237 = arith.addf %236, %235 : vector<8x128xf32>
    %238 = arith.divf %236, %237 : vector<8x128xf32>
    %239 = vector.extract_strided_slice %232 {offsets = [0, 128], sizes = [8, 128], strides = [1, 1]} : vector<8x512xf32> to vector<8x128xf32>
    %240 = arith.negf %239 : vector<8x128xf32>
    %241 = math.exp %240 : vector<8x128xf32>
    %cst_58 = arith.constant 1.000000e+00 : f32
    %242 = vector.broadcast %cst_58 : f32 to vector<8x128xf32>
    %243 = arith.addf %242, %241 : vector<8x128xf32>
    %244 = arith.divf %242, %243 : vector<8x128xf32>
    %245 = vector.extract_strided_slice %232 {offsets = [0, 256], sizes = [8, 128], strides = [1, 1]} : vector<8x512xf32> to vector<8x128xf32>
    %246 = math.tanh %245 : vector<8x128xf32>
    %247 = vector.extract_strided_slice %232 {offsets = [0, 384], sizes = [8, 128], strides = [1, 1]} : vector<8x512xf32> to vector<8x128xf32>
    %248 = arith.negf %247 : vector<8x128xf32>
    %249 = math.exp %248 : vector<8x128xf32>
    %cst_59 = arith.constant 1.000000e+00 : f32
    %250 = vector.broadcast %cst_59 : f32 to vector<8x128xf32>
    %251 = arith.addf %250, %249 : vector<8x128xf32>
    %252 = arith.divf %250, %251 : vector<8x128xf32>
    %253 = arith.mulf %244, %224 : vector<8x128xf32>
    %254 = arith.mulf %238, %246 : vector<8x128xf32>
    %255 = arith.addf %253, %254 : vector<8x128xf32>
    %256 = math.tanh %255 : vector<8x128xf32>
    %257 = arith.mulf %252, %256 : vector<8x128xf32>
    %c7 = arith.constant 7 : index
    %c0_60 = arith.constant 0 : index
    %c0_61 = arith.constant 0 : index
    %258 = vector.load %arg7[%c7, %c0_60, %c0_61] : memref<8x8x128xf32, #tpu.memory_space<vmem>>, vector<1x8x128xf32>
    %259 = vector.shape_cast %258 : vector<1x8x128xf32> to vector<8x128xf32>
    %260 = vector.shape_cast %257 : vector<8x128xf32> to vector<1x8x128xf32>
    tpu.vector_store %arg7[%c7, %c0_60, %c0_61], %260 {strides = array<i32>} : memref<8x8x128xf32, #tpu.memory_space<vmem>>, vector<1x8x128xf32>,
    %c0_62 = arith.constant 0 : index
    %c0_63 = arith.constant 0 : index
    %261 = vector.load %arg9[%c0_62, %c0_63] : memref<8x128xf32, #tpu.memory_space<vmem>>, vector<8x128xf32>
    tpu.vector_store %arg9[%c0_62, %c0_63], %257 {strides = array<i32>} : memref<8x128xf32, #tpu.memory_space<vmem>>, vector<8x128xf32>,
    %c0_64 = arith.constant 0 : index
    %c0_65 = arith.constant 0 : index
    %262 = vector.load %arg10[%c0_64, %c0_65] : memref<8x128xf32, #tpu.memory_space<vmem>>, vector<8x128xf32>
    tpu.vector_store %arg10[%c0_64, %c0_65], %255 {strides = array<i32>} : memref<8x128xf32, #tpu.memory_space<vmem>>, vector<8x128xf32>,
    %c0_66 = arith.constant 0 : index
    %c0_67 = arith.constant 0 : index
    %c0_68 = arith.constant 0 : index
    %263 = vector.load %arg7[%c0_66, %c0_67, %c0_68] : memref<8x8x128xf32, #tpu.memory_space<vmem>>, vector<8x8x128xf32>
    %264 = vector.shape_cast %263 : vector<8x8x128xf32> to vector<64x128xf32>
    %c0_69 = arith.constant 0 : index
    %c0_70 = arith.constant 0 : index
    %265 = vector.load %arg5[%c0_69, %c0_70] : memref<128x128xf32, #tpu.memory_space<vmem>>, vector<128x128xf32>
    %cst_71 = arith.constant dense<0.000000e+00> : vector<64x128xf32>
    %266 = tpu.matmul %264, %265, %cst_71 {dimension_numbers = #tpu.dot_dimension_numbers<[1], [0], [0], [1], [0, 0, 1, 1], [], []>} : vector<64x128xf32>, vector<128x128xf32>, vector<64x128xf32> -> vector<64x128xf32>
    %c0_72 = arith.constant 0 : index
    %c0_73 = arith.constant 0 : index
    %267 = vector.load %arg6[%c0_72, %c0_73] : memref<1x128xf32, #tpu.memory_space<vmem>>, vector<1x128xf32>
    %268 = vector.broadcast %267 : vector<1x128xf32> to vector<64x128xf32>
    %269 = arith.addf %266, %268 : vector<64x128xf32>
    %270 = vector.shape_cast %269 : vector<64x128xf32> to vector<8x8x128xf32>
    %c0_74 = arith.constant 0 : index
    %c0_75 = arith.constant 0 : index
    %c0_76 = arith.constant 0 : index
    %271 = vector.load %arg8[%c0_74, %c0_75, %c0_76] : memref<8x8x128xf32, #tpu.memory_space<vmem>>, vector<8x8x128xf32>
    tpu.vector_store %arg8[%c0_74, %c0_75, %c0_76], %270 {strides = array<i32>} : memref<8x8x128xf32, #tpu.memory_space<vmem>>, vector<8x8x128xf32>,
    return
  }
  func.func @transform_0(%arg0: i32) -> (i32, i32, i32) {
    %c0_i32 = arith.constant 0 : i32
    %c0_i32_0 = arith.constant 0 : i32
    %c0_i32_1 = arith.constant 0 : i32
    return %arg0, %c0_i32, %c0_i32_0 : i32, i32, i32
  }
  func.func @transform_1(%arg0: i32) -> (i32, i32) {
    %c0_i32 = arith.constant 0 : i32
    %c0_i32_0 = arith.constant 0 : i32
    %c0_i32_1 = arith.constant 0 : i32
    return %c0_i32, %c0_i32_0 : i32, i32
  }
  func.func @transform_2(%arg0: i32) -> (i32, i32) {
    %c0_i32 = arith.constant 0 : i32
    %c0_i32_0 = arith.constant 0 : i32
    %c0_i32_1 = arith.constant 0 : i32
    return %c0_i32, %c0_i32_0 : i32, i32
  }
  func.func @transform_3(%arg0: i32) -> (i32, i32) {
    %c0_i32 = arith.constant 0 : i32
    %c0_i32_0 = arith.constant 0 : i32
    %c0_i32_1 = arith.constant 0 : i32
    return %c0_i32, %c0_i32_0 : i32, i32
  }
  func.func @transform_4(%arg0: i32) -> (i32, i32) {
    %c0_i32 = arith.constant 0 : i32
    %c0_i32_0 = arith.constant 0 : i32
    %c0_i32_1 = arith.constant 0 : i32
    return %c0_i32, %c0_i32_0 : i32, i32
  }
  func.func @transform_5(%arg0: i32) -> (i32, i32) {
    %c0_i32 = arith.constant 0 : i32
    %c0_i32_0 = arith.constant 0 : i32
    %c0_i32_1 = arith.constant 0 : i32
    return %c0_i32, %c0_i32_0 : i32, i32
  }
  func.func @transform_6(%arg0: i32) -> (i32, i32, i32) {
    %c0_i32 = arith.constant 0 : i32
    %c0_i32_0 = arith.constant 0 : i32
    %c0_i32_1 = arith.constant 0 : i32
    return %arg0, %c0_i32, %c0_i32_0 : i32, i32, i32
  }
  func.func @transform_7(%arg0: i32) -> (i32, i32, i32) {
    %c0_i32 = arith.constant 0 : i32
    %c0_i32_0 = arith.constant 0 : i32
    %c0_i32_1 = arith.constant 0 : i32
    return %arg0, %c0_i32, %c0_i32_0 : i32, i32, i32
  }
}

</mosaic_0001>

<bundles_post_ra>
// kernel: frm_lstm_forward.2
= control target key start
LH: loop header
LB: loop body
LE: loop exit
PB: predicated region body
PF: predicated region fallthrough
CT: control target
= control target key end

     0   :  { %v2590_v3 = vmov 0.0   ;;  %s3469_s1 = inlined_call_operand.vmem [shape: f32[128,512], index: 1, kind: input, shape index: {}]   ;;  %s3470_s2 = inlined_call_operand.vmem [shape: f32[128,512], index: 2, kind: input, shape index: {}]   ;;  %s3471_s0 = inlined_call_operand.vmem [shape: f32[8,8,128], index: 0, kind: input, shape index: {}]   ;;  %s3472_s3 = inlined_call_operand.vmem [shape: f32[1,512], index: 3, kind: input, shape index: {}]   ;;  %s3473_s4 = inlined_call_operand.vmem [shape: f32[8,8,128], index: 4, kind: output, shape index: {}]  }
   0x1   :  { %v32_v0 = vld [vmem:[%s3469_s1 + $0x8] sm:$0xff]  ;;  %v34_v2 = vld [vmem:[%s3469_s1 + $0x18] sm:$0xff]  ;;  %181 = vmatprep.mubr.f32.mxu0 %v2590_v3  ;;  %294 = vmatprep.mubr.f32.mxu1 %v2590_v3  ;;  %v31_v6 = vld [vmem:[%s3469_s1] sm:$0xff] }
   0x2   :  { %v36_v1 = vld [vmem:[%s3469_s1 + $0x28] sm:$0xff]  ;;  %v38_v5 = vld [vmem:[%s3469_s1 + $0x38] sm:$0xff]  ;;  %v35_v7 = vld [vmem:[%s3469_s1 + $0x20] sm:$0xff] }
   0x3   :  { %v1821_v4 = vpack.c.bf16 %v36_v1, %v32_v0  ;;  %v1853_v8 = vpack.c.bf16 %v38_v5, %v34_v2  ;;  %v1823_v9 = vpack.c.bf16 %v35_v7, %v31_v6  ;;  %v33_v10 = vld [vmem:[%s3469_s1 + $0x10] sm:$0xff]  ;;  %v40_v12 = vld [vmem:[%s3469_s1 + $0x48] sm:$0xff]  ;;  %v42_v15 = vld [vmem:[%s3469_s1 + $0x58] sm:$0xff] }
   0x4   :  { %v37_v11 = vld [vmem:[%s3469_s1 + $0x30] sm:$0xff]  ;;  %v44_v14 = vld [vmem:[%s3469_s1 + $0x68] sm:$0xff]  ;;  %v46_v16 = vld [vmem:[%s3469_s1 + $0x78] sm:$0xff] }
   0x5   :  { %1822 = vmatprep.subr.bf16.mxu0 %v1821_v4  ;;  %v1855_v13 = vpack.c.bf16 %v37_v11, %v33_v10  ;;  %1854 = vmatprep.subr.bf16.mxu1 %v1853_v8  ;;  %v1825_v17 = vpack.c.bf16 %v44_v14, %v40_v12  ;;  %v1857_v18 = vpack.c.bf16 %v46_v16, %v42_v15  ;;  %v39_v19 = vld [vmem:[%s3469_s1 + $0x40] sm:$0xff]  ;;  %v41_v21 = vld [vmem:[%s3469_s1 + $0x50] sm:$0xff]  ;;  %v48_v24 = vld [vmem:[%s3469_s1 + $0x88] sm:$0xff] }
   0x6   :  { %1824 = vmatpush1.bf16.msra.mxu0 %v1823_v9  ;;  %v43_v20 = vld [vmem:[%s3469_s1 + $0x60] sm:$0xff]  ;;  %v45_v23 = vld [vmem:[%s3469_s1 + $0x70] sm:$0xff]  ;;  %v52_v25 = vld [vmem:[%s3469_s1 + $0xa8] sm:$0xff] }
   0x7   :  { %1856 = vmatpush1.bf16.msra.mxu1 %v1855_v13  ;;  %v1827_v22 = vpack.c.bf16 %v43_v20, %v39_v19  ;;  %1826 = vmatprep.subr.bf16.mxu0 %v1825_v17  ;;  %v1859_v26 = vpack.c.bf16 %v45_v23, %v41_v21  ;;  %v1829_v27 = vpack.c.bf16 %v52_v25, %v48_v24  ;;  %v50_v28 = vld [vmem:[%s3469_s1 + $0x98] sm:$0xff]  ;;  %v47_v30 = vld [vmem:[%s3469_s1 + $0x80] sm:$0xff]  ;;  %v49_v33 = vld [vmem:[%s3469_s1 + $0x90] sm:$0xff] }
   0x8   :  { %1858 = vmatprep.subr.bf16.mxu1 %v1857_v18  ;;  %v54_v29 = vld [vmem:[%s3469_s1 + $0xb8] sm:$0xff]  ;;  %v51_v32 = vld [vmem:[%s3469_s1 + $0xa0] sm:$0xff]  ;;  %v53_v34 = vld [vmem:[%s3469_s1 + $0xb0] sm:$0xff] }
   0x9   :  { %v1861_v31 = vpack.c.bf16 %v54_v29, %v50_v28  ;;  %v1831_v35 = vpack.c.bf16 %v51_v32, %v47_v30  ;;  %v56_v36 = vld [vmem:[%s3469_s1 + $0xc8] sm:$0xff]  ;;  %v58_v38 = vld [vmem:[%s3469_s1 + $0xd8] sm:$0xff]  ;;  %v1863_v39 = vpack.c.bf16 %v53_v34, %v49_v33  ;;  %v55_v42 = vld [vmem:[%s3469_s1 + $0xc0] sm:$0xff] }
   0xa   :  { %1828 = vmatpush1.bf16.msra.mxu0 %v1827_v22  ;;  %v60_v37 = vld [vmem:[%s3469_s1 + $0xe8] sm:$0xff]  ;;  %v62_v41 = vld [vmem:[%s3469_s1 + $0xf8] sm:$0xff]  ;;  %v59_v43 = vld [vmem:[%s3469_s1 + $0xe0] sm:$0xff] }
   0xb   :  { %1860 = vmatpush1.bf16.msra.mxu1 %v1859_v26  ;;  %1830 = vmatprep.subr.bf16.mxu0 %v1829_v27  ;;  %v1833_v40 = vpack.c.bf16 %v60_v37, %v56_v36  ;;  %v1865_v44 = vpack.c.bf16 %v62_v41, %v58_v38  ;;  %v57_v45 = vld [vmem:[%s3469_s1 + $0xd0] sm:$0xff]  ;;  %v64_v47 = vld [vmem:[%s3469_s1 + $0x108] sm:$0xff]  ;;  %v66_v49 = vld [vmem:[%s3469_s1 + $0x118] sm:$0xff]  ;;  %v1835_v51 = vpack.c.bf16 %v59_v43, %v55_v42 }
   0xc   :  { %1862 = vmatprep.subr.bf16.mxu1 %v1861_v31  ;;  %v61_v46 = vld [vmem:[%s3469_s1 + $0xf0] sm:$0xff]  ;;  %v68_v48 = vld [vmem:[%s3469_s1 + $0x128] sm:$0xff]  ;;  %v70_v50 = vld [vmem:[%s3469_s1 + $0x138] sm:$0xff] }
   0xd   :  { %v1867_v52 = vpack.c.bf16 %v61_v46, %v57_v45  ;;  %v1837_v53 = vpack.c.bf16 %v68_v48, %v64_v47  ;;  %v63_v54 = vld [vmem:[%s3469_s1 + $0x100] sm:$0xff]  ;;  %v65_v56 = vld [vmem:[%s3469_s1 + $0x110] sm:$0xff]  ;;  %v1869_v57 = vpack.c.bf16 %v70_v50, %v66_v49  ;;  %v72_v59 = vld [vmem:[%s3469_s1 + $0x148] sm:$0xff] }
   0xe   :  { %1832 = vmatpush1.bf16.msra.mxu0 %v1831_v35  ;;  %v67_v55 = vld [vmem:[%s3469_s1 + $0x120] sm:$0xff]  ;;  %v69_v58 = vld [vmem:[%s3469_s1 + $0x130] sm:$0xff]  ;;  %v76_v60 = vld [vmem:[%s3469_s1 + $0x168] sm:$0xff] }
   0xf   :  { %1864 = vmatpush1.bf16.msra.mxu1 %v1863_v39  ;;  %1834 = vmatprep.subr.bf16.mxu0 %v1833_v40  ;;  %v74_v61 = vld [vmem:[%s3469_s1 + $0x158] sm:$0xff]  ;;  %v1839_v63 = vpack.c.bf16 %v67_v55, %v63_v54  ;;  %v1871_v0 = vpack.c.bf16 %v69_v58, %v65_v56  ;;  %v1841_v1 = vpack.c.bf16 %v76_v60, %v72_v59  ;;  %v71_v2 = vld [vmem:[%s3469_s1 + $0x140] sm:$0xff]  ;;  %v73_v5 = vld [vmem:[%s3469_s1 + $0x150] sm:$0xff] }
  0x10   :  { %1866 = vmatprep.subr.bf16.mxu1 %v1865_v44  ;;  %v78_v62 = vld [vmem:[%s3469_s1 + $0x178] sm:$0xff]  ;;  %v75_v4 = vld [vmem:[%s3469_s1 + $0x160] sm:$0xff]  ;;  %v77_v7 = vld [vmem:[%s3469_s1 + $0x170] sm:$0xff] }
  0x11   :  { %v1873_v6 = vpack.c.bf16 %v78_v62, %v74_v61  ;;  %v80_v8 = vld [vmem:[%s3469_s1 + $0x188] sm:$0xff]  ;;  %v82_v10 = vld [vmem:[%s3469_s1 + $0x198] sm:$0xff]  ;;  %v1843_v12 = vpack.c.bf16 %v75_v4, %v71_v2  ;;  %v1875_v13 = vpack.c.bf16 %v77_v7, %v73_v5  ;;  %v79_v15 = vld [vmem:[%s3469_s1 + $0x180] sm:$0xff] }
  0x12   :  { %1836 = vmatpush1.bf16.msra.mxu0 %v1835_v51  ;;  %v84_v9 = vld [vmem:[%s3469_s1 + $0x1a8] sm:$0xff]  ;;  %v86_v11 = vld [vmem:[%s3469_s1 + $0x1b8] sm:$0xff]  ;;  %v83_v16 = vld [vmem:[%s3469_s1 + $0x1a0] sm:$0xff] }
  0x13   :  { %1868 = vmatpush1.bf16.msra.mxu1 %v1867_v52  ;;  %1838 = vmatprep.subr.bf16.mxu0 %v1837_v53  ;;  %v1845_v14 = vpack.c.bf16 %v84_v9, %v80_v8  ;;  %v81_v17 = vld [vmem:[%s3469_s1 + $0x190] sm:$0xff]  ;;  %v1877_v18 = vpack.c.bf16 %v86_v11, %v82_v10  ;;  %v88_v20 = vld [vmem:[%s3469_s1 + $0x1c8] sm:$0xff]  ;;  %v90_v22 = vld [vmem:[%s3469_s1 + $0x1d8] sm:$0xff]  ;;  %v1847_v24 = vpack.c.bf16 %v83_v16, %v79_v15 }
  0x14   :  { %1870 = vmatprep.subr.bf16.mxu1 %v1869_v57  ;;  %v85_v19 = vld [vmem:[%s3469_s1 + $0x1b0] sm:$0xff]  ;;  %v92_v21 = vld [vmem:[%s3469_s1 + $0x1e8] sm:$0xff]  ;;  %v94_v23 = vld [vmem:[%s3469_s1 + $0x1f8] sm:$0xff] }
  0x15   :  { %v1879_v25 = vpack.c.bf16 %v85_v19, %v81_v17  ;;  %v1849_v26 = vpack.c.bf16 %v92_v21, %v88_v20  ;;  %v87_v27 = vld [vmem:[%s3469_s1 + $0x1c0] sm:$0xff]  ;;  %v89_v29 = vld [vmem:[%s3469_s1 + $0x1d0] sm:$0xff]  ;;  %v1881_v30 = vpack.c.bf16 %v94_v23, %v90_v22  ;;  %v344_v32 = vld [vmem:[%s3470_s2 + $0x8] sm:$0xff] }
  0x16   :  { %1840 = vmatpush1.bf16.msra.mxu0 %v1839_v63  ;;  %v91_v28 = vld [vmem:[%s3469_s1 + $0x1e0] sm:$0xff]  ;;  %v93_v31 = vld [vmem:[%s3469_s1 + $0x1f0] sm:$0xff]  ;;  %v348_v33 = vld [vmem:[%s3470_s2 + $0x28] sm:$0xff] }
  0x17   :  { %1872 = vmatpush1.bf16.msra.mxu1 %v1871_v0  ;;  %1842 = vmatprep.subr.bf16.mxu0 %v1841_v1  ;;  %v346_v34 = vld [vmem:[%s3470_s2 + $0x18] sm:$0xff]  ;;  %v1851_v36 = vpack.c.bf16 %v91_v28, %v87_v27  ;;  %v1883_v37 = vpack.c.bf16 %v93_v31, %v89_v29  ;;  %v2822_v38 = vpack.c.bf16 %v348_v33, %v344_v32  ;;  %v343_v39 = vld [vmem:[%s3470_s2] sm:$0xff]  ;;  %v345_v42 = vld [vmem:[%s3470_s2 + $0x10] sm:$0xff] }
  0x18   :  { %1874 = vmatprep.subr.bf16.mxu1 %v1873_v6  ;;  %v350_v35 = vld [vmem:[%s3470_s2 + $0x38] sm:$0xff]  ;;  %v347_v40 = vld [vmem:[%s3470_s2 + $0x20] sm:$0xff]  ;;  %v349_v43 = vld [vmem:[%s3470_s2 + $0x30] sm:$0xff] }
  0x19   :  { %v2830_v41 = vpack.c.bf16 %v350_v35, %v346_v34  ;;  %v352_v44 = vld [vmem:[%s3470_s2 + $0x48] sm:$0xff]  ;;  %v23_v46 = vld [vmem:[%s3471_s0] sm:$0xff]  ;;  %v2847_v47 = vpack.c.bf16 %v347_v40, %v343_v39  ;;  %v354_v48 = vld [vmem:[%s3470_s2 + $0x58] sm:$0xff]  ;;  %v2856_v50 = vpack.c.bf16 %v349_v43, %v345_v42 }
  0x1a   :  { %1844 = vmatpush1.bf16.msra.mxu0 %v1843_v12  ;;  %v356_v45 = vld [vmem:[%s3470_s2 + $0x68] sm:$0xff]  ;;  %v358_v49 = vld [vmem:[%s3470_s2 + $0x78] sm:$0xff]  ;;  %v351_v51 = vld [vmem:[%s3470_s2 + $0x40] sm:$0xff] }
  0x1b   :  { %1876 = vmatpush1.bf16.msra.mxu1 %v1875_v13  ;;  %1846 = vmatprep.subr.bf16.mxu0 %v1845_v14  ;;  %v355_v52 = vld [vmem:[%s3470_s2 + $0x60] sm:$0xff]  ;;  %v2865_v53 = vpack.c.bf16 %v356_v45, %v352_v44  ;;  %v353_v54 = vld [vmem:[%s3470_s2 + $0x50] sm:$0xff]  ;;  %v2873_v56 = vpack.c.bf16 %v358_v49, %v354_v48  ;;  %v360_v57 = vld [vmem:[%s3470_s2 + $0x88] sm:$0xff] }
  0x1c   :  { %1878 = vmatprep.subr.bf16.mxu1 %v1877_v18  ;;  %v357_v55 = vld [vmem:[%s3470_s2 + $0x70] sm:$0xff]  ;;  %v364_v58 = vld [vmem:[%s3470_s2 + $0xa8] sm:$0xff]  ;;  %v2885_v60 = vpack.c.bf16 %v355_v52, %v351_v51  ;;  %v362_v61 = vld [vmem:[%s3470_s2 + $0x98] sm:$0xff] }
  0x1d   :  { %v24_v59 = vld [vmem:[%s3471_s0 + $0x8] sm:$0xff]  ;;  %v366_v62 = vld [vmem:[%s3470_s2 + $0xb8] sm:$0xff]  ;;  %v2895_v63 = vpack.c.bf16 %v357_v55, %v353_v54  ;;  %v359_v0 = vld [vmem:[%s3470_s2 + $0x80] sm:$0xff]  ;;  %v2905_v2 = vpack.c.bf16 %v364_v58, %v360_v57 }
  0x1e   :  { %1848 = vmatpush1.bf16.msra.mxu0 %v1847_v24  ;;  %v363_v1 = vld [vmem:[%s3470_s2 + $0xa0] sm:$0xff]  ;;  %v361_v4 = vld [vmem:[%s3470_s2 + $0x90] sm:$0xff]  ;;  %v2914_v6 = vpack.c.bf16 %v366_v62, %v362_v61  ;;  %v368_v7 = vld [vmem:[%s3470_s2 + $0xc8] sm:$0xff] }
  0x1f   :  { %1880 = vmatpush1.bf16.msra.mxu1 %v1879_v25  ;;  %1850 = vmatprep.subr.bf16.mxu0 %v1849_v26  ;;  %v365_v5 = vld [vmem:[%s3470_s2 + $0xb0] sm:$0xff]  ;;  %v372_v8 = vld [vmem:[%s3470_s2 + $0xe8] sm:$0xff]  ;;  %v2926_v10 = vpack.c.bf16 %v363_v1, %v359_v0  ;;  %v370_v11 = vld [vmem:[%s3470_s2 + $0xd8] sm:$0xff] }
  0x20   :  { %1882 = vmatprep.subr.bf16.mxu1 %v1881_v30  ;;  %v25_v9 = vld [vmem:[%s3471_s0 + $0x10] sm:$0xff]  ;;  %v374_v12 = vld [vmem:[%s3470_s2 + $0xf8] sm:$0xff]  ;;  %v2936_v13 = vpack.c.bf16 %v365_v5, %v361_v4  ;;  %v367_v14 = vld [vmem:[%s3470_s2 + $0xc0] sm:$0xff]  ;;  %v2946_v16 = vpack.c.bf16 %v372_v8, %v368_v7 }
  0x21   :  { %v371_v15 = vld [vmem:[%s3470_s2 + $0xe0] sm:$0xff]  ;;  %v369_v17 = vld [vmem:[%s3470_s2 + $0xd0] sm:$0xff]  ;;  %v2955_v19 = vpack.c.bf16 %v374_v12, %v370_v11  ;;  %v376_v20 = vld [vmem:[%s3470_s2 + $0x108] sm:$0xff] }
  0x22   :  { %1852 = vmatpush1.bf16.msra.mxu0 %v1851_v36  ;;  %v373_v18 = vld [vmem:[%s3470_s2 + $0xf0] sm:$0xff]  ;;  %v380_v21 = vld [vmem:[%s3470_s2 + $0x128] sm:$0xff]  ;;  %v26_v22 = vld [vmem:[%s3471_s0 + $0x18] sm:$0xff]  ;;  %v2967_v23 = vpack.c.bf16 %v371_v15, %v367_v14 }
  0x23   :  { %1884 = vmatpush1.bf16.msra.mxu1 %v1883_v37  ;;  %1886 = vmatprep.subr.bf16.mxu0 %v2822_v38  ;;  %v378_v24 = vld [vmem:[%s3470_s2 + $0x118] sm:$0xff]  ;;  %v2977_v26 = vpack.c.bf16 %v373_v18, %v369_v17  ;;  %v375_v27 = vld [vmem:[%s3470_s2 + $0x100] sm:$0xff]  ;;  %v2987_v29 = vpack.c.bf16 %v380_v21, %v376_v20  ;;  %v377_v30 = vld [vmem:[%s3470_s2 + $0x110] sm:$0xff] }
  0x24   :  { %1918 = vmatprep.subr.bf16.mxu1 %v2830_v41  ;;  %v382_v25 = vld [vmem:[%s3470_s2 + $0x138] sm:$0xff]  ;;  %v379_v28 = vld [vmem:[%s3470_s2 + $0x120] sm:$0xff]  ;;  %v381_v31 = vld [vmem:[%s3470_s2 + $0x130] sm:$0xff] }
  0x25   :  { %182 = vmatmul.mubr.f32.vlgmr.msra.gmra.mrb[0].mxu0 %v23_v46  ;;  %v2996_v32 = vpack.c.bf16 %v382_v25, %v378_v24  ;;  %v384_v33 = vld [vmem:[%s3470_s2 + $0x148] sm:$0xff]  ;;  %v27_v35 = vld [vmem:[%s3471_s0 + $0x20] sm:$0xff]  ;;  %v3008_v36 = vpack.c.bf16 %v379_v28, %v375_v27  ;;  %v386_v37 = vld [vmem:[%s3470_s2 + $0x158] sm:$0xff]  ;;  %v3018_v40 = vpack.c.bf16 %v381_v31, %v377_v30  ;;  %v97_v28 = vlaneseq }
  0x26   :  { %295 = vmatmul.mubr.f32.vlgmr.msra.gmra.mrb[0].mxu1 %v23_v46  ;;  %1888 = vmatpush1.bf16.msra.mxu0 %v2847_v47  ;;  %v388_v34 = vld [vmem:[%s3470_s2 + $0x168] sm:$0xff]  ;;  %v390_v39 = vld [vmem:[%s3470_s2 + $0x178] sm:$0xff]  ;;  %v383_v42 = vld [vmem:[%s3470_s2 + $0x140] sm:$0xff] }
  0x27   :  { %1920 = vmatpush1.bf16.msra.mxu1 %v2856_v50  ;;  %187 = vmatprep.mubr.f32.mxu0 %v2590_v3  ;;  %v387_v43 = vld [vmem:[%s3470_s2 + $0x160] sm:$0xff]  ;;  %v3028_v44 = vpack.c.bf16 %v388_v34, %v384_v33  ;;  %v385_v45 = vld [vmem:[%s3470_s2 + $0x150] sm:$0xff]  ;;  %v3037_v48 = vpack.c.bf16 %v390_v39, %v386_v37  ;;  %v392_v49 = vld [vmem:[%s3470_s2 + $0x188] sm:$0xff]  ;;  %v98_v30 = vshrl.u32 %v97_v28, 7 }
  0x28   :  { %300 = vmatprep.mubr.f32.mxu1 %v2590_v3  ;;  %1890 = vmatprep.subr.bf16.mxu0 %v2865_v53  ;;  %v389_v46 = vld [vmem:[%s3470_s2 + $0x170] sm:$0xff]  ;;  %v396_v51 = vld [vmem:[%s3470_s2 + $0x1a8] sm:$0xff]  ;;  %v3049_v54 = vpack.c.bf16 %v387_v43, %v383_v42  ;;  %v394_v55 = vld [vmem:[%s3470_s2 + $0x198] sm:$0xff] }
  0x29   :  { %188 = vmatmul.mubr.f32.gmra.mrb[2].mxu0 %v24_v59  ;;  %1922 = vmatprep.subr.bf16.mxu1 %v2873_v56  ;;  %v28_v52 = vld [vmem:[%s3471_s0 + $0x28] sm:$0xff]  ;;  %v398_v57 = vld [vmem:[%s3470_s2 + $0x1b8] sm:$0xff]  ;;  %v3059_v58 = vpack.c.bf16 %v389_v46, %v385_v45  ;;  %v395_v61 = vld [vmem:[%s3470_s2 + $0x1a0] sm:$0xff]  ;;  %v3069_v62 = vpack.c.bf16 %v396_v51, %v392_v49  ;;  %v99_v31 = vsub.s32 0, %v98_v30  ;;  %v103_v34 = vsub.s32 1, %v98_v30 }
  0x2a   :  { %301 = vmatmul.mubr.f32.gmra.mrb[2].mxu1 %v24_v59  ;;  %1892 = vmatpush1.bf16.msra.mxu0 %v2885_v60  ;;  %v391_v59 = vld [vmem:[%s3470_s2 + $0x180] sm:$0xff]  ;;  %v393_v0 = vld [vmem:[%s3470_s2 + $0x190] sm:$0xff]  ;;  %v3078_v4 = vpack.c.bf16 %v398_v57, %v394_v55  ;;  %v400_v5 = vld [vmem:[%s3470_s2 + $0x1c8] sm:$0xff]  ;;  %v111_v42 = vsub.s32 3, %v98_v30 }
  0x2b   :  { %1924 = vmatpush1.bf16.msra.mxu1 %v2895_v63  ;;  %193 = vmatprep.mubr.f32.mxu0 %v2590_v3  ;;  %v397_v1 = vld [vmem:[%s3470_s2 + $0x1b0] sm:$0xff]  ;;  %v404_v7 = vld [vmem:[%s3470_s2 + $0x1e8] sm:$0xff]  ;;  %v402_v11 = vld [vmem:[%s3470_s2 + $0x1d8] sm:$0xff] }
  0x2c   :  { %306 = vmatprep.mubr.f32.mxu1 %v2590_v3  ;;  %1894 = vmatprep.subr.bf16.mxu0 %v2905_v2  ;;  %v29_v8 = vld [vmem:[%s3471_s0 + $0x30] sm:$0xff]  ;;  %v406_v12 = vld [vmem:[%s3470_s2 + $0x1f8] sm:$0xff]  ;;  %v3100_v14 = vpack.c.bf16 %v397_v1, %v393_v0  ;;  %v399_v15 = vld [vmem:[%s3470_s2 + $0x1c0] sm:$0xff]  ;;  %v3110_v18 = vpack.c.bf16 %v404_v7, %v400_v5 }
  0x2d   :  { %194 = vmatmul.mubr.f32.gmra.mrb[4].mxu0 %v25_v9  ;;  %1926 = vmatprep.subr.bf16.mxu1 %v2914_v6  ;;  %v403_v17 = vld [vmem:[%s3470_s2 + $0x1e0] sm:$0xff]  ;;  %v401_v20 = vld [vmem:[%s3470_s2 + $0x1d0] sm:$0xff]  ;;  %v30_v24 = vld [vmem:[%s3471_s0 + $0x38] sm:$0xff] }
  0x2e   :  { %307 = vmatmul.mubr.f32.gmra.mrb[4].mxu1 %v25_v9  ;;  %1896 = vmatpush1.bf16.msra.mxu0 %v2926_v10  ;;  %v3090_v9 = vpack.c.bf16 %v395_v61, %v391_v59  ;;  %v405_v21 = vld [vmem:[%s3470_s2 + $0x1f0] sm:$0xff]  ;;  %v3125_v25 = vpack.c.bf16 %v403_v17, %v399_v15  ;;  %v95_v33 = vld [vmem:[%s3472_s3] sm:$0xf]  ;;  %v107_v59 = vsub.s32 2, %v98_v30 }
  0x2f   :  { %1928 = vmatpush1.bf16.msra.mxu1 %v2936_v13  ;;  %199 = vmatprep.mubr.f32.mxu0 %v2590_v3  ;;  %v3129_v27 = vpack.c.bf16 %v405_v21, %v401_v20  ;;  %v3181_v37 = vrot.slane %v95_v33, %v103_v34  ;;  %v3185_v57 = vrot.slane %v95_v33, %v111_v42 }
  0x30   :  { %312 = vmatprep.mubr.f32.mxu1 %v2590_v3  ;;  %1898 = vmatprep.subr.bf16.mxu0 %v2946_v16  ;;  %v3188_v0 = vrot.slane %v95_v33, %v107_v59 }
  0x31   :  { %200 = vmatmul.mubr.f32.gmra.mrb[6].mxu0 %v26_v22  ;;  %1930 = vmatprep.subr.bf16.mxu1 %v2955_v19 }
  0x32   :  { %313 = vmatmul.mubr.f32.gmra.mrb[6].mxu1 %v26_v22  ;;  %1900 = vmatpush1.bf16.msra.mxu0 %v2967_v23  ;;  %v3119_v22 = vpack.c.bf16 %v406_v12, %v402_v11 }
  0x33   :  { %1932 = vmatpush1.bf16.msra.mxu1 %v2977_v26  ;;  %205 = vmatprep.mubr.f32.mxu0 %v2590_v3 }
  0x34   :  { %318 = vmatprep.mubr.f32.mxu1 %v2590_v3  ;;  %1902 = vmatprep.subr.bf16.mxu0 %v2987_v29 }
  0x35   :  { %206 = vmatmul.mubr.f32.gmra.mrb[8].mxu0 %v27_v35  ;;  %1934 = vmatprep.subr.bf16.mxu1 %v2996_v32 }
  0x36   :  { %319 = vmatmul.mubr.f32.gmra.mrb[8].mxu1 %v27_v35  ;;  %1904 = vmatpush1.bf16.msra.mxu0 %v3008_v36  ;;  %v3179_v35 = vrot.slane %v95_v33, %v99_v31 }
  0x37   :  { %1936 = vmatpush1.bf16.msra.mxu1 %v3018_v40  ;;  %211 = vmatprep.mubr.f32.mxu0 %v2590_v3 }
  0x38   :  { %324 = vmatprep.mubr.f32.mxu1 %v2590_v3  ;;  %1906 = vmatprep.subr.bf16.mxu0 %v3028_v44 }
  0x39   :  { %212 = vmatmul.mubr.f32.gmra.mrb[10].mxu0 %v28_v52  ;;  %1938 = vmatprep.subr.bf16.mxu1 %v3037_v48 }
  0x3a   :  { %325 = vmatmul.mubr.f32.gmra.mrb[10].mxu1 %v28_v52  ;;  %1908 = vmatpush1.bf16.msra.mxu0 %v3049_v54 }
  0x3b   :  { %1940 = vmatpush1.bf16.msra.mxu1 %v3059_v58  ;;  %217 = vmatprep.mubr.f32.mxu0 %v2590_v3 }
  0x3c   :  { %330 = vmatprep.mubr.f32.mxu1 %v2590_v3  ;;  %1910 = vmatprep.subr.bf16.mxu0 %v3069_v62 }
  0x3d   :  { %218 = vmatmul.mubr.f32.gmra.mrb[12].mxu0 %v29_v8  ;;  %1942 = vmatprep.subr.bf16.mxu1 %v3078_v4 }
  0x3e   :  { %331 = vmatmul.mubr.f32.gmra.mrb[12].mxu1 %v29_v8  ;;  %1912 = vmatpush1.bf16.msra.mxu0 %v3090_v9 }
  0x3f   :  { %1944 = vmatpush1.bf16.msra.mxu1 %v3100_v14  ;;  %223 = vmatprep.mubr.f32.mxu0 %v2590_v3 }
  0x40   :  { %336 = vmatprep.mubr.f32.mxu1 %v2590_v3  ;;  %1914 = vmatprep.subr.bf16.mxu0 %v3110_v18 }
  0x41   :  { %224 = vmatmul.mubr.f32.gmra.mrb[14].mxu0 %v30_v24  ;;  %1946 = vmatprep.subr.bf16.mxu1 %v3119_v22 }
  0x42   :  { %337 = vmatmul.mubr.f32.gmra.mrb[14].mxu1 %v30_v24  ;;  %1916 = vmatpush1.bf16.msra.mxu0 %v3125_v25 }
  0x43   :  { %1948 = vmatpush1.bf16.msra.mxu1 %v3129_v27  ;;  %473 = vmatprep.mubr.f32.mxu0 %v2590_v3 }
  0x44   :  { %544 = vmatprep.mubr.f32.mxu1 %v2590_v3  ;;  %1950 = vmatprep.subr.bf16.mxu0 %v2822_v38 }
  0x45   :  { %474 = vmatmul.mubr.f32.vlgmr.msra.gmra.mrb[0].mxu0 %v2590_v3  ;;  %1982 = vmatprep.subr.bf16.mxu1 %v2830_v41 }
  0x46   :  { %545 = vmatmul.mubr.f32.vlgmr.msra.gmra.mrb[0].mxu1 %v2590_v3  ;;  %1952 = vmatpush1.bf16.msra.mxu0 %v2847_v47 }
  0x47   :  { %1984 = vmatpush1.bf16.msra.mxu1 %v2856_v50  ;;  %1954 = vmatprep.subr.bf16.mxu0 %v2865_v53 }
  0x48   :  { %1986 = vmatprep.subr.bf16.mxu1 %v2873_v56  ;;  %644 = vmatprep.mubr.f32.mxu0 %v2590_v3 }
  0x49   :  { %715 = vmatprep.mubr.f32.mxu1 %v2590_v3 }
  0x4a   :  { %1956 = vmatpush1.bf16.msra.mxu0 %v2885_v60 }
  0x4b   :  { %1988 = vmatpush1.bf16.msra.mxu1 %v2895_v63  ;;  %1958 = vmatprep.subr.bf16.mxu0 %v2905_v2 }
  0x4c   :  { %1990 = vmatprep.subr.bf16.mxu1 %v2914_v6 }
  0x4e   :  { %1960 = vmatpush1.bf16.msra.mxu0 %v2926_v10 }
  0x4f   :  { %1992 = vmatpush1.bf16.msra.mxu1 %v2936_v13  ;;  %1962 = vmatprep.subr.bf16.mxu0 %v2946_v16 }
  0x50   :  { %1994 = vmatprep.subr.bf16.mxu1 %v2955_v19 }
  0x52   :  { %1964 = vmatpush1.bf16.msra.mxu0 %v2967_v23 }
  0x53   :  { %1996 = vmatpush1.bf16.msra.mxu1 %v2977_v26  ;;  %1966 = vmatprep.subr.bf16.mxu0 %v2987_v29 }
  0x54   :  { %1998 = vmatprep.subr.bf16.mxu1 %v2996_v32 }
  0x56   :  { %1968 = vmatpush1.bf16.msra.mxu0 %v3008_v36 }
  0x57   :  { %2000 = vmatpush1.bf16.msra.mxu1 %v3018_v40  ;;  %1970 = vmatprep.subr.bf16.mxu0 %v3028_v44 }
  0x58   :  { %2002 = vmatprep.subr.bf16.mxu1 %v3037_v48 }
  0x5a   :  { %1972 = vmatpush1.bf16.msra.mxu0 %v3049_v54 }
  0x5b   :  { %2004 = vmatpush1.bf16.msra.mxu1 %v3059_v58  ;;  %1974 = vmatprep.subr.bf16.mxu0 %v3069_v62 }
  0x5c   :  { %2006 = vmatprep.subr.bf16.mxu1 %v3078_v4 }
  0x5e   :  { %1976 = vmatpush1.bf16.msra.mxu0 %v3090_v9 }
  0x5f   :  { %2008 = vmatpush1.bf16.msra.mxu1 %v3100_v14  ;;  %1978 = vmatprep.subr.bf16.mxu0 %v3110_v18 }
  0x60   :  { %2010 = vmatprep.subr.bf16.mxu1 %v3119_v22 }
  0x62   :  { %1980 = vmatpush1.bf16.msra.mxu0 %v3125_v25 }
  0x63   :  { %2012 = vmatpush1.bf16.msra.mxu1 %v3129_v27  ;;  %2014 = vmatprep.subr.bf16.mxu0 %v2822_v38 }
  0x64   :  { %2046 = vmatprep.subr.bf16.mxu1 %v2830_v41 }
 0x118   :  { %v475_v39 = vpop.f32.mrb[0].mxu0 }
 0x119   :  { %v2397_v43 = vadd.f32 %v475_v39, %v3179_v35  ;;  %v546_v45 = vpop.f32.mrb[0].mxu1  ;;  %v477_v46 = vpop.f32.mrb[1].mxu0 }
 0x11a   :  { %v2398_v49 = vadd.f32 %v477_v46, %v3181_v37  ;;  %v548_v51 = vpop.f32.mrb[1].mxu1  ;;  %v2413_v5 = vadd.f32 %v546_v45, %v3188_v0 }
 0x11b   :  { %v1790_v52 = vmul.f32 -1.442695, %v2397_v43  ;;  %v2414_v61 = vadd.f32 %v548_v51, %v3185_v57 }
 0x11c   :  { %v1791_v55 = vmul.f32 -1.442695, %v2398_v49 }
 0x11d   :  { %2462 = vpow2.f32 %v1790_v52  ;;  %v1792_v1 = vmul.f32 -1.442695, %v2414_v61 }
 0x11e   :  { %2464 = vpow2.f32 %v1791_v55 }
 0x11f   :  { %2466 = vpow2.f32 %v1792_v1 }
 0x120   :  { %2468 = vtanh.f32 %v2413_v5 }
 0x127   :  { %v2463_v7 = vpop.eup %2462 }
 0x128   :  { %v2465_v8 = vpop.eup %2464  ;;  %v558_v11 = vadd.f32 1.0, %v2463_v7 }
 0x129   :  { %v564_v12 = vadd.f32 1.0, %v2465_v8  ;;  %v2467_v15 = vpop.eup %2466 }
 0x12a   :  { %2470 = vrcp.f32 %v558_v11  ;;  %v2469_v17 = vpop.eup %2468  ;;  %v571_v28 = vadd.f32 1.0, %v2467_v15 }
 0x12b   :  { %2472 = vrcp.f32 %v564_v12 }
 0x12c   :  { %2474 = vrcp.f32 %v571_v28 }
 0x134   :  { %v2471_v20 = vpop.eup %2470 }
 0x135   :  { %v2473_v21 = vpop.eup %2472  ;;  %v575_v24 = vmul.f32 %v2471_v20, %v2469_v17 }
 0x136   :  { %v574_v30 = vmul.f32 0.0, %v2473_v21  ;;  %v2475_v33 = vpop.eup %2474 }
 0x138   :  { %v3191_v31 = vadd.f32 %v575_v24, %v574_v30 }
 0x13a   :  { %2476 = vtanh.f32 %v3191_v31 }
 0x144   :  { %v2477_v34 = vpop.eup %2476 }
 0x145   :  { %v578_v39 = vmul.f32 %v2477_v34, %v2475_v33 }
 0x147   :  { %579 = vst [vmem:[%s3473_s4] sm:$0xff] %v578_v39  ;;  %645 = vmatmul.mubr.f32.vlgmr.msra.gmra.mrb[2].mxu0 %v578_v39  ;;  %716 = vmatmul.mubr.f32.vlgmr.msra.gmra.mrb[2].mxu1 %v578_v39 }
 0x148   :  { %2016 = vmatpush1.bf16.msra.mxu0 %v2847_v47  ;;  %2048 = vmatpush1.bf16.msra.mxu1 %v2856_v50 }
 0x149   :  { %2018 = vmatprep.subr.bf16.mxu0 %v2865_v53  ;;  %2050 = vmatprep.subr.bf16.mxu1 %v2873_v56 }
 0x14a   :  { %816 = vmatprep.mubr.f32.mxu0 %v2590_v3  ;;  %887 = vmatprep.mubr.f32.mxu1 %v2590_v3 }
 0x14c   :  { %2020 = vmatpush1.bf16.msra.mxu0 %v2885_v60  ;;  %2052 = vmatpush1.bf16.msra.mxu1 %v2895_v63 }
 0x14d   :  { %2022 = vmatprep.subr.bf16.mxu0 %v2905_v2  ;;  %2054 = vmatprep.subr.bf16.mxu1 %v2914_v6 }
 0x150   :  { %2024 = vmatpush1.bf16.msra.mxu0 %v2926_v10  ;;  %2056 = vmatpush1.bf16.msra.mxu1 %v2936_v13 }
 0x151   :  { %2026 = vmatprep.subr.bf16.mxu0 %v2946_v16  ;;  %2058 = vmatprep.subr.bf16.mxu1 %v2955_v19 }
 0x154   :  { %2028 = vmatpush1.bf16.msra.mxu0 %v2967_v23  ;;  %2060 = vmatpush1.bf16.msra.mxu1 %v2977_v26 }
 0x155   :  { %2030 = vmatprep.subr.bf16.mxu0 %v2987_v29  ;;  %2062 = vmatprep.subr.bf16.mxu1 %v2996_v32 }
 0x158   :  { %2032 = vmatpush1.bf16.msra.mxu0 %v3008_v36  ;;  %2064 = vmatpush1.bf16.msra.mxu1 %v3018_v40 }
 0x159   :  { %2034 = vmatprep.subr.bf16.mxu0 %v3028_v44  ;;  %2066 = vmatprep.subr.bf16.mxu1 %v3037_v48 }
 0x15c   :  { %2036 = vmatpush1.bf16.msra.mxu0 %v3049_v54  ;;  %2068 = vmatpush1.bf16.msra.mxu1 %v3059_v58 }
 0x15d   :  { %2038 = vmatprep.subr.bf16.mxu0 %v3069_v62  ;;  %2070 = vmatprep.subr.bf16.mxu1 %v3078_v4 }
 0x160   :  { %2040 = vmatpush1.bf16.msra.mxu0 %v3090_v9  ;;  %2072 = vmatpush1.bf16.msra.mxu1 %v3100_v14 }
 0x161   :  { %2042 = vmatprep.subr.bf16.mxu0 %v3110_v18  ;;  %2074 = vmatprep.subr.bf16.mxu1 %v3119_v22 }
 0x164   :  { %2044 = vmatpush1.bf16.msra.mxu0 %v3125_v25  ;;  %2076 = vmatpush1.bf16.msra.mxu1 %v3129_v27 }
 0x165   :  { %2078 = vmatprep.subr.bf16.mxu0 %v2822_v38  ;;  %2110 = vmatprep.subr.bf16.mxu1 %v2830_v41 }
 0x21a   :  { %v646_v42 = vpop.f32.mrb[2].mxu0  ;;  %v717_v43 = vpop.f32.mrb[2].mxu1 }
 0x21b   :  { %v2399_v45 = vadd.f32 %v646_v42, %v3179_v35  ;;  %v648_v46 = vpop.f32.mrb[3].mxu0  ;;  %v719_v49 = vpop.f32.mrb[3].mxu1  ;;  %v2415_v1 = vadd.f32 %v717_v43, %v3188_v0 }
 0x21c   :  { %v2400_v51 = vadd.f32 %v648_v46, %v3181_v37  ;;  %v2416_v59 = vadd.f32 %v719_v49, %v3185_v57 }
 0x21d   :  { %v1793_v52 = vmul.f32 -1.442695, %v2399_v45 }
 0x21e   :  { %v1794_v55 = vmul.f32 -1.442695, %v2400_v51  ;;  %v1795_v61 = vmul.f32 -1.442695, %v2416_v59 }
 0x21f   :  { %2478 = vpow2.f32 %v1793_v52 }
 0x220   :  { %2480 = vpow2.f32 %v1794_v55 }
 0x221   :  { %2482 = vpow2.f32 %v1795_v61 }
 0x222   :  { %2484 = vtanh.f32 %v2415_v1 }
 0x229   :  { %v2479_v5 = vpop.eup %2478 }
 0x22a   :  { %v2481_v7 = vpop.eup %2480  ;;  %v729_v8 = vadd.f32 1.0, %v2479_v5 }
 0x22b   :  { %v735_v11 = vadd.f32 1.0, %v2481_v7  ;;  %v2483_v12 = vpop.eup %2482 }
 0x22c   :  { %2486 = vrcp.f32 %v729_v8  ;;  %v2485_v15 = vpop.eup %2484  ;;  %v742_v24 = vadd.f32 1.0, %v2483_v12 }
 0x22d   :  { %2488 = vrcp.f32 %v735_v11 }
 0x22e   :  { %2490 = vrcp.f32 %v742_v24 }
 0x236   :  { %v2487_v17 = vpop.eup %2486 }
 0x237   :  { %v2489_v20 = vpop.eup %2488  ;;  %v746_v21 = vmul.f32 %v2487_v17, %v2485_v15 }
 0x238   :  { %v745_v28 = vmul.f32 %v2489_v20, %v3191_v31  ;;  %v2491_v33 = vpop.eup %2490 }
 0x23a   :  { %v3236_v30 = vadd.f32 %v746_v21, %v745_v28 }
 0x23c   :  { %2492 = vtanh.f32 %v3236_v30 }
 0x246   :  { %v2493_v34 = vpop.eup %2492 }
 0x247   :  { %v749_v39 = vmul.f32 %v2493_v34, %v2491_v33 }
 0x249   :  { %1796 = vst [vmem:[%s3473_s4 + $0x8] sm:$0xff] %v749_v39  ;;  %817 = vmatmul.mubr.f32.vlgmr.msra.gmra.mrb[4].mxu0 %v749_v39  ;;  %888 = vmatmul.mubr.f32.vlgmr.msra.gmra.mrb[4].mxu1 %v749_v39 }
 0x24a   :  { %2080 = vmatpush1.bf16.msra.mxu0 %v2847_v47  ;;  %2112 = vmatpush1.bf16.msra.mxu1 %v2856_v50 }
 0x24b   :  { %2082 = vmatprep.subr.bf16.mxu0 %v2865_v53  ;;  %2114 = vmatprep.subr.bf16.mxu1 %v2873_v56 }
 0x24c   :  { %988 = vmatprep.mubr.f32.mxu0 %v2590_v3  ;;  %1059 = vmatprep.mubr.f32.mxu1 %v2590_v3 }
 0x24e   :  { %2084 = vmatpush1.bf16.msra.mxu0 %v2885_v60  ;;  %2116 = vmatpush1.bf16.msra.mxu1 %v2895_v63 }
 0x24f   :  { %2086 = vmatprep.subr.bf16.mxu0 %v2905_v2  ;;  %2118 = vmatprep.subr.bf16.mxu1 %v2914_v6 }
 0x252   :  { %2088 = vmatpush1.bf16.msra.mxu0 %v2926_v10  ;;  %2120 = vmatpush1.bf16.msra.mxu1 %v2936_v13 }
 0x253   :  { %2090 = vmatprep.subr.bf16.mxu0 %v2946_v16  ;;  %2122 = vmatprep.subr.bf16.mxu1 %v2955_v19 }
 0x256   :  { %2092 = vmatpush1.bf16.msra.mxu0 %v2967_v23  ;;  %2124 = vmatpush1.bf16.msra.mxu1 %v2977_v26 }
 0x257   :  { %2094 = vmatprep.subr.bf16.mxu0 %v2987_v29  ;;  %2126 = vmatprep.subr.bf16.mxu1 %v2996_v32 }
 0x25a   :  { %2096 = vmatpush1.bf16.msra.mxu0 %v3008_v36  ;;  %2128 = vmatpush1.bf16.msra.mxu1 %v3018_v40 }
 0x25b   :  { %2098 = vmatprep.subr.bf16.mxu0 %v3028_v44  ;;  %2130 = vmatprep.subr.bf16.mxu1 %v3037_v48 }
 0x25e   :  { %2100 = vmatpush1.bf16.msra.mxu0 %v3049_v54  ;;  %2132 = vmatpush1.bf16.msra.mxu1 %v3059_v58 }
 0x25f   :  { %2102 = vmatprep.subr.bf16.mxu0 %v3069_v62  ;;  %2134 = vmatprep.subr.bf16.mxu1 %v3078_v4 }
 0x262   :  { %2104 = vmatpush1.bf16.msra.mxu0 %v3090_v9  ;;  %2136 = vmatpush1.bf16.msra.mxu1 %v3100_v14 }
 0x263   :  { %2106 = vmatprep.subr.bf16.mxu0 %v3110_v18  ;;  %2138 = vmatprep.subr.bf16.mxu1 %v3119_v22 }
 0x266   :  { %2108 = vmatpush1.bf16.msra.mxu0 %v3125_v25  ;;  %2140 = vmatpush1.bf16.msra.mxu1 %v3129_v27 }
 0x267   :  { %2142 = vmatprep.subr.bf16.mxu0 %v2822_v38  ;;  %2174 = vmatprep.subr.bf16.mxu1 %v2830_v41 }
 0x31c   :  { %v818_v31 = vpop.f32.mrb[4].mxu0  ;;  %v889_v42 = vpop.f32.mrb[4].mxu1 }
 0x31d   :  { %v2401_v43 = vadd.f32 %v818_v31, %v3179_v35  ;;  %v820_v45 = vpop.f32.mrb[5].mxu0  ;;  %v891_v46 = vpop.f32.mrb[5].mxu1  ;;  %v2417_v61 = vadd.f32 %v889_v42, %v3188_v0 }
 0x31e   :  { %v2402_v49 = vadd.f32 %v820_v45, %v3181_v37  ;;  %v2418_v55 = vadd.f32 %v891_v46, %v3185_v57 }
 0x31f   :  { %v1797_v51 = vmul.f32 -1.442695, %v2401_v43 }
 0x320   :  { %v1798_v52 = vmul.f32 -1.442695, %v2402_v49  ;;  %v1799_v59 = vmul.f32 -1.442695, %v2418_v55 }
 0x321   :  { %2494 = vpow2.f32 %v1797_v51 }
 0x322   :  { %2496 = vpow2.f32 %v1798_v52 }
 0x323   :  { %2498 = vpow2.f32 %v1799_v59 }
 0x324   :  { %2500 = vtanh.f32 %v2417_v61 }
 0x32b   :  { %v2495_v1 = vpop.eup %2494 }
 0x32c   :  { %v2497_v5 = vpop.eup %2496  ;;  %v901_v7 = vadd.f32 1.0, %v2495_v1 }
 0x32d   :  { %v907_v8 = vadd.f32 1.0, %v2497_v5  ;;  %v2499_v11 = vpop.eup %2498 }
 0x32e   :  { %2502 = vrcp.f32 %v901_v7  ;;  %v2501_v12 = vpop.eup %2500  ;;  %v914_v21 = vadd.f32 1.0, %v2499_v11 }
 0x32f   :  { %2504 = vrcp.f32 %v907_v8 }
 0x330   :  { %2506 = vrcp.f32 %v914_v21 }
 0x338   :  { %v2503_v15 = vpop.eup %2502 }
 0x339   :  { %v2505_v17 = vpop.eup %2504  ;;  %v918_v20 = vmul.f32 %v2503_v15, %v2501_v12 }
 0x33a   :  { %v917_v24 = vmul.f32 %v2505_v17, %v3236_v30  ;;  %v2507_v33 = vpop.eup %2506 }
 0x33c   :  { %v3281_v28 = vadd.f32 %v918_v20, %v917_v24 }
 0x33e   :  { %2508 = vtanh.f32 %v3281_v28 }
 0x348   :  { %v2509_v34 = vpop.eup %2508 }
 0x349   :  { %v921_v39 = vmul.f32 %v2509_v34, %v2507_v33 }
 0x34b   :  { %1800 = vst [vmem:[%s3473_s4 + $0x10] sm:$0xff] %v921_v39  ;;  %989 = vmatmul.mubr.f32.vlgmr.msra.gmra.mrb[6].mxu0 %v921_v39  ;;  %1060 = vmatmul.mubr.f32.vlgmr.msra.gmra.mrb[6].mxu1 %v921_v39 }
 0x34c   :  { %2144 = vmatpush1.bf16.msra.mxu0 %v2847_v47  ;;  %2176 = vmatpush1.bf16.msra.mxu1 %v2856_v50 }
 0x34d   :  { %2146 = vmatprep.subr.bf16.mxu0 %v2865_v53  ;;  %2178 = vmatprep.subr.bf16.mxu1 %v2873_v56 }
 0x34e   :  { %1160 = vmatprep.mubr.f32.mxu0 %v2590_v3  ;;  %1231 = vmatprep.mubr.f32.mxu1 %v2590_v3 }
 0x350   :  { %2148 = vmatpush1.bf16.msra.mxu0 %v2885_v60  ;;  %2180 = vmatpush1.bf16.msra.mxu1 %v2895_v63 }
 0x351   :  { %2150 = vmatprep.subr.bf16.mxu0 %v2905_v2  ;;  %2182 = vmatprep.subr.bf16.mxu1 %v2914_v6 }
 0x354   :  { %2152 = vmatpush1.bf16.msra.mxu0 %v2926_v10  ;;  %2184 = vmatpush1.bf16.msra.mxu1 %v2936_v13 }
 0x355   :  { %2154 = vmatprep.subr.bf16.mxu0 %v2946_v16  ;;  %2186 = vmatprep.subr.bf16.mxu1 %v2955_v19 }
 0x358   :  { %2156 = vmatpush1.bf16.msra.mxu0 %v2967_v23  ;;  %2188 = vmatpush1.bf16.msra.mxu1 %v2977_v26 }
 0x359   :  { %2158 = vmatprep.subr.bf16.mxu0 %v2987_v29  ;;  %2190 = vmatprep.subr.bf16.mxu1 %v2996_v32 }
 0x35c   :  { %2160 = vmatpush1.bf16.msra.mxu0 %v3008_v36  ;;  %2192 = vmatpush1.bf16.msra.mxu1 %v3018_v40 }
 0x35d   :  { %2162 = vmatprep.subr.bf16.mxu0 %v3028_v44  ;;  %2194 = vmatprep.subr.bf16.mxu1 %v3037_v48 }
 0x360   :  { %2164 = vmatpush1.bf16.msra.mxu0 %v3049_v54  ;;  %2196 = vmatpush1.bf16.msra.mxu1 %v3059_v58 }
 0x361   :  { %2166 = vmatprep.subr.bf16.mxu0 %v3069_v62  ;;  %2198 = vmatprep.subr.bf16.mxu1 %v3078_v4 }
 0x364   :  { %2168 = vmatpush1.bf16.msra.mxu0 %v3090_v9  ;;  %2200 = vmatpush1.bf16.msra.mxu1 %v3100_v14 }
 0x365   :  { %2170 = vmatprep.subr.bf16.mxu0 %v3110_v18  ;;  %2202 = vmatprep.subr.bf16.mxu1 %v3119_v22 }
 0x368   :  { %2172 = vmatpush1.bf16.msra.mxu0 %v3125_v25  ;;  %2204 = vmatpush1.bf16.msra.mxu1 %v3129_v27 }
 0x369   :  { %2206 = vmatprep.subr.bf16.mxu0 %v2822_v38  ;;  %2238 = vmatprep.subr.bf16.mxu1 %v2830_v41 }
 0x41e   :  { %v990_v30 = vpop.f32.mrb[6].mxu0  ;;  %v1061_v31 = vpop.f32.mrb[6].mxu1 }
 0x41f   :  { %v2403_v42 = vadd.f32 %v990_v30, %v3179_v35  ;;  %v992_v43 = vpop.f32.mrb[7].mxu0  ;;  %v1063_v45 = vpop.f32.mrb[7].mxu1  ;;  %v2419_v59 = vadd.f32 %v1061_v31, %v3188_v0 }
 0x420   :  { %v2404_v46 = vadd.f32 %v992_v43, %v3181_v37  ;;  %v2420_v52 = vadd.f32 %v1063_v45, %v3185_v57 }
 0x421   :  { %v1801_v49 = vmul.f32 -1.442695, %v2403_v42 }
 0x422   :  { %v1802_v51 = vmul.f32 -1.442695, %v2404_v46  ;;  %v1803_v55 = vmul.f32 -1.442695, %v2420_v52 }
 0x423   :  { %2510 = vpow2.f32 %v1801_v49 }
 0x424   :  { %2512 = vpow2.f32 %v1802_v51 }
 0x425   :  { %2514 = vpow2.f32 %v1803_v55 }
 0x426   :  { %2516 = vtanh.f32 %v2419_v59 }
 0x42d   :  { %v2511_v61 = vpop.eup %2510 }
 0x42e   :  { %v2513_v1 = vpop.eup %2512  ;;  %v1073_v5 = vadd.f32 1.0, %v2511_v61 }
 0x42f   :  { %v1079_v7 = vadd.f32 1.0, %v2513_v1  ;;  %v2515_v8 = vpop.eup %2514 }
 0x430   :  { %2518 = vrcp.f32 %v1073_v5  ;;  %v2517_v11 = vpop.eup %2516  ;;  %v1086_v20 = vadd.f32 1.0, %v2515_v8 }
 0x431   :  { %2520 = vrcp.f32 %v1079_v7 }
 0x432   :  { %2522 = vrcp.f32 %v1086_v20 }
 0x43a   :  { %v2519_v12 = vpop.eup %2518 }
 0x43b   :  { %v2521_v15 = vpop.eup %2520  ;;  %v1090_v17 = vmul.f32 %v2519_v12, %v2517_v11 }
 0x43c   :  { %v1089_v21 = vmul.f32 %v2521_v15, %v3281_v28  ;;  %v2523_v33 = vpop.eup %2522 }
 0x43e   :  { %v3326_v24 = vadd.f32 %v1090_v17, %v1089_v21 }
 0x440   :  { %2524 = vtanh.f32 %v3326_v24 }
 0x44a   :  { %v2525_v34 = vpop.eup %2524 }
 0x44b   :  { %v1093_v39 = vmul.f32 %v2525_v34, %v2523_v33 }
 0x44d   :  { %1804 = vst [vmem:[%s3473_s4 + $0x18] sm:$0xff] %v1093_v39  ;;  %1161 = vmatmul.mubr.f32.vlgmr.msra.gmra.mrb[8].mxu0 %v1093_v39  ;;  %1232 = vmatmul.mubr.f32.vlgmr.msra.gmra.mrb[8].mxu1 %v1093_v39 }
 0x44e   :  { %2208 = vmatpush1.bf16.msra.mxu0 %v2847_v47  ;;  %2240 = vmatpush1.bf16.msra.mxu1 %v2856_v50 }
 0x44f   :  { %2210 = vmatprep.subr.bf16.mxu0 %v2865_v53  ;;  %2242 = vmatprep.subr.bf16.mxu1 %v2873_v56 }
 0x450   :  { %1332 = vmatprep.mubr.f32.mxu0 %v2590_v3  ;;  %1403 = vmatprep.mubr.f32.mxu1 %v2590_v3 }
 0x452   :  { %2212 = vmatpush1.bf16.msra.mxu0 %v2885_v60  ;;  %2244 = vmatpush1.bf16.msra.mxu1 %v2895_v63 }
 0x453   :  { %2214 = vmatprep.subr.bf16.mxu0 %v2905_v2  ;;  %2246 = vmatprep.subr.bf16.mxu1 %v2914_v6 }
 0x456   :  { %2216 = vmatpush1.bf16.msra.mxu0 %v2926_v10  ;;  %2248 = vmatpush1.bf16.msra.mxu1 %v2936_v13 }
 0x457   :  { %2218 = vmatprep.subr.bf16.mxu0 %v2946_v16  ;;  %2250 = vmatprep.subr.bf16.mxu1 %v2955_v19 }
 0x45a   :  { %2220 = vmatpush1.bf16.msra.mxu0 %v2967_v23  ;;  %2252 = vmatpush1.bf16.msra.mxu1 %v2977_v26 }
 0x45b   :  { %2222 = vmatprep.subr.bf16.mxu0 %v2987_v29  ;;  %2254 = vmatprep.subr.bf16.mxu1 %v2996_v32 }
 0x45e   :  { %2224 = vmatpush1.bf16.msra.mxu0 %v3008_v36  ;;  %2256 = vmatpush1.bf16.msra.mxu1 %v3018_v40 }
 0x45f   :  { %2226 = vmatprep.subr.bf16.mxu0 %v3028_v44  ;;  %2258 = vmatprep.subr.bf16.mxu1 %v3037_v48 }
 0x462   :  { %2228 = vmatpush1.bf16.msra.mxu0 %v3049_v54  ;;  %2260 = vmatpush1.bf16.msra.mxu1 %v3059_v58 }
 0x463   :  { %2230 = vmatprep.subr.bf16.mxu0 %v3069_v62  ;;  %2262 = vmatprep.subr.bf16.mxu1 %v3078_v4 }
 0x466   :  { %2232 = vmatpush1.bf16.msra.mxu0 %v3090_v9  ;;  %2264 = vmatpush1.bf16.msra.mxu1 %v3100_v14 }
 0x467   :  { %2234 = vmatprep.subr.bf16.mxu0 %v3110_v18  ;;  %2266 = vmatprep.subr.bf16.mxu1 %v3119_v22 }
 0x46a   :  { %2236 = vmatpush1.bf16.msra.mxu0 %v3125_v25  ;;  %2268 = vmatpush1.bf16.msra.mxu1 %v3129_v27 }
 0x46b   :  { %2270 = vmatprep.subr.bf16.mxu0 %v2822_v38  ;;  %2302 = vmatprep.subr.bf16.mxu1 %v2830_v41 }
 0x520   :  { %v1162_v28 = vpop.f32.mrb[8].mxu0  ;;  %v1233_v30 = vpop.f32.mrb[8].mxu1 }
 0x521   :  { %v2405_v31 = vadd.f32 %v1162_v28, %v3179_v35  ;;  %v1164_v42 = vpop.f32.mrb[9].mxu0  ;;  %v1235_v43 = vpop.f32.mrb[9].mxu1  ;;  %v2421_v55 = vadd.f32 %v1233_v30, %v3188_v0 }
 0x522   :  { %v2406_v45 = vadd.f32 %v1164_v42, %v3181_v37  ;;  %v2422_v51 = vadd.f32 %v1235_v43, %v3185_v57 }
 0x523   :  { %v1805_v46 = vmul.f32 -1.442695, %v2405_v31 }
 0x524   :  { %v1806_v49 = vmul.f32 -1.442695, %v2406_v45  ;;  %v1807_v52 = vmul.f32 -1.442695, %v2422_v51 }
 0x525   :  { %2526 = vpow2.f32 %v1805_v46 }
 0x526   :  { %2528 = vpow2.f32 %v1806_v49 }
 0x527   :  { %2530 = vpow2.f32 %v1807_v52 }
 0x528   :  { %2532 = vtanh.f32 %v2421_v55 }
 0x52f   :  { %v2527_v59 = vpop.eup %2526 }
 0x530   :  { %v2529_v61 = vpop.eup %2528  ;;  %v1245_v1 = vadd.f32 1.0, %v2527_v59 }
 0x531   :  { %v1251_v5 = vadd.f32 1.0, %v2529_v61  ;;  %v2531_v7 = vpop.eup %2530 }
 0x532   :  { %2534 = vrcp.f32 %v1245_v1  ;;  %v2533_v8 = vpop.eup %2532  ;;  %v1258_v17 = vadd.f32 1.0, %v2531_v7 }
 0x533   :  { %2536 = vrcp.f32 %v1251_v5 }
 0x534   :  { %2538 = vrcp.f32 %v1258_v17 }
 0x53c   :  { %v2535_v11 = vpop.eup %2534 }
 0x53d   :  { %v2537_v12 = vpop.eup %2536  ;;  %v1262_v15 = vmul.f32 %v2535_v11, %v2533_v8 }
 0x53e   :  { %v1261_v20 = vmul.f32 %v2537_v12, %v3326_v24  ;;  %v2539_v33 = vpop.eup %2538 }
 0x540   :  { %v3371_v21 = vadd.f32 %v1262_v15, %v1261_v20 }
 0x542   :  { %2540 = vtanh.f32 %v3371_v21 }
 0x54c   :  { %v2541_v34 = vpop.eup %2540 }
 0x54d   :  { %v1265_v39 = vmul.f32 %v2541_v34, %v2539_v33 }
 0x54f   :  { %1808 = vst [vmem:[%s3473_s4 + $0x20] sm:$0xff] %v1265_v39  ;;  %1333 = vmatmul.mubr.f32.vlgmr.msra.gmra.mrb[10].mxu0 %v1265_v39  ;;  %1404 = vmatmul.mubr.f32.vlgmr.msra.gmra.mrb[10].mxu1 %v1265_v39 }
 0x550   :  { %2272 = vmatpush1.bf16.msra.mxu0 %v2847_v47  ;;  %2304 = vmatpush1.bf16.msra.mxu1 %v2856_v50 }
 0x551   :  { %2274 = vmatprep.subr.bf16.mxu0 %v2865_v53  ;;  %2306 = vmatprep.subr.bf16.mxu1 %v2873_v56 }
 0x552   :  { %1504 = vmatprep.mubr.f32.mxu0 %v2590_v3  ;;  %1575 = vmatprep.mubr.f32.mxu1 %v2590_v3 }
 0x554   :  { %2276 = vmatpush1.bf16.msra.mxu0 %v2885_v60  ;;  %2308 = vmatpush1.bf16.msra.mxu1 %v2895_v63 }
 0x555   :  { %2278 = vmatprep.subr.bf16.mxu0 %v2905_v2  ;;  %2310 = vmatprep.subr.bf16.mxu1 %v2914_v6 }
 0x558   :  { %2280 = vmatpush1.bf16.msra.mxu0 %v2926_v10  ;;  %2312 = vmatpush1.bf16.msra.mxu1 %v2936_v13 }
 0x559   :  { %2282 = vmatprep.subr.bf16.mxu0 %v2946_v16  ;;  %2314 = vmatprep.subr.bf16.mxu1 %v2955_v19 }
 0x55c   :  { %2284 = vmatpush1.bf16.msra.mxu0 %v2967_v23  ;;  %2316 = vmatpush1.bf16.msra.mxu1 %v2977_v26 }
 0x55d   :  { %2286 = vmatprep.subr.bf16.mxu0 %v2987_v29  ;;  %2318 = vmatprep.subr.bf16.mxu1 %v2996_v32 }
 0x560   :  { %2288 = vmatpush1.bf16.msra.mxu0 %v3008_v36  ;;  %2320 = vmatpush1.bf16.msra.mxu1 %v3018_v40 }
 0x561   :  { %2290 = vmatprep.subr.bf16.mxu0 %v3028_v44  ;;  %2322 = vmatprep.subr.bf16.mxu1 %v3037_v48 }
 0x564   :  { %2292 = vmatpush1.bf16.msra.mxu0 %v3049_v54  ;;  %2324 = vmatpush1.bf16.msra.mxu1 %v3059_v58 }
 0x565   :  { %2294 = vmatprep.subr.bf16.mxu0 %v3069_v62  ;;  %2326 = vmatprep.subr.bf16.mxu1 %v3078_v4 }
 0x568   :  { %2296 = vmatpush1.bf16.msra.mxu0 %v3090_v9  ;;  %2328 = vmatpush1.bf16.msra.mxu1 %v3100_v14 }
 0x569   :  { %2298 = vmatprep.subr.bf16.mxu0 %v3110_v18  ;;  %2330 = vmatprep.subr.bf16.mxu1 %v3119_v22 }
 0x56c   :  { %2300 = vmatpush1.bf16.msra.mxu0 %v3125_v25  ;;  %2332 = vmatpush1.bf16.msra.mxu1 %v3129_v27 }
 0x56d   :  { %2334 = vmatprep.subr.bf16.mxu0 %v2822_v38  ;;  %2366 = vmatprep.subr.bf16.mxu1 %v2830_v41 }
 0x622   :  { %v1334_v24 = vpop.f32.mrb[10].mxu0  ;;  %v1405_v28 = vpop.f32.mrb[10].mxu1 }
 0x623   :  { %v2407_v30 = vadd.f32 %v1334_v24, %v3179_v35  ;;  %v1336_v31 = vpop.f32.mrb[11].mxu0  ;;  %v1407_v42 = vpop.f32.mrb[11].mxu1  ;;  %v2423_v52 = vadd.f32 %v1405_v28, %v3188_v0 }
 0x624   :  { %v2408_v43 = vadd.f32 %v1336_v31, %v3181_v37  ;;  %v2424_v49 = vadd.f32 %v1407_v42, %v3185_v57 }
 0x625   :  { %v1809_v45 = vmul.f32 -1.442695, %v2407_v30 }
 0x626   :  { %v1810_v46 = vmul.f32 -1.442695, %v2408_v43  ;;  %v1811_v51 = vmul.f32 -1.442695, %v2424_v49 }
 0x627   :  { %2542 = vpow2.f32 %v1809_v45 }
 0x628   :  { %2544 = vpow2.f32 %v1810_v46 }
 0x629   :  { %2546 = vpow2.f32 %v1811_v51 }
 0x62a   :  { %2548 = vtanh.f32 %v2423_v52 }
 0x631   :  { %v2543_v38 = vpop.eup %2542 }
 0x632   :  { %v2545_v55 = vpop.eup %2544  ;;  %v1417_v41 = vadd.f32 1.0, %v2543_v38 }
 0x633   :  { %v1423_v59 = vadd.f32 1.0, %v2545_v55  ;;  %v2547_v61 = vpop.eup %2546 }
 0x634   :  { %2550 = vrcp.f32 %v1417_v41  ;;  %v2549_v1 = vpop.eup %2548  ;;  %v1430_v11 = vadd.f32 1.0, %v2547_v61 }
 0x635   :  { %2552 = vrcp.f32 %v1423_v59 }
 0x636   :  { %2554 = vrcp.f32 %v1430_v11 }
 0x63e   :  { %v2551_v5 = vpop.eup %2550 }
 0x63f   :  { %v2553_v7 = vpop.eup %2552  ;;  %v1434_v8 = vmul.f32 %v2551_v5, %v2549_v1 }
 0x640   :  { %v1433_v12 = vmul.f32 %v2553_v7, %v3371_v21  ;;  %v2555_v17 = vpop.eup %2554 }
 0x642   :  { %v3416_v15 = vadd.f32 %v1434_v8, %v1433_v12 }
 0x644   :  { %2556 = vtanh.f32 %v3416_v15 }
 0x64e   :  { %v2557_v20 = vpop.eup %2556 }
 0x64f   :  { %v1437_v33 = vmul.f32 %v2557_v20, %v2555_v17 }
 0x651   :  { %1812 = vst [vmem:[%s3473_s4 + $0x28] sm:$0xff] %v1437_v33  ;;  %1505 = vmatmul.mubr.f32.vlgmr.msra.gmra.mrb[12].mxu0 %v1437_v33  ;;  %1576 = vmatmul.mubr.f32.vlgmr.msra.gmra.mrb[12].mxu1 %v1437_v33 }
 0x652   :  { %2336 = vmatpush1.bf16.msra.mxu0 %v2847_v47  ;;  %2368 = vmatpush1.bf16.msra.mxu1 %v2856_v50 }
 0x653   :  { %2338 = vmatprep.subr.bf16.mxu0 %v2865_v53  ;;  %2370 = vmatprep.subr.bf16.mxu1 %v2873_v56 }
 0x654   :  { %1676 = vmatprep.mubr.f32.mxu0 %v2590_v3  ;;  %1747 = vmatprep.mubr.f32.mxu1 %v2590_v3 }
 0x656   :  { %2340 = vmatpush1.bf16.msra.mxu0 %v2885_v60  ;;  %2372 = vmatpush1.bf16.msra.mxu1 %v2895_v63 }
 0x657   :  { %2342 = vmatprep.subr.bf16.mxu0 %v2905_v2  ;;  %2374 = vmatprep.subr.bf16.mxu1 %v2914_v6 }
 0x65a   :  { %2344 = vmatpush1.bf16.msra.mxu0 %v2926_v10  ;;  %2376 = vmatpush1.bf16.msra.mxu1 %v2936_v13 }
 0x65b   :  { %2346 = vmatprep.subr.bf16.mxu0 %v2946_v16  ;;  %2378 = vmatprep.subr.bf16.mxu1 %v2955_v19 }
 0x65e   :  { %2348 = vmatpush1.bf16.msra.mxu0 %v2967_v23  ;;  %2380 = vmatpush1.bf16.msra.mxu1 %v2977_v26 }
 0x65f   :  { %2350 = vmatprep.subr.bf16.mxu0 %v2987_v29  ;;  %2382 = vmatprep.subr.bf16.mxu1 %v2996_v32 }
 0x662   :  { %2352 = vmatpush1.bf16.msra.mxu0 %v3008_v36  ;;  %2384 = vmatpush1.bf16.msra.mxu1 %v3018_v40 }
 0x663   :  { %2354 = vmatprep.subr.bf16.mxu0 %v3028_v44  ;;  %2386 = vmatprep.subr.bf16.mxu1 %v3037_v48 }
 0x666   :  { %2356 = vmatpush1.bf16.msra.mxu0 %v3049_v54  ;;  %2388 = vmatpush1.bf16.msra.mxu1 %v3059_v58 }
 0x667   :  { %2358 = vmatprep.subr.bf16.mxu0 %v3069_v62  ;;  %2390 = vmatprep.subr.bf16.mxu1 %v3078_v4 }
 0x66a   :  { %2360 = vmatpush1.bf16.msra.mxu0 %v3090_v9  ;;  %2392 = vmatpush1.bf16.msra.mxu1 %v3100_v14 }
 0x66b   :  { %2362 = vmatprep.subr.bf16.mxu0 %v3110_v18  ;;  %2394 = vmatprep.subr.bf16.mxu1 %v3119_v22 }
 0x66e   :  { %2364 = vmatpush1.bf16.msra.mxu0 %v3125_v25  ;;  %2396 = vmatpush1.bf16.msra.mxu1 %v3129_v27 }
 0x724   :  { %v1506_v3 = vpop.f32.mrb[12].mxu0  ;;  %v1577_v47 = vpop.f32.mrb[12].mxu1 }
 0x725   :  { %v2409_v50 = vadd.f32 %v1506_v3, %v3179_v35  ;;  %v1508_v53 = vpop.f32.mrb[13].mxu0  ;;  %v1579_v56 = vpop.f32.mrb[13].mxu1  ;;  %v2425_v13 = vadd.f32 %v1577_v47, %v3188_v0 }
 0x726   :  { %v2410_v60 = vadd.f32 %v1508_v53, %v3181_v37  ;;  %v2426_v6 = vadd.f32 %v1579_v56, %v3185_v57 }
 0x727   :  { %v1813_v63 = vmul.f32 -1.442695, %v2409_v50 }
 0x728   :  { %v1814_v2 = vmul.f32 -1.442695, %v2410_v60  ;;  %v1815_v10 = vmul.f32 -1.442695, %v2426_v6 }
 0x729   :  { %2558 = vpow2.f32 %v1813_v63 }
 0x72a   :  { %2560 = vpow2.f32 %v1814_v2 }
 0x72b   :  { %2562 = vpow2.f32 %v1815_v10 }
 0x72c   :  { %2564 = vtanh.f32 %v2425_v13 }
 0x733   :  { %v2559_v16 = vpop.eup %2558 }
 0x734   :  { %v2561_v19 = vpop.eup %2560  ;;  %v1589_v23 = vadd.f32 1.0, %v2559_v16 }
 0x735   :  { %v1595_v26 = vadd.f32 1.0, %v2561_v19  ;;  %v2563_v29 = vpop.eup %2562 }
 0x736   :  { %2566 = vrcp.f32 %v1589_v23  ;;  %v2565_v32 = vpop.eup %2564  ;;  %v1602_v48 = vadd.f32 1.0, %v2563_v29 }
 0x737   :  { %2568 = vrcp.f32 %v1595_v26 }
 0x738   :  { %2570 = vrcp.f32 %v1602_v48 }
 0x740   :  { %v2567_v36 = vpop.eup %2566 }
 0x741   :  { %v2569_v40 = vpop.eup %2568  ;;  %v1606_v44 = vmul.f32 %v2567_v36, %v2565_v32 }
 0x742   :  { %v1605_v54 = vmul.f32 %v2569_v40, %v3416_v15  ;;  %v2571_v62 = vpop.eup %2570 }
 0x744   :  { %v1607_v58 = vadd.f32 %v1606_v44, %v1605_v54 }
 0x746   :  { %2572 = vtanh.f32 %v1607_v58 }
 0x750   :  { %v2573_v4 = vpop.eup %2572 }
 0x751   :  { %v1609_v9 = vmul.f32 %v2573_v4, %v2571_v62 }
 0x753   :  { %1816 = vst [vmem:[%s3473_s4 + $0x30] sm:$0xff] %v1609_v9  ;;  %1677 = vmatmul.mubr.f32.vlgmr.msra.gmra.mrb[14].mxu0 %v1609_v9  ;;  %1748 = vmatmul.mubr.f32.vlgmr.msra.gmra.mrb[14].mxu1 %v1609_v9 }
 0x826   :  { %v1678_v14 = vpop.f32.mrb[14].mxu0  ;;  %v1749_v18 = vpop.f32.mrb[14].mxu1 }
 0x827   :  { %v2411_v22 = vadd.f32 %v1678_v14, %v3179_v35  ;;  %v1680_v25 = vpop.f32.mrb[15].mxu0  ;;  %v1751_v27 = vpop.f32.mrb[15].mxu1  ;;  %v2427_v30 = vadd.f32 %v1749_v18, %v3188_v0 }
 0x828   :  { %v2412_v21 = vadd.f32 %v1680_v25, %v3181_v37  ;;  %v2428_v24 = vadd.f32 %v1751_v27, %v3185_v57 }
 0x829   :  { %v1817_v34 = vmul.f32 -1.442695, %v2411_v22 }
 0x82a   :  { %v1818_v39 = vmul.f32 -1.442695, %v2412_v21  ;;  %v1819_v28 = vmul.f32 -1.442695, %v2428_v24 }
 0x82b   :  { %2574 = vpow2.f32 %v1817_v34 }
 0x82c   :  { %2576 = vpow2.f32 %v1818_v39 }
 0x82d   :  { %2578 = vpow2.f32 %v1819_v28 }
 0x82e   :  { %2580 = vtanh.f32 %v2427_v30 }
 0x835   :  { %v2575_v31 = vpop.eup %2574 }
 0x836   :  { %v2577_v42 = vpop.eup %2576  ;;  %v1761_v43 = vadd.f32 1.0, %v2575_v31 }
 0x837   :  { %v1767_v45 = vadd.f32 1.0, %v2577_v42  ;;  %v2579_v35 = vpop.eup %2578 }
 0x838   :  { %2582 = vrcp.f32 %v1761_v43  ;;  %v2581_v46 = vpop.eup %2580  ;;  %v1774_v52 = vadd.f32 1.0, %v2579_v35 }
 0x839   :  { %2584 = vrcp.f32 %v1767_v45 }
 0x83a   :  { %2586 = vrcp.f32 %v1774_v52 }
 0x842   :  { %v2583_v37 = vpop.eup %2582 }
 0x843   :  { %v2585_v49 = vpop.eup %2584  ;;  %v1778_v51 = vmul.f32 %v2583_v37, %v2581_v46 }
 0x844   :  { %v1777_v38 = vmul.f32 %v2585_v49, %v1607_v58  ;;  %v2587_v57 = vpop.eup %2586 }
 0x846   :  { %v1779_v55 = vadd.f32 %v1778_v51, %v1777_v38 }
 0x848   :  { %2588 = vtanh.f32 %v1779_v55 }
 0x852   :  { %v2589_v0 = vpop.eup %2588 }
 0x853   :  { %v1781_v41 = vmul.f32 %v2589_v0, %v2587_v57 }
 0x855   :  { %1820 = vst [vmem:[%s3473_s4 + $0x38] sm:$0xff] %v1781_v41 }

// kernel: frm_lstm_forward.3
= control target key start
LH: loop header
LB: loop body
LE: loop exit
PB: predicated region body
PF: predicated region fallthrough
CT: control target
= control target key end

     0   :  { %v3918_v3 = vmov 0.0   ;;  %s3910_s1 = inlined_call_operand.vmem [shape: f32[128,512], index: 1, kind: input, shape index: {}]   ;;  %s3911_s2 = inlined_call_operand.vmem [shape: f32[128,512], index: 2, kind: input, shape index: {}]   ;;  %s3912_s0 = inlined_call_operand.vmem [shape: f32[8,8,128], index: 0, kind: input, shape index: {}]   ;;  %s3913_s3 = inlined_call_operand.vmem [shape: f32[1,512], index: 3, kind: input, shape index: {}]   ;;  %s3914_s6 = inlined_call_operand.vmem [shape: f32[8,8,128], index: 6, kind: output, shape index: {0}]   ;;  %s3915_s4 = inlined_call_operand.vmem [shape: f32[128,128], index: 4, kind: input, shape index: {}]   ;;  %s3916_s5 = inlined_call_operand.vmem [shape: f32[1,128], index: 5, kind: input, shape index: {}]   ;;  %s3917_s7 = inlined_call_operand.vmem [shape: f32[8,8,128], index: 7, kind: output, shape index: {1}]  }
   0x1   :  { %v40_v0 = vld [vmem:[%s3910_s1 + $0x8] sm:$0xff]  ;;  %v39_v2 = vld [vmem:[%s3910_s1] sm:$0xff]  ;;  %189 = vmatprep.mubr.f32.mxu1 %v3918_v3  ;;  %481 = vmatprep.mubr.f32.mxu0 %v3918_v3 }
   0x2   :  { %v44_v1 = vld [vmem:[%s3910_s1 + $0x28] sm:$0xff]  ;;  %v43_v5 = vld [vmem:[%s3910_s1 + $0x20] sm:$0xff] }
   0x3   :  { %v2046_v4 = vpack.c.bf16 %v44_v1, %v40_v0  ;;  %v352_v6 = vld [vmem:[%s3911_s2 + $0x8] sm:$0xff]  ;;  %v2048_v8 = vpack.c.bf16 %v43_v5, %v39_v2  ;;  %v351_v10 = vld [vmem:[%s3911_s2] sm:$0xff] }
   0x4   :  { %v356_v7 = vld [vmem:[%s3911_s2 + $0x28] sm:$0xff]  ;;  %v355_v11 = vld [vmem:[%s3911_s2 + $0x20] sm:$0xff] }
   0x5   :  { %v2908_v9 = vpack.c.bf16 %v356_v7, %v352_v6  ;;  %v48_v12 = vld [vmem:[%s3910_s1 + $0x48] sm:$0xff]  ;;  %2047 = vmatprep.subr.bf16.mxu1 %v2046_v4  ;;  %v2919_v13 = vpack.c.bf16 %v355_v11, %v351_v10  ;;  %v47_v15 = vld [vmem:[%s3910_s1 + $0x40] sm:$0xff] }
   0x6   :  { %v52_v14 = vld [vmem:[%s3910_s1 + $0x68] sm:$0xff]  ;;  %v51_v16 = vld [vmem:[%s3910_s1 + $0x60] sm:$0xff]  ;;  %2049 = vmatpush1.bf16.msra.mxu1 %v2048_v8 }
   0x7   :  { %2111 = vmatprep.subr.bf16.mxu0 %v2908_v9  ;;  %v2050_v17 = vpack.c.bf16 %v52_v14, %v48_v12  ;;  %v2052_v18 = vpack.c.bf16 %v51_v16, %v47_v15  ;;  %v360_v19 = vld [vmem:[%s3911_s2 + $0x48] sm:$0xff]  ;;  %v359_v21 = vld [vmem:[%s3911_s2 + $0x40] sm:$0xff] }
   0x8   :  { %v364_v20 = vld [vmem:[%s3911_s2 + $0x68] sm:$0xff]  ;;  %2113 = vmatpush1.bf16.msra.mxu0 %v2919_v13  ;;  %v363_v23 = vld [vmem:[%s3911_s2 + $0x60] sm:$0xff] }
   0x9   :  { %v2941_v22 = vpack.c.bf16 %v364_v20, %v360_v19  ;;  %v56_v24 = vld [vmem:[%s3910_s1 + $0x88] sm:$0xff]  ;;  %2051 = vmatprep.subr.bf16.mxu1 %v2050_v17  ;;  %v2952_v26 = vpack.c.bf16 %v363_v23, %v359_v21  ;;  %v55_v28 = vld [vmem:[%s3910_s1 + $0x80] sm:$0xff] }
   0xa   :  { %v60_v25 = vld [vmem:[%s3910_s1 + $0xa8] sm:$0xff]  ;;  %v59_v29 = vld [vmem:[%s3910_s1 + $0xa0] sm:$0xff]  ;;  %2053 = vmatpush1.bf16.msra.mxu1 %v2052_v18 }
   0xb   :  { %v2054_v27 = vpack.c.bf16 %v60_v25, %v56_v24  ;;  %v368_v30 = vld [vmem:[%s3911_s2 + $0x88] sm:$0xff]  ;;  %2115 = vmatprep.subr.bf16.mxu0 %v2941_v22  ;;  %v367_v32 = vld [vmem:[%s3911_s2 + $0x80] sm:$0xff]  ;;  %v2056_v34 = vpack.c.bf16 %v59_v29, %v55_v28 }
   0xc   :  { %v372_v31 = vld [vmem:[%s3911_s2 + $0xa8] sm:$0xff]  ;;  %v371_v33 = vld [vmem:[%s3911_s2 + $0xa0] sm:$0xff]  ;;  %2117 = vmatpush1.bf16.msra.mxu0 %v2952_v26 }
   0xd   :  { %v2973_v35 = vpack.c.bf16 %v372_v31, %v368_v30  ;;  %v64_v36 = vld [vmem:[%s3910_s1 + $0xc8] sm:$0xff]  ;;  %v63_v38 = vld [vmem:[%s3910_s1 + $0xc0] sm:$0xff]  ;;  %2055 = vmatprep.subr.bf16.mxu1 %v2054_v27  ;;  %v2985_v39 = vpack.c.bf16 %v371_v33, %v367_v32 }
   0xe   :  { %v68_v37 = vld [vmem:[%s3910_s1 + $0xe8] sm:$0xff]  ;;  %v67_v41 = vld [vmem:[%s3910_s1 + $0xe0] sm:$0xff]  ;;  %2057 = vmatpush1.bf16.msra.mxu1 %v2056_v34 }
   0xf   :  { %v2058_v40 = vpack.c.bf16 %v68_v37, %v64_v36  ;;  %v376_v42 = vld [vmem:[%s3911_s2 + $0xc8] sm:$0xff]  ;;  %2119 = vmatprep.subr.bf16.mxu0 %v2973_v35  ;;  %v375_v45 = vld [vmem:[%s3911_s2 + $0xc0] sm:$0xff]  ;;  %v2060_v49 = vpack.c.bf16 %v67_v41, %v63_v38  ;;  %v42_v37 = vld [vmem:[%s3910_s1 + $0x18] sm:$0xff] }
  0x10   :  { %v380_v43 = vld [vmem:[%s3911_s2 + $0xe8] sm:$0xff]  ;;  %v379_v46 = vld [vmem:[%s3911_s2 + $0xe0] sm:$0xff]  ;;  %2121 = vmatpush1.bf16.msra.mxu0 %v2985_v39  ;;  %v46_v38 = vld [vmem:[%s3910_s1 + $0x38] sm:$0xff] }
  0x11   :  { %v2997_v44 = vpack.c.bf16 %v380_v43, %v376_v42  ;;  %v72_v47 = vld [vmem:[%s3910_s1 + $0x108] sm:$0xff]  ;;  %2059 = vmatprep.subr.bf16.mxu1 %v2058_v40  ;;  %v3018_v52 = vpack.c.bf16 %v379_v46, %v375_v45  ;;  %v71_v54 = vld [vmem:[%s3910_s1 + $0x100] sm:$0xff]  ;;  %v2078_v42 = vpack.c.bf16 %v46_v38, %v42_v37  ;;  %v41_v43 = vld [vmem:[%s3910_s1 + $0x10] sm:$0xff] }
  0x12   :  { %v76_v48 = vld [vmem:[%s3910_s1 + $0x128] sm:$0xff]  ;;  %v75_v55 = vld [vmem:[%s3910_s1 + $0x120] sm:$0xff]  ;;  %2061 = vmatpush1.bf16.msra.mxu1 %v2060_v49  ;;  %v45_v45 = vld [vmem:[%s3910_s1 + $0x30] sm:$0xff] }
  0x13   :  { %v384_v50 = vld [vmem:[%s3911_s2 + $0x108] sm:$0xff]  ;;  %v2062_v53 = vpack.c.bf16 %v76_v48, %v72_v47  ;;  %v383_v56 = vld [vmem:[%s3911_s2 + $0x100] sm:$0xff]  ;;  %2123 = vmatprep.subr.bf16.mxu0 %v2997_v44  ;;  %v2064_v63 = vpack.c.bf16 %v75_v55, %v71_v54  ;;  %v50_v46 = vld [vmem:[%s3910_s1 + $0x58] sm:$0xff]  ;;  %v2080_v49 = vpack.c.bf16 %v45_v45, %v41_v43 }
  0x14   :  { %v388_v51 = vld [vmem:[%s3911_s2 + $0x128] sm:$0xff]  ;;  %v387_v58 = vld [vmem:[%s3911_s2 + $0x120] sm:$0xff]  ;;  %2125 = vmatpush1.bf16.msra.mxu0 %v3018_v52  ;;  %v54_v47 = vld [vmem:[%s3910_s1 + $0x78] sm:$0xff] }
  0x15   :  { %v3030_v57 = vpack.c.bf16 %v388_v51, %v384_v50  ;;  %v80_v59 = vld [vmem:[%s3910_s1 + $0x148] sm:$0xff]  ;;  %2063 = vmatprep.subr.bf16.mxu1 %v2062_v53  ;;  %v3048_v0 = vpack.c.bf16 %v387_v58, %v383_v56  ;;  %v79_v2 = vld [vmem:[%s3910_s1 + $0x140] sm:$0xff]  ;;  %v2082_v50 = vpack.c.bf16 %v54_v47, %v50_v46  ;;  %v49_v51 = vld [vmem:[%s3910_s1 + $0x50] sm:$0xff] }
  0x16   :  { %v84_v60 = vld [vmem:[%s3910_s1 + $0x168] sm:$0xff]  ;;  %v83_v4 = vld [vmem:[%s3910_s1 + $0x160] sm:$0xff]  ;;  %2065 = vmatpush1.bf16.msra.mxu1 %v2064_v63  ;;  %v53_v53 = vld [vmem:[%s3910_s1 + $0x70] sm:$0xff] }
  0x17   :  { %v392_v61 = vld [vmem:[%s3911_s2 + $0x148] sm:$0xff]  ;;  %v2066_v1 = vpack.c.bf16 %v84_v60, %v80_v59  ;;  %v391_v5 = vld [vmem:[%s3911_s2 + $0x140] sm:$0xff]  ;;  %2127 = vmatprep.subr.bf16.mxu0 %v3030_v57  ;;  %v2068_v14 = vpack.c.bf16 %v83_v4, %v79_v2  ;;  %v58_v54 = vld [vmem:[%s3910_s1 + $0x98] sm:$0xff]  ;;  %v2084_v58 = vpack.c.bf16 %v53_v53, %v49_v51 }
  0x18   :  { %v396_v62 = vld [vmem:[%s3911_s2 + $0x168] sm:$0xff]  ;;  %v395_v7 = vld [vmem:[%s3911_s2 + $0x160] sm:$0xff]  ;;  %2129 = vmatpush1.bf16.msra.mxu0 %v3048_v0  ;;  %v62_v55 = vld [vmem:[%s3910_s1 + $0xb8] sm:$0xff] }
  0x19   :  { %v3060_v6 = vpack.c.bf16 %v396_v62, %v392_v61  ;;  %v88_v8 = vld [vmem:[%s3910_s1 + $0x188] sm:$0xff]  ;;  %2067 = vmatprep.subr.bf16.mxu1 %v2066_v1  ;;  %v3078_v15 = vpack.c.bf16 %v395_v7, %v391_v5  ;;  %v87_v17 = vld [vmem:[%s3910_s1 + $0x180] sm:$0xff]  ;;  %v2086_v59 = vpack.c.bf16 %v62_v55, %v58_v54  ;;  %v57_v60 = vld [vmem:[%s3910_s1 + $0x90] sm:$0xff] }
  0x1a   :  { %v92_v10 = vld [vmem:[%s3910_s1 + $0x1a8] sm:$0xff]  ;;  %v91_v18 = vld [vmem:[%s3910_s1 + $0x1a0] sm:$0xff]  ;;  %2069 = vmatpush1.bf16.msra.mxu1 %v2068_v14  ;;  %v61_v61 = vld [vmem:[%s3910_s1 + $0xb0] sm:$0xff] }
  0x1b   :  { %v400_v11 = vld [vmem:[%s3911_s2 + $0x188] sm:$0xff]  ;;  %v2070_v16 = vpack.c.bf16 %v92_v10, %v88_v8  ;;  %v399_v19 = vld [vmem:[%s3911_s2 + $0x180] sm:$0xff]  ;;  %2131 = vmatprep.subr.bf16.mxu0 %v3060_v6  ;;  %v2072_v28 = vpack.c.bf16 %v91_v18, %v87_v17  ;;  %v66_v62 = vld [vmem:[%s3910_s1 + $0xd8] sm:$0xff]  ;;  %v2088_v2 = vpack.c.bf16 %v61_v61, %v57_v60 }
  0x1c   :  { %v404_v12 = vld [vmem:[%s3911_s2 + $0x1a8] sm:$0xff]  ;;  %v403_v21 = vld [vmem:[%s3911_s2 + $0x1a0] sm:$0xff]  ;;  %2133 = vmatpush1.bf16.msra.mxu0 %v3078_v15  ;;  %v70_v63 = vld [vmem:[%s3910_s1 + $0xf8] sm:$0xff] }
  0x1d   :  { %v3090_v20 = vpack.c.bf16 %v404_v12, %v400_v11  ;;  %v96_v23 = vld [vmem:[%s3910_s1 + $0x1c8] sm:$0xff]  ;;  %2071 = vmatprep.subr.bf16.mxu1 %v2070_v16  ;;  %v3108_v29 = vpack.c.bf16 %v403_v21, %v399_v19  ;;  %v95_v31 = vld [vmem:[%s3910_s1 + $0x1c0] sm:$0xff]  ;;  %v3194_v1 = vld [vmem:[%s3912_s0 + $0x10] sm:$0xff]  ;;  %v2090_v4 = vpack.c.bf16 %v70_v63, %v66_v62 }
  0x1e   :  { %v100_v24 = vld [vmem:[%s3910_s1 + $0x1e8] sm:$0xff]  ;;  %v99_v32 = vld [vmem:[%s3910_s1 + $0x1e0] sm:$0xff]  ;;  %2073 = vmatpush1.bf16.msra.mxu1 %v2072_v28  ;;  %v65_v5 = vld [vmem:[%s3910_s1 + $0xd0] sm:$0xff] }
  0x1f   :  { %v408_v25 = vld [vmem:[%s3911_s2 + $0x1c8] sm:$0xff]  ;;  %v2074_v30 = vpack.c.bf16 %v100_v24, %v96_v23  ;;  %v407_v33 = vld [vmem:[%s3911_s2 + $0x1c0] sm:$0xff]  ;;  %2135 = vmatprep.subr.bf16.mxu0 %v3090_v20  ;;  %v2076_v40 = vpack.c.bf16 %v99_v32, %v95_v31  ;;  %v69_v7 = vld [vmem:[%s3910_s1 + $0xf0] sm:$0xff] }
  0x20   :  { %v412_v27 = vld [vmem:[%s3911_s2 + $0x1e8] sm:$0xff]  ;;  %v411_v36 = vld [vmem:[%s3911_s2 + $0x1e0] sm:$0xff]  ;;  %2137 = vmatpush1.bf16.msra.mxu0 %v3108_v29  ;;  %v74_v8 = vld [vmem:[%s3910_s1 + $0x118] sm:$0xff]  ;;  %v2092_v12 = vpack.c.bf16 %v69_v7, %v65_v5 }
  0x21   :  { %v3120_v34 = vpack.c.bf16 %v412_v27, %v408_v25  ;;  %2075 = vmatprep.subr.bf16.mxu1 %v2074_v30  ;;  %v3132_v41 = vpack.c.bf16 %v411_v36, %v407_v33  ;;  %v3150_v48 = vld [vmem:[%s3912_s0] sm:$0xff]  ;;  %v3171_v56 = vld [vmem:[%s3912_s0 + $0x8] sm:$0xff]  ;;  %v78_v10 = vld [vmem:[%s3910_s1 + $0x138] sm:$0xff] }
  0x22   :  { %2077 = vmatpush1.bf16.msra.mxu1 %v2076_v40  ;;  %v3215_v11 = vld [vmem:[%s3912_s0 + $0x18] sm:$0xff]  ;;  %v2094_v14 = vpack.c.bf16 %v78_v10, %v74_v8  ;;  %v73_v16 = vld [vmem:[%s3910_s1 + $0x110] sm:$0xff]  ;;  %v3236_v21 = vld [vmem:[%s3912_s0 + $0x20] sm:$0xff] }
  0x23   :  { %2139 = vmatprep.subr.bf16.mxu0 %v3120_v34  ;;  %2079 = vmatprep.subr.bf16.mxu1 %v2078_v42  ;;  %v77_v17 = vld [vmem:[%s3910_s1 + $0x130] sm:$0xff]  ;;  %v82_v18 = vld [vmem:[%s3910_s1 + $0x158] sm:$0xff]  ;;  %v3257_v31 = vld [vmem:[%s3912_s0 + $0x28] sm:$0xff] }
  0x24   :  { %2141 = vmatpush1.bf16.msra.mxu0 %v3132_v41  ;;  %v86_v19 = vld [vmem:[%s3910_s1 + $0x178] sm:$0xff]  ;;  %v2096_v23 = vpack.c.bf16 %v77_v17, %v73_v16  ;;  %v81_v25 = vld [vmem:[%s3910_s1 + $0x150] sm:$0xff] }
  0x25   :  { %2175 = vmatprep.subr.bf16.mxu0 %v2908_v9  ;;  %190 = vmatmul.mubr.f32.vlgmr.msra.gmra.mrb[0].mxu1 %v3150_v48  ;;  %v2098_v24 = vpack.c.bf16 %v86_v19, %v82_v18  ;;  %v85_v27 = vld [vmem:[%s3910_s1 + $0x170] sm:$0xff]  ;;  %v90_v28 = vld [vmem:[%s3910_s1 + $0x198] sm:$0xff] }
  0x26   :  { %2081 = vmatpush1.bf16.msra.mxu1 %v2080_v49  ;;  %195 = vmatprep.mubr.f32.mxu1 %v3918_v3  ;;  %v94_v30 = vld [vmem:[%s3910_s1 + $0x1b8] sm:$0xff]  ;;  %v2100_v32 = vpack.c.bf16 %v85_v27, %v81_v25  ;;  %v89_v36 = vld [vmem:[%s3910_s1 + $0x190] sm:$0xff] }
  0x27   :  { %482 = vmatmul.mubr.f32.vlgmr.msra.gmra.mrb[0].mxu0 %v3918_v3  ;;  %2083 = vmatprep.subr.bf16.mxu1 %v2082_v50  ;;  %v2102_v33 = vpack.c.bf16 %v94_v30, %v90_v28  ;;  %v93_v37 = vld [vmem:[%s3910_s1 + $0x1b0] sm:$0xff]  ;;  %v98_v38 = vld [vmem:[%s3910_s1 + $0x1d8] sm:$0xff] }
  0x28   :  { %2177 = vmatpush1.bf16.msra.mxu0 %v2919_v13  ;;  %652 = vmatprep.mubr.f32.mxu0 %v3918_v3  ;;  %v102_v40 = vld [vmem:[%s3910_s1 + $0x1f8] sm:$0xff]  ;;  %v3278_v42 = vld [vmem:[%s3912_s0 + $0x30] sm:$0xff]  ;;  %v2104_v43 = vpack.c.bf16 %v93_v37, %v89_v36 }
  0x29   :  { %196 = vmatmul.mubr.f32.gmra.mrb[2].mxu1 %v3171_v56  ;;  %2179 = vmatprep.subr.bf16.mxu0 %v2941_v22  ;;  %v2106_v45 = vpack.c.bf16 %v102_v40, %v98_v38  ;;  %v97_v46 = vld [vmem:[%s3910_s1 + $0x1d0] sm:$0xff]  ;;  %v354_v49 = vld [vmem:[%s3911_s2 + $0x18] sm:$0xff] }
  0x2a   :  { %2085 = vmatpush1.bf16.msra.mxu1 %v2084_v58  ;;  %201 = vmatprep.mubr.f32.mxu1 %v3918_v3  ;;  %v101_v47 = vld [vmem:[%s3910_s1 + $0x1f0] sm:$0xff]  ;;  %v358_v50 = vld [vmem:[%s3911_s2 + $0x38] sm:$0xff] }
  0x2b   :  { %2087 = vmatprep.subr.bf16.mxu1 %v2086_v59  ;;  %v3299_v51 = vld [vmem:[%s3912_s0 + $0x38] sm:$0xff]  ;;  %v2108_v53 = vpack.c.bf16 %v101_v47, %v97_v46  ;;  %v3301_v54 = vpack.c.bf16 %v358_v50, %v354_v49  ;;  %v353_v55 = vld [vmem:[%s3911_s2 + $0x10] sm:$0xff] }
  0x2c   :  { %2181 = vmatpush1.bf16.msra.mxu0 %v2952_v26  ;;  %v357_v58 = vld [vmem:[%s3911_s2 + $0x30] sm:$0xff]  ;;  %v362_v59 = vld [vmem:[%s3911_s2 + $0x58] sm:$0xff] }
  0x2d   :  { %202 = vmatmul.mubr.f32.gmra.mrb[4].mxu1 %v3194_v1  ;;  %2183 = vmatprep.subr.bf16.mxu0 %v2973_v35  ;;  %v366_v60 = vld [vmem:[%s3911_s2 + $0x78] sm:$0xff]  ;;  %v3319_v61 = vpack.c.bf16 %v357_v58, %v353_v55  ;;  %v361_v63 = vld [vmem:[%s3911_s2 + $0x50] sm:$0xff] }
  0x2e   :  { %2089 = vmatpush1.bf16.msra.mxu1 %v2088_v2  ;;  %207 = vmatprep.mubr.f32.mxu1 %v3918_v3  ;;  %v3322_v62 = vpack.c.bf16 %v366_v60, %v362_v59  ;;  %v365_v2 = vld [vmem:[%s3911_s2 + $0x70] sm:$0xff]  ;;  %v374_v5 = vld [vmem:[%s3911_s2 + $0xb8] sm:$0xff]  ;;  %v103_v59 = vld [vmem:[%s3913_s3] sm:$0xf] }
  0x2f   :  { %2091 = vmatprep.subr.bf16.mxu1 %v2090_v4  ;;  %v370_v4 = vld [vmem:[%s3911_s2 + $0x98] sm:$0xff]  ;;  %v3341_v7 = vpack.c.bf16 %v365_v2, %v361_v63  ;;  %v369_v10 = vld [vmem:[%s3911_s2 + $0x90] sm:$0xff] }
  0x30   :  { %2185 = vmatpush1.bf16.msra.mxu0 %v2985_v39  ;;  %v3344_v8 = vpack.c.bf16 %v374_v5, %v370_v4  ;;  %v377_v18 = vld [vmem:[%s3911_s2 + $0xd0] sm:$0xff]  ;;  %v398_v30 = vld [vmem:[%s3911_s2 + $0x178] sm:$0xff] }
  0x31   :  { %208 = vmatmul.mubr.f32.gmra.mrb[6].mxu1 %v3215_v11  ;;  %2187 = vmatprep.subr.bf16.mxu0 %v2997_v44  ;;  %v381_v19 = vld [vmem:[%s3911_s2 + $0xf0] sm:$0xff]  ;;  %v406_v38 = vld [vmem:[%s3911_s2 + $0x1b8] sm:$0xff] }
  0x32   :  { %2093 = vmatpush1.bf16.msra.mxu1 %v2092_v12  ;;  %213 = vmatprep.mubr.f32.mxu1 %v3918_v3  ;;  %v378_v12 = vld [vmem:[%s3911_s2 + $0xd8] sm:$0xff]  ;;  %v385_v27 = vld [vmem:[%s3911_s2 + $0x110] sm:$0xff] }
  0x33   :  { %2095 = vmatprep.subr.bf16.mxu1 %v2094_v14  ;;  %v382_v14 = vld [vmem:[%s3911_s2 + $0xf8] sm:$0xff]  ;;  %v389_v28 = vld [vmem:[%s3911_s2 + $0x130] sm:$0xff] }
  0x34   :  { %2189 = vmatpush1.bf16.msra.mxu0 %v3018_v52  ;;  %v3364_v17 = vpack.c.bf16 %v382_v14, %v378_v12  ;;  %v393_v36 = vld [vmem:[%s3911_s2 + $0x150] sm:$0xff]  ;;  %v414_v47 = vld [vmem:[%s3911_s2 + $0x1f8] sm:$0xff] }
  0x35   :  { %214 = vmatmul.mubr.f32.gmra.mrb[8].mxu1 %v3236_v21  ;;  %2191 = vmatprep.subr.bf16.mxu0 %v3030_v57  ;;  %v397_v37 = vld [vmem:[%s3911_s2 + $0x170] sm:$0xff] }
  0x36   :  { %2097 = vmatpush1.bf16.msra.mxu1 %v2096_v23  ;;  %219 = vmatprep.mubr.f32.mxu1 %v3918_v3  ;;  %v390_v23 = vld [vmem:[%s3911_s2 + $0x138] sm:$0xff]  ;;  %v3421_v40 = vpack.c.bf16 %v397_v37, %v393_v36  ;;  %v405_v46 = vld [vmem:[%s3911_s2 + $0x1b0] sm:$0xff] }
  0x37   :  { %2099 = vmatprep.subr.bf16.mxu1 %v2098_v24  ;;  %v3381_v24 = vpack.c.bf16 %v381_v19, %v377_v18  ;;  %v413_v55 = vld [vmem:[%s3911_s2 + $0x1f0] sm:$0xff] }
  0x38   :  { %2193 = vmatpush1.bf16.msra.mxu0 %v3048_v0 }
  0x39   :  { %220 = vmatmul.mubr.f32.gmra.mrb[10].mxu1 %v3257_v31  ;;  %2195 = vmatprep.subr.bf16.mxu0 %v3060_v6 }
  0x3a   :  { %2101 = vmatpush1.bf16.msra.mxu1 %v2100_v32  ;;  %225 = vmatprep.mubr.f32.mxu1 %v3918_v3  ;;  %v3401_v32 = vpack.c.bf16 %v389_v28, %v385_v27 }
  0x3b   :  { %2103 = vmatprep.subr.bf16.mxu1 %v2102_v33 }
  0x3c   :  { %2197 = vmatpush1.bf16.msra.mxu0 %v3078_v15 }
  0x3d   :  { %226 = vmatmul.mubr.f32.gmra.mrb[12].mxu1 %v3278_v42  ;;  %2199 = vmatprep.subr.bf16.mxu0 %v3090_v20 }
  0x3e   :  { %2105 = vmatpush1.bf16.msra.mxu1 %v2104_v43  ;;  %231 = vmatprep.mubr.f32.mxu1 %v3918_v3 }
  0x3f   :  { %2107 = vmatprep.subr.bf16.mxu1 %v2106_v45  ;;  %v401_v45 = vld [vmem:[%s3911_s2 + $0x190] sm:$0xff] }
  0x40   :  { %2201 = vmatpush1.bf16.msra.mxu0 %v3108_v29  ;;  %v3441_v49 = vpack.c.bf16 %v405_v46, %v401_v45 }
  0x41   :  { %232 = vmatmul.mubr.f32.gmra.mrb[14].mxu1 %v3299_v51  ;;  %2203 = vmatprep.subr.bf16.mxu0 %v3120_v34 }
  0x42   :  { %2109 = vmatpush1.bf16.msra.mxu1 %v2108_v53  ;;  %302 = vmatprep.mubr.f32.mxu1 %v3918_v3  ;;  %v409_v53 = vld [vmem:[%s3911_s2 + $0x1d0] sm:$0xff] }
  0x43   :  { %2143 = vmatprep.subr.bf16.mxu1 %v3301_v54 }
  0x44   :  { %2205 = vmatpush1.bf16.msra.mxu0 %v3132_v41 }
  0x45   :  { %303 = vmatmul.mubr.f32.vlgmr.msra.gmra.mrb[16].mxu1 %v3150_v48  ;;  %2239 = vmatprep.subr.bf16.mxu0 %v2908_v9  ;;  %v373_v48 = vld [vmem:[%s3911_s2 + $0xb0] sm:$0xff] }
  0x46   :  { %2145 = vmatpush1.bf16.msra.mxu1 %v3319_v61  ;;  %308 = vmatprep.mubr.f32.mxu1 %v3918_v3  ;;  %v3361_v16 = vpack.c.bf16 %v373_v48, %v369_v10 }
  0x47   :  { %2147 = vmatprep.subr.bf16.mxu1 %v3322_v62 }
  0x49   :  { %309 = vmatmul.mubr.f32.gmra.mrb[18].mxu1 %v3171_v56  ;;  %v386_v56 = vld [vmem:[%s3911_s2 + $0x118] sm:$0xff] }
  0x4a   :  { %2149 = vmatpush1.bf16.msra.mxu1 %v3341_v7  ;;  %314 = vmatprep.mubr.f32.mxu1 %v3918_v3  ;;  %v3384_v25 = vpack.c.bf16 %v390_v23, %v386_v56 }
  0x4b   :  { %2151 = vmatprep.subr.bf16.mxu1 %v3344_v8 }
  0x4d   :  { %315 = vmatmul.mubr.f32.gmra.mrb[20].mxu1 %v3194_v1  ;;  %v394_v1 = vld [vmem:[%s3911_s2 + $0x158] sm:$0xff] }
  0x4e   :  { %2153 = vmatpush1.bf16.msra.mxu1 %v3361_v16  ;;  %320 = vmatprep.mubr.f32.mxu1 %v3918_v3  ;;  %v3404_v33 = vpack.c.bf16 %v398_v30, %v394_v1 }
  0x4f   :  { %2155 = vmatprep.subr.bf16.mxu1 %v3364_v17 }
  0x51   :  { %321 = vmatmul.mubr.f32.gmra.mrb[22].mxu1 %v3215_v11  ;;  %v402_v11 = vld [vmem:[%s3911_s2 + $0x198] sm:$0xff] }
  0x52   :  { %2157 = vmatpush1.bf16.msra.mxu1 %v3381_v24  ;;  %326 = vmatprep.mubr.f32.mxu1 %v3918_v3  ;;  %v3424_v43 = vpack.c.bf16 %v406_v38, %v402_v11 }
  0x53   :  { %2159 = vmatprep.subr.bf16.mxu1 %v3384_v25 }
  0x55   :  { %327 = vmatmul.mubr.f32.gmra.mrb[24].mxu1 %v3236_v21  ;;  %v410_v21 = vld [vmem:[%s3911_s2 + $0x1d8] sm:$0xff] }
  0x56   :  { %2161 = vmatpush1.bf16.msra.mxu1 %v3401_v32  ;;  %332 = vmatprep.mubr.f32.mxu1 %v3918_v3  ;;  %v3444_v50 = vpack.c.bf16 %v414_v47, %v410_v21 }
  0x57   :  { %2163 = vmatprep.subr.bf16.mxu1 %v3404_v33 }
  0x59   :  { %333 = vmatmul.mubr.f32.gmra.mrb[26].mxu1 %v3257_v31  ;;  %v3455_v31 = vpack.c.bf16 %v413_v55, %v409_v53 }
  0x5a   :  { %2165 = vmatpush1.bf16.msra.mxu1 %v3421_v40  ;;  %338 = vmatprep.mubr.f32.mxu1 %v3918_v3 }
  0x5b   :  { %2167 = vmatprep.subr.bf16.mxu1 %v3424_v43 }
  0x5d   :  { %339 = vmatmul.mubr.f32.gmra.mrb[28].mxu1 %v3278_v42  ;;  %v105_v42 = vlaneseq }
  0x5e   :  { %2169 = vmatpush1.bf16.msra.mxu1 %v3441_v49  ;;  %344 = vmatprep.mubr.f32.mxu1 %v3918_v3 }
  0x5f   :  { %2171 = vmatprep.subr.bf16.mxu1 %v3444_v50 }
  0x61   :  { %345 = vmatmul.mubr.f32.gmra.mrb[30].mxu1 %v3299_v51  ;;  %v106_v51 = vshrl.u32 %v105_v42, 7 }
  0x62   :  { %2173 = vmatpush1.bf16.msra.mxu1 %v3455_v31  ;;  %552 = vmatprep.mubr.f32.mxu1 %v3918_v3 }
  0x63   :  { %2207 = vmatprep.subr.bf16.mxu1 %v3301_v54  ;;  %v107_v58 = vsub.s32 0, %v106_v51  ;;  %v111_v60 = vsub.s32 1, %v106_v51 }
  0x65   :  { %553 = vmatmul.mubr.f32.vlgmr.msra.gmra.mrb[16].mxu1 %v3918_v3  ;;  %v108_v63 = vrot.slane %v103_v59, %v107_v58  ;;  %v112_v2 = vrot.slane %v103_v59, %v111_v60 }
  0x66   :  { %2209 = vmatpush1.bf16.msra.mxu1 %v3319_v61  ;;  %723 = vmatprep.mubr.f32.mxu1 %v3918_v3 }
  0x67   :  { %2211 = vmatprep.subr.bf16.mxu1 %v3322_v62 }
  0x6a   :  { %2213 = vmatpush1.bf16.msra.mxu1 %v3341_v7 }
  0x6b   :  { %2215 = vmatprep.subr.bf16.mxu1 %v3344_v8 }
  0x6e   :  { %2217 = vmatpush1.bf16.msra.mxu1 %v3361_v16 }
  0x6f   :  { %2219 = vmatprep.subr.bf16.mxu1 %v3364_v17 }
  0x72   :  { %2221 = vmatpush1.bf16.msra.mxu1 %v3381_v24 }
  0x73   :  { %2223 = vmatprep.subr.bf16.mxu1 %v3384_v25 }
  0x76   :  { %2225 = vmatpush1.bf16.msra.mxu1 %v3401_v32 }
  0x77   :  { %2227 = vmatprep.subr.bf16.mxu1 %v3404_v33 }
  0x7a   :  { %2229 = vmatpush1.bf16.msra.mxu1 %v3421_v40 }
  0x7b   :  { %2231 = vmatprep.subr.bf16.mxu1 %v3424_v43 }
  0x7e   :  { %2233 = vmatpush1.bf16.msra.mxu1 %v3441_v49 }
  0x7f   :  { %2235 = vmatprep.subr.bf16.mxu1 %v3444_v50 }
  0x82   :  { %2237 = vmatpush1.bf16.msra.mxu1 %v3455_v31 }
  0x83   :  { %2271 = vmatprep.subr.bf16.mxu1 %v3301_v54 }
  0xf8   :  { %v191_v4 = vpop.f32.mrb[0].mxu1 }
  0xf9   :  { %v192_v5 = vadd.f32 %v191_v4, %v108_v63  ;;  %v193_v10 = vpop.f32.mrb[1].mxu1 }
  0xfa   :  { %v483_v48 = vpop.f32.mrb[0].mxu0  ;;  %v194_v12 = vadd.f32 %v193_v10, %v112_v2 }
  0xfb   :  { %v485_v14 = vpop.f32.mrb[1].mxu0  ;;  %v559_v18 = vadd.f32 %v483_v48, %v192_v5 }
  0xfc   :  { %v560_v19 = vadd.f32 %v485_v14, %v194_v12  ;;  %v197_v56 = vpop.f32.mrb[2].mxu1 }
  0xfd   :  { %v3483_v23 = vadd.f32 %v197_v56, %v108_v63  ;;  %v199_v27 = vpop.f32.mrb[3].mxu1 }
  0xfe   :  { %v3485_v28 = vadd.f32 %v199_v27, %v112_v2 }
 0x100   :  { %v203_v1 = vpop.f32.mrb[4].mxu1 }
 0x101   :  { %v3487_v30 = vadd.f32 %v203_v1, %v108_v63  ;;  %v205_v36 = vpop.f32.mrb[5].mxu1 }
 0x102   :  { %v3489_v37 = vadd.f32 %v205_v36, %v112_v2  ;;  %v1947_v36 = vmul.f32 -1.442695, %v560_v19 }
 0x104   :  { %v209_v11 = vpop.f32.mrb[6].mxu1  ;;  %2719 = vpow2.f32 %v1947_v36 }
 0x105   :  { %v3491_v38 = vadd.f32 %v209_v11, %v108_v63  ;;  %v211_v45 = vpop.f32.mrb[7].mxu1  ;;  %v1946_v11 = vmul.f32 -1.442695, %v559_v18 }
 0x106   :  { %v3493_v46 = vadd.f32 %v211_v45, %v112_v2  ;;  %v115_v45 = vsub.s32 2, %v106_v51 }
 0x107   :  { %2721 = vpow2.f32 %v1946_v11 }
 0x108   :  { %v215_v21 = vpop.f32.mrb[8].mxu1 }
 0x109   :  { %v3495_v47 = vadd.f32 %v215_v21, %v108_v63  ;;  %v217_v53 = vpop.f32.mrb[9].mxu1 }
 0x10a   :  { %v3497_v55 = vadd.f32 %v217_v53, %v112_v2  ;;  %v119_v53 = vsub.s32 3, %v106_v51 }
 0x10c   :  { %v221_v42 = vpop.f32.mrb[10].mxu1 }
 0x10d   :  { %v3499_v58 = vadd.f32 %v221_v42, %v108_v63  ;;  %v223_v60 = vpop.f32.mrb[11].mxu1 }
 0x10e   :  { %v3501_v4 = vadd.f32 %v223_v60, %v112_v2  ;;  %v2720_v21 = vpop.eup %2719 }
 0x10f   :  { %v572_v60 = vadd.f32 1.0, %v2720_v21 }
 0x110   :  { %v227_v5 = vpop.f32.mrb[12].mxu1 }
 0x111   :  { %v3503_v10 = vadd.f32 %v227_v5, %v108_v63  ;;  %v229_v48 = vpop.f32.mrb[13].mxu1  ;;  %v2722_v42 = vpop.eup %2721  ;;  %v3511_v5 = vrot.slane %v103_v59, %v115_v45  ;;  %2723 = vrcp.f32 %v572_v60 }
 0x112   :  { %v3505_v12 = vadd.f32 %v229_v48, %v112_v2  ;;  %v566_v3 = vadd.f32 1.0, %v2722_v42  ;;  %v3513_v48 = vrot.slane %v103_v59, %v119_v53  ;;  %v3922_v42 = vmov 0.0  }
 0x114   :  { %3920 = vst [vmem:[#allocation4_spill] sm:$0xff] %v3505_v12  ;;  %v233_v14 = vpop.f32.mrb[14].mxu1  ;;  %2725 = vrcp.f32 %v566_v3 }
 0x115   :  { %v3507_v56 = vadd.f32 %v233_v14, %v108_v63  ;;  %v235_v27 = vpop.f32.mrb[15].mxu1 }
 0x116   :  { %v3509_v1 = vadd.f32 %v235_v27, %v112_v2 }
 0x118   :  { %3921 = vst [vmem:[#allocation5_spill] sm:$0xff] %v3509_v1 }
 0x11b   :  { %v2724_v14 = vpop.eup %2723 }
 0x11c   :  { %v582_v36 = vmul.f32 0.0, %v2724_v14 }
 0x11e   :  { %v2726_v51 = vpop.eup %2725 }
 0x138   :  { %v554_v12 = vpop.f32.mrb[16].mxu1 }
 0x139   :  { %v2686_v63 = vadd.f32 %v554_v12, %v3511_v5  ;;  %v556_v2 = vpop.f32.mrb[17].mxu1 }
 0x13a   :  { %v2687_v18 = vadd.f32 %v556_v2, %v3513_v48 }
 0x13b   :  { %2727 = vtanh.f32 %v2686_v63 }
 0x13c   :  { %v1948_v19 = vmul.f32 -1.442695, %v2687_v18 }
 0x13e   :  { %2729 = vpow2.f32 %v1948_v19 }
 0x145   :  { %v2728_v27 = vpop.eup %2727 }
 0x146   :  { %v583_v11 = vmul.f32 %v2728_v27, %v2726_v51 }
 0x148   :  { %v2730_v45 = vpop.eup %2729  ;;  %v3517_v21 = vadd.f32 %v583_v11, %v582_v36 }
 0x149   :  { %v579_v59 = vadd.f32 1.0, %v2730_v45 }
 0x14a   :  { %2731 = vtanh.f32 %v3517_v21 }
 0x14b   :  { %2733 = vrcp.f32 %v579_v59 }
 0x154   :  { %v2732_v12 = vpop.eup %2731 }
 0x155   :  { %v2734_v53 = vpop.eup %2733 }
 0x156   :  { %v3520_v3 = vmul.f32 %v2734_v53, %v2732_v12 }
 0x158   :  { %587 = vst [vmem:[%s3914_s6] sm:$0xff] %v3520_v3  ;;  %653 = vmatmul.mubr.f32.vlgmr.msra.gmra.mrb[2].mxu0 %v3520_v3  ;;  %724 = vmatmul.mubr.f32.vlgmr.msra.gmra.mrb[18].mxu1 %v3520_v3 }
 0x159   :  { %2241 = vmatpush1.bf16.msra.mxu0 %v2919_v13  ;;  %2273 = vmatpush1.bf16.msra.mxu1 %v3319_v61 }
 0x15a   :  { %2243 = vmatprep.subr.bf16.mxu0 %v2941_v22  ;;  %2275 = vmatprep.subr.bf16.mxu1 %v3322_v62 }
 0x15b   :  { %824 = vmatprep.mubr.f32.mxu0 %v3922_v42  ;;  %895 = vmatprep.mubr.f32.mxu1 %v3922_v42 }
 0x15d   :  { %2245 = vmatpush1.bf16.msra.mxu0 %v2952_v26  ;;  %2277 = vmatpush1.bf16.msra.mxu1 %v3341_v7 }
 0x15e   :  { %2247 = vmatprep.subr.bf16.mxu0 %v2973_v35  ;;  %2279 = vmatprep.subr.bf16.mxu1 %v3344_v8 }
 0x161   :  { %2249 = vmatpush1.bf16.msra.mxu0 %v2985_v39  ;;  %2281 = vmatpush1.bf16.msra.mxu1 %v3361_v16 }
 0x162   :  { %2251 = vmatprep.subr.bf16.mxu0 %v2997_v44  ;;  %2283 = vmatprep.subr.bf16.mxu1 %v3364_v17 }
 0x165   :  { %2253 = vmatpush1.bf16.msra.mxu0 %v3018_v52  ;;  %2285 = vmatpush1.bf16.msra.mxu1 %v3381_v24 }
 0x166   :  { %2255 = vmatprep.subr.bf16.mxu0 %v3030_v57  ;;  %2287 = vmatprep.subr.bf16.mxu1 %v3384_v25 }
 0x169   :  { %2257 = vmatpush1.bf16.msra.mxu0 %v3048_v0  ;;  %2289 = vmatpush1.bf16.msra.mxu1 %v3401_v32 }
 0x16a   :  { %2259 = vmatprep.subr.bf16.mxu0 %v3060_v6  ;;  %2291 = vmatprep.subr.bf16.mxu1 %v3404_v33 }
 0x16d   :  { %2261 = vmatpush1.bf16.msra.mxu0 %v3078_v15  ;;  %2293 = vmatpush1.bf16.msra.mxu1 %v3421_v40 }
 0x16e   :  { %2263 = vmatprep.subr.bf16.mxu0 %v3090_v20  ;;  %2295 = vmatprep.subr.bf16.mxu1 %v3424_v43 }
 0x171   :  { %2265 = vmatpush1.bf16.msra.mxu0 %v3108_v29  ;;  %2297 = vmatpush1.bf16.msra.mxu1 %v3441_v49 }
 0x172   :  { %2267 = vmatprep.subr.bf16.mxu0 %v3120_v34  ;;  %2299 = vmatprep.subr.bf16.mxu1 %v3444_v50 }
 0x175   :  { %2269 = vmatpush1.bf16.msra.mxu0 %v3132_v41  ;;  %2301 = vmatpush1.bf16.msra.mxu1 %v3455_v31 }
 0x176   :  { %2303 = vmatprep.subr.bf16.mxu0 %v2908_v9  ;;  %2335 = vmatprep.subr.bf16.mxu1 %v3301_v54 }
 0x22b   :  { %v654_v60 = vpop.f32.mrb[2].mxu0  ;;  %v725_v63 = vpop.f32.mrb[18].mxu1 }
 0x22c   :  { %v730_v2 = vadd.f32 %v654_v60, %v3483_v23  ;;  %v656_v18 = vpop.f32.mrb[3].mxu0  ;;  %v727_v19 = vpop.f32.mrb[19].mxu1  ;;  %v2688_v45 = vadd.f32 %v725_v63, %v3511_v5 }
 0x22d   :  { %v731_v14 = vadd.f32 %v656_v18, %v3485_v28  ;;  %v2689_v36 = vadd.f32 %v727_v19, %v3513_v48 }
 0x22e   :  { %v1949_v51 = vmul.f32 -1.442695, %v730_v2 }
 0x22f   :  { %v1950_v27 = vmul.f32 -1.442695, %v731_v14  ;;  %v1951_v11 = vmul.f32 -1.442695, %v2689_v36 }
 0x230   :  { %2735 = vpow2.f32 %v1949_v51 }
 0x231   :  { %2737 = vpow2.f32 %v1950_v27 }
 0x232   :  { %2739 = vpow2.f32 %v1951_v11 }
 0x233   :  { %2741 = vtanh.f32 %v2688_v45 }
 0x23a   :  { %v2736_v59 = vpop.eup %2735 }
 0x23b   :  { %v2738_v12 = vpop.eup %2737  ;;  %v737_v53 = vadd.f32 1.0, %v2736_v59 }
 0x23c   :  { %v743_v1 = vadd.f32 1.0, %v2738_v12  ;;  %v2740_v23 = vpop.eup %2739 }
 0x23d   :  { %2743 = vrcp.f32 %v737_v53  ;;  %v2742_v60 = vpop.eup %2741  ;;  %v750_v14 = vadd.f32 1.0, %v2740_v23 }
 0x23e   :  { %2745 = vrcp.f32 %v743_v1 }
 0x23f   :  { %2747 = vrcp.f32 %v750_v14 }
 0x247   :  { %v2744_v28 = vpop.eup %2743 }
 0x248   :  { %v2746_v2 = vpop.eup %2745  ;;  %v754_v18 = vmul.f32 %v2744_v28, %v2742_v60 }
 0x249   :  { %v753_v51 = vmul.f32 %v2746_v2, %v3517_v21  ;;  %v2748_v63 = vpop.eup %2747 }
 0x24b   :  { %v3567_v19 = vadd.f32 %v754_v18, %v753_v51 }
 0x24d   :  { %2749 = vtanh.f32 %v3567_v19 }
 0x257   :  { %v2750_v27 = vpop.eup %2749 }
 0x258   :  { %v3570_v36 = vmul.f32 %v2750_v27, %v2748_v63 }
 0x25a   :  { %1952 = vst [vmem:[%s3914_s6 + $0x8] sm:$0xff] %v3570_v36  ;;  %825 = vmatmul.mubr.f32.vlgmr.msra.gmra.mrb[4].mxu0 %v3570_v36  ;;  %896 = vmatmul.mubr.f32.vlgmr.msra.gmra.mrb[20].mxu1 %v3570_v36 }
 0x25b   :  { %2305 = vmatpush1.bf16.msra.mxu0 %v2919_v13  ;;  %2337 = vmatpush1.bf16.msra.mxu1 %v3319_v61 }
 0x25c   :  { %2307 = vmatprep.subr.bf16.mxu0 %v2941_v22  ;;  %2339 = vmatprep.subr.bf16.mxu1 %v3322_v62 }
 0x25d   :  { %996 = vmatprep.mubr.f32.mxu0 %v3922_v42  ;;  %1067 = vmatprep.mubr.f32.mxu1 %v3922_v42 }
 0x25f   :  { %2309 = vmatpush1.bf16.msra.mxu0 %v2952_v26  ;;  %2341 = vmatpush1.bf16.msra.mxu1 %v3341_v7 }
 0x260   :  { %2311 = vmatprep.subr.bf16.mxu0 %v2973_v35  ;;  %2343 = vmatprep.subr.bf16.mxu1 %v3344_v8 }
 0x263   :  { %2313 = vmatpush1.bf16.msra.mxu0 %v2985_v39  ;;  %2345 = vmatpush1.bf16.msra.mxu1 %v3361_v16 }
 0x264   :  { %2315 = vmatprep.subr.bf16.mxu0 %v2997_v44  ;;  %2347 = vmatprep.subr.bf16.mxu1 %v3364_v17 }
 0x267   :  { %2317 = vmatpush1.bf16.msra.mxu0 %v3018_v52  ;;  %2349 = vmatpush1.bf16.msra.mxu1 %v3381_v24 }
 0x268   :  { %2319 = vmatprep.subr.bf16.mxu0 %v3030_v57  ;;  %2351 = vmatprep.subr.bf16.mxu1 %v3384_v25 }
 0x26b   :  { %2321 = vmatpush1.bf16.msra.mxu0 %v3048_v0  ;;  %2353 = vmatpush1.bf16.msra.mxu1 %v3401_v32 }
 0x26c   :  { %2323 = vmatprep.subr.bf16.mxu0 %v3060_v6  ;;  %2355 = vmatprep.subr.bf16.mxu1 %v3404_v33 }
 0x26f   :  { %2325 = vmatpush1.bf16.msra.mxu0 %v3078_v15  ;;  %2357 = vmatpush1.bf16.msra.mxu1 %v3421_v40 }
 0x270   :  { %2327 = vmatprep.subr.bf16.mxu0 %v3090_v20  ;;  %2359 = vmatprep.subr.bf16.mxu1 %v3424_v43 }
 0x273   :  { %2329 = vmatpush1.bf16.msra.mxu0 %v3108_v29  ;;  %2361 = vmatpush1.bf16.msra.mxu1 %v3441_v49 }
 0x274   :  { %2331 = vmatprep.subr.bf16.mxu0 %v3120_v34  ;;  %2363 = vmatprep.subr.bf16.mxu1 %v3444_v50 }
 0x277   :  { %2333 = vmatpush1.bf16.msra.mxu0 %v3132_v41  ;;  %2365 = vmatpush1.bf16.msra.mxu1 %v3455_v31 }
 0x278   :  { %2367 = vmatprep.subr.bf16.mxu0 %v2908_v9  ;;  %2399 = vmatprep.subr.bf16.mxu1 %v3301_v54 }
 0x32d   :  { %v826_v1 = vpop.f32.mrb[4].mxu0  ;;  %v897_v21 = vpop.f32.mrb[20].mxu1 }
 0x32e   :  { %v902_v11 = vadd.f32 %v826_v1, %v3487_v30  ;;  %v828_v45 = vpop.f32.mrb[5].mxu0  ;;  %v899_v59 = vpop.f32.mrb[21].mxu1  ;;  %v2690_v2 = vadd.f32 %v897_v21, %v3511_v5 }
 0x32f   :  { %v903_v12 = vadd.f32 %v828_v45, %v3489_v37  ;;  %v2691_v60 = vadd.f32 %v899_v59, %v3513_v48 }
 0x330   :  { %v1953_v53 = vmul.f32 -1.442695, %v902_v11 }
 0x331   :  { %v1954_v23 = vmul.f32 -1.442695, %v903_v12  ;;  %v1955_v28 = vmul.f32 -1.442695, %v2691_v60 }
 0x332   :  { %2751 = vpow2.f32 %v1953_v53 }
 0x333   :  { %2753 = vpow2.f32 %v1954_v23 }
 0x334   :  { %2755 = vpow2.f32 %v1955_v28 }
 0x335   :  { %2757 = vtanh.f32 %v2690_v2 }
 0x33c   :  { %v2752_v18 = vpop.eup %2751 }
 0x33d   :  { %v2754_v14 = vpop.eup %2753  ;;  %v909_v51 = vadd.f32 1.0, %v2752_v18 }
 0x33e   :  { %v915_v63 = vadd.f32 1.0, %v2754_v14  ;;  %v2756_v30 = vpop.eup %2755 }
 0x33f   :  { %2759 = vrcp.f32 %v909_v51  ;;  %v2758_v27 = vpop.eup %2757  ;;  %v922_v45 = vadd.f32 1.0, %v2756_v30 }
 0x340   :  { %2761 = vrcp.f32 %v915_v63 }
 0x341   :  { %2763 = vrcp.f32 %v922_v45 }
 0x349   :  { %v2760_v37 = vpop.eup %2759 }
 0x34a   :  { %v2762_v1 = vpop.eup %2761  ;;  %v926_v11 = vmul.f32 %v2760_v37, %v2758_v27 }
 0x34b   :  { %v925_v12 = vmul.f32 %v2762_v1, %v3567_v19  ;;  %v2764_v21 = vpop.eup %2763 }
 0x34d   :  { %v3617_v59 = vadd.f32 %v926_v11, %v925_v12 }
 0x34f   :  { %2765 = vtanh.f32 %v3617_v59 }
 0x359   :  { %v2766_v53 = vpop.eup %2765 }
 0x35a   :  { %v3620_v23 = vmul.f32 %v2766_v53, %v2764_v21 }
 0x35c   :  { %1956 = vst [vmem:[%s3914_s6 + $0x10] sm:$0xff] %v3620_v23  ;;  %997 = vmatmul.mubr.f32.vlgmr.msra.gmra.mrb[6].mxu0 %v3620_v23  ;;  %1068 = vmatmul.mubr.f32.vlgmr.msra.gmra.mrb[22].mxu1 %v3620_v23 }
 0x35d   :  { %2369 = vmatpush1.bf16.msra.mxu0 %v2919_v13  ;;  %2401 = vmatpush1.bf16.msra.mxu1 %v3319_v61 }
 0x35e   :  { %2371 = vmatprep.subr.bf16.mxu0 %v2941_v22  ;;  %2403 = vmatprep.subr.bf16.mxu1 %v3322_v62 }
 0x35f   :  { %1168 = vmatprep.mubr.f32.mxu0 %v3922_v42  ;;  %1239 = vmatprep.mubr.f32.mxu1 %v3922_v42 }
 0x361   :  { %2373 = vmatpush1.bf16.msra.mxu0 %v2952_v26  ;;  %2405 = vmatpush1.bf16.msra.mxu1 %v3341_v7 }
 0x362   :  { %2375 = vmatprep.subr.bf16.mxu0 %v2973_v35  ;;  %2407 = vmatprep.subr.bf16.mxu1 %v3344_v8 }
 0x365   :  { %2377 = vmatpush1.bf16.msra.mxu0 %v2985_v39  ;;  %2409 = vmatpush1.bf16.msra.mxu1 %v3361_v16 }
 0x366   :  { %2379 = vmatprep.subr.bf16.mxu0 %v2997_v44  ;;  %2411 = vmatprep.subr.bf16.mxu1 %v3364_v17 }
 0x369   :  { %2381 = vmatpush1.bf16.msra.mxu0 %v3018_v52  ;;  %2413 = vmatpush1.bf16.msra.mxu1 %v3381_v24 }
 0x36a   :  { %2383 = vmatprep.subr.bf16.mxu0 %v3030_v57  ;;  %2415 = vmatprep.subr.bf16.mxu1 %v3384_v25 }
 0x36d   :  { %2385 = vmatpush1.bf16.msra.mxu0 %v3048_v0  ;;  %2417 = vmatpush1.bf16.msra.mxu1 %v3401_v32 }
 0x36e   :  { %2387 = vmatprep.subr.bf16.mxu0 %v3060_v6  ;;  %2419 = vmatprep.subr.bf16.mxu1 %v3404_v33 }
 0x371   :  { %2389 = vmatpush1.bf16.msra.mxu0 %v3078_v15  ;;  %2421 = vmatpush1.bf16.msra.mxu1 %v3421_v40 }
 0x372   :  { %2391 = vmatprep.subr.bf16.mxu0 %v3090_v20  ;;  %2423 = vmatprep.subr.bf16.mxu1 %v3424_v43 }
 0x375   :  { %2393 = vmatpush1.bf16.msra.mxu0 %v3108_v29  ;;  %2425 = vmatpush1.bf16.msra.mxu1 %v3441_v49 }
 0x376   :  { %2395 = vmatprep.subr.bf16.mxu0 %v3120_v34  ;;  %2427 = vmatprep.subr.bf16.mxu1 %v3444_v50 }
 0x379   :  { %2397 = vmatpush1.bf16.msra.mxu0 %v3132_v41  ;;  %2429 = vmatpush1.bf16.msra.mxu1 %v3455_v31 }
 0x37a   :  { %2431 = vmatprep.subr.bf16.mxu0 %v2908_v9  ;;  %2463 = vmatprep.subr.bf16.mxu1 %v3301_v54 }
 0x42f   :  { %v998_v19 = vpop.f32.mrb[6].mxu0  ;;  %v1069_v60 = vpop.f32.mrb[22].mxu1 }
 0x430   :  { %v1074_v28 = vadd.f32 %v998_v19, %v3491_v38  ;;  %v1000_v2 = vpop.f32.mrb[7].mxu0  ;;  %v1071_v18 = vpop.f32.mrb[23].mxu1  ;;  %v2692_v37 = vadd.f32 %v1069_v60, %v3511_v5 }
 0x431   :  { %v1075_v14 = vadd.f32 %v1000_v2, %v3493_v46  ;;  %v2693_v30 = vadd.f32 %v1071_v18, %v3513_v48 }
 0x432   :  { %v1957_v51 = vmul.f32 -1.442695, %v1074_v28 }
 0x433   :  { %v1958_v63 = vmul.f32 -1.442695, %v1075_v14  ;;  %v1959_v27 = vmul.f32 -1.442695, %v2693_v30 }
 0x434   :  { %2767 = vpow2.f32 %v1957_v51 }
 0x435   :  { %2769 = vpow2.f32 %v1958_v63 }
 0x436   :  { %2771 = vpow2.f32 %v1959_v27 }
 0x437   :  { %2773 = vtanh.f32 %v2692_v37 }
 0x43e   :  { %v2768_v1 = vpop.eup %2767 }
 0x43f   :  { %v2770_v11 = vpop.eup %2769  ;;  %v1081_v45 = vadd.f32 1.0, %v2768_v1 }
 0x440   :  { %v1087_v12 = vadd.f32 1.0, %v2770_v11  ;;  %v2772_v38 = vpop.eup %2771 }
 0x441   :  { %2775 = vrcp.f32 %v1081_v45  ;;  %v2774_v21 = vpop.eup %2773  ;;  %v1094_v28 = vadd.f32 1.0, %v2772_v38 }
 0x442   :  { %2777 = vrcp.f32 %v1087_v12 }
 0x443   :  { %2779 = vrcp.f32 %v1094_v28 }
 0x44b   :  { %v2776_v46 = vpop.eup %2775 }
 0x44c   :  { %v2778_v53 = vpop.eup %2777  ;;  %v1098_v19 = vmul.f32 %v2776_v46, %v2774_v21 }
 0x44d   :  { %v1097_v2 = vmul.f32 %v2778_v53, %v3617_v59  ;;  %v2780_v60 = vpop.eup %2779 }
 0x44f   :  { %v3667_v18 = vadd.f32 %v1098_v19, %v1097_v2 }
 0x451   :  { %2781 = vtanh.f32 %v3667_v18 }
 0x45b   :  { %v2782_v14 = vpop.eup %2781 }
 0x45c   :  { %v3670_v51 = vmul.f32 %v2782_v14, %v2780_v60 }
 0x45e   :  { %1960 = vst [vmem:[%s3914_s6 + $0x18] sm:$0xff] %v3670_v51  ;;  %1169 = vmatmul.mubr.f32.vlgmr.msra.gmra.mrb[8].mxu0 %v3670_v51  ;;  %1240 = vmatmul.mubr.f32.vlgmr.msra.gmra.mrb[24].mxu1 %v3670_v51 }
 0x45f   :  { %2433 = vmatpush1.bf16.msra.mxu0 %v2919_v13  ;;  %2465 = vmatpush1.bf16.msra.mxu1 %v3319_v61 }
 0x460   :  { %2435 = vmatprep.subr.bf16.mxu0 %v2941_v22  ;;  %2467 = vmatprep.subr.bf16.mxu1 %v3322_v62 }
 0x461   :  { %1340 = vmatprep.mubr.f32.mxu0 %v3922_v42  ;;  %1411 = vmatprep.mubr.f32.mxu1 %v3922_v42 }
 0x463   :  { %2437 = vmatpush1.bf16.msra.mxu0 %v2952_v26  ;;  %2469 = vmatpush1.bf16.msra.mxu1 %v3341_v7 }
 0x464   :  { %2439 = vmatprep.subr.bf16.mxu0 %v2973_v35  ;;  %2471 = vmatprep.subr.bf16.mxu1 %v3344_v8 }
 0x467   :  { %2441 = vmatpush1.bf16.msra.mxu0 %v2985_v39  ;;  %2473 = vmatpush1.bf16.msra.mxu1 %v3361_v16 }
 0x468   :  { %2443 = vmatprep.subr.bf16.mxu0 %v2997_v44  ;;  %2475 = vmatprep.subr.bf16.mxu1 %v3364_v17 }
 0x46b   :  { %2445 = vmatpush1.bf16.msra.mxu0 %v3018_v52  ;;  %2477 = vmatpush1.bf16.msra.mxu1 %v3381_v24 }
 0x46c   :  { %2447 = vmatprep.subr.bf16.mxu0 %v3030_v57  ;;  %2479 = vmatprep.subr.bf16.mxu1 %v3384_v25 }
 0x46f   :  { %2449 = vmatpush1.bf16.msra.mxu0 %v3048_v0  ;;  %2481 = vmatpush1.bf16.msra.mxu1 %v3401_v32 }
 0x470   :  { %2451 = vmatprep.subr.bf16.mxu0 %v3060_v6  ;;  %2483 = vmatprep.subr.bf16.mxu1 %v3404_v33 }
 0x473   :  { %2453 = vmatpush1.bf16.msra.mxu0 %v3078_v15  ;;  %2485 = vmatpush1.bf16.msra.mxu1 %v3421_v40 }
 0x474   :  { %2455 = vmatprep.subr.bf16.mxu0 %v3090_v20  ;;  %2487 = vmatprep.subr.bf16.mxu1 %v3424_v43 }
 0x477   :  { %2457 = vmatpush1.bf16.msra.mxu0 %v3108_v29  ;;  %2489 = vmatpush1.bf16.msra.mxu1 %v3441_v49 }
 0x478   :  { %2459 = vmatprep.subr.bf16.mxu0 %v3120_v34  ;;  %2491 = vmatprep.subr.bf16.mxu1 %v3444_v50 }
 0x47b   :  { %2461 = vmatpush1.bf16.msra.mxu0 %v3132_v41  ;;  %2493 = vmatpush1.bf16.msra.mxu1 %v3455_v31 }
 0x47c   :  { %2495 = vmatprep.subr.bf16.mxu0 %v2908_v9  ;;  %2527 = vmatprep.subr.bf16.mxu1 %v3301_v54 }
 0x531   :  { %v1170_v59 = vpop.f32.mrb[8].mxu0  ;;  %v1241_v63 = vpop.f32.mrb[24].mxu1 }
 0x532   :  { %v1246_v30 = vadd.f32 %v1170_v59, %v3495_v47  ;;  %v1172_v27 = vpop.f32.mrb[9].mxu0  ;;  %v1243_v37 = vpop.f32.mrb[25].mxu1  ;;  %v2694_v21 = vadd.f32 %v1241_v63, %v3511_v5 }
 0x533   :  { %v1247_v1 = vadd.f32 %v1172_v27, %v3497_v55  ;;  %v2695_v12 = vadd.f32 %v1243_v37, %v3513_v48 }
 0x534   :  { %v1961_v11 = vmul.f32 -1.442695, %v1246_v30 }
 0x535   :  { %v1962_v45 = vmul.f32 -1.442695, %v1247_v1  ;;  %v1963_v38 = vmul.f32 -1.442695, %v2695_v12 }
 0x536   :  { %2783 = vpow2.f32 %v1961_v11 }
 0x537   :  { %2785 = vpow2.f32 %v1962_v45 }
 0x538   :  { %2787 = vpow2.f32 %v1963_v38 }
 0x539   :  { %2789 = vtanh.f32 %v2694_v21 }
 0x540   :  { %v2784_v46 = vpop.eup %2783 }
 0x541   :  { %v2786_v53 = vpop.eup %2785  ;;  %v1253_v19 = vadd.f32 1.0, %v2784_v46 }
 0x542   :  { %v1259_v28 = vadd.f32 1.0, %v2786_v53  ;;  %v2788_v47 = vpop.eup %2787 }
 0x543   :  { %2791 = vrcp.f32 %v1253_v19  ;;  %v2790_v2 = vpop.eup %2789  ;;  %v1266_v59 = vadd.f32 1.0, %v2788_v47 }
 0x544   :  { %2793 = vrcp.f32 %v1259_v28 }
 0x545   :  { %2795 = vrcp.f32 %v1266_v59 }
 0x54d   :  { %v2792_v55 = vpop.eup %2791 }
 0x54e   :  { %v2794_v60 = vpop.eup %2793  ;;  %v1270_v14 = vmul.f32 %v2792_v55, %v2790_v2 }
 0x54f   :  { %v1269_v30 = vmul.f32 %v2794_v60, %v3667_v18  ;;  %v2796_v63 = vpop.eup %2795 }
 0x551   :  { %v3717_v27 = vadd.f32 %v1270_v14, %v1269_v30 }
 0x553   :  { %2797 = vtanh.f32 %v3717_v27 }
 0x55d   :  { %v2798_v37 = vpop.eup %2797 }
 0x55e   :  { %v3720_v1 = vmul.f32 %v2798_v37, %v2796_v63 }
 0x560   :  { %1964 = vst [vmem:[%s3914_s6 + $0x20] sm:$0xff] %v3720_v1  ;;  %1341 = vmatmul.mubr.f32.vlgmr.msra.gmra.mrb[10].mxu0 %v3720_v1  ;;  %1412 = vmatmul.mubr.f32.vlgmr.msra.gmra.mrb[26].mxu1 %v3720_v1 }
 0x561   :  { %2497 = vmatpush1.bf16.msra.mxu0 %v2919_v13  ;;  %2529 = vmatpush1.bf16.msra.mxu1 %v3319_v61 }
 0x562   :  { %2499 = vmatprep.subr.bf16.mxu0 %v2941_v22  ;;  %2531 = vmatprep.subr.bf16.mxu1 %v3322_v62 }
 0x563   :  { %1512 = vmatprep.mubr.f32.mxu0 %v3922_v42  ;;  %1583 = vmatprep.mubr.f32.mxu1 %v3922_v42 }
 0x565   :  { %2501 = vmatpush1.bf16.msra.mxu0 %v2952_v26  ;;  %2533 = vmatpush1.bf16.msra.mxu1 %v3341_v7 }
 0x566   :  { %2503 = vmatprep.subr.bf16.mxu0 %v2973_v35  ;;  %2535 = vmatprep.subr.bf16.mxu1 %v3344_v8 }
 0x569   :  { %2505 = vmatpush1.bf16.msra.mxu0 %v2985_v39  ;;  %2537 = vmatpush1.bf16.msra.mxu1 %v3361_v16 }
 0x56a   :  { %2507 = vmatprep.subr.bf16.mxu0 %v2997_v44  ;;  %2539 = vmatprep.subr.bf16.mxu1 %v3364_v17 }
 0x56d   :  { %2509 = vmatpush1.bf16.msra.mxu0 %v3018_v52  ;;  %2541 = vmatpush1.bf16.msra.mxu1 %v3381_v24 }
 0x56e   :  { %2511 = vmatprep.subr.bf16.mxu0 %v3030_v57  ;;  %2543 = vmatprep.subr.bf16.mxu1 %v3384_v25 }
 0x571   :  { %2513 = vmatpush1.bf16.msra.mxu0 %v3048_v0  ;;  %2545 = vmatpush1.bf16.msra.mxu1 %v3401_v32 }
 0x572   :  { %2515 = vmatprep.subr.bf16.mxu0 %v3060_v6  ;;  %2547 = vmatprep.subr.bf16.mxu1 %v3404_v33 }
 0x575   :  { %2517 = vmatpush1.bf16.msra.mxu0 %v3078_v15  ;;  %2549 = vmatpush1.bf16.msra.mxu1 %v3421_v40 }
 0x576   :  { %2519 = vmatprep.subr.bf16.mxu0 %v3090_v20  ;;  %2551 = vmatprep.subr.bf16.mxu1 %v3424_v43 }
 0x579   :  { %2521 = vmatpush1.bf16.msra.mxu0 %v3108_v29  ;;  %2553 = vmatpush1.bf16.msra.mxu1 %v3441_v49 }
 0x57a   :  { %2523 = vmatprep.subr.bf16.mxu0 %v3120_v34  ;;  %2555 = vmatprep.subr.bf16.mxu1 %v3444_v50 }
 0x57d   :  { %2525 = vmatpush1.bf16.msra.mxu0 %v3132_v41  ;;  %2557 = vmatpush1.bf16.msra.mxu1 %v3455_v31 }
 0x57e   :  { %2559 = vmatprep.subr.bf16.mxu0 %v2908_v9  ;;  %2591 = vmatprep.subr.bf16.mxu1 %v3301_v54 }
 0x633   :  { %v1342_v18 = vpop.f32.mrb[10].mxu0  ;;  %v1413_v11 = vpop.f32.mrb[26].mxu1 }
 0x634   :  { %v1418_v45 = vadd.f32 %v1342_v18, %v3499_v58  ;;  %v1344_v12 = vpop.f32.mrb[11].mxu0  ;;  %v1415_v38 = vpop.f32.mrb[27].mxu1  ;;  %v2696_v47 = vadd.f32 %v1413_v11, %v3511_v5 }
 0x635   :  { %v1419_v21 = vadd.f32 %v1344_v12, %v3501_v4  ;;  %v2697_v19 = vadd.f32 %v1415_v38, %v3513_v48  ;;  %v1806_v12 = vld [vmem:[%s3915_s4 + $0x20] sm:$0xff]  ;;  %v1807_v38 = vld [vmem:[%s3915_s4 + $0x28] sm:$0xff] }
 0x636   :  { %v1965_v46 = vmul.f32 -1.442695, %v1418_v45 }
 0x637   :  { %v1966_v53 = vmul.f32 -1.442695, %v1419_v21  ;;  %v1967_v28 = vmul.f32 -1.442695, %v2697_v19  ;;  %v2630_v21 = vpack.c.bf16 %v1807_v38, %v1806_v12 }
 0x638   :  { %2799 = vpow2.f32 %v1965_v46  ;;  %v1808_v46 = vld [vmem:[%s3915_s4 + $0x30] sm:$0xff] }
 0x639   :  { %2801 = vpow2.f32 %v1966_v53  ;;  %v1809_v53 = vld [vmem:[%s3915_s4 + $0x38] sm:$0xff] }
 0x63a   :  { %2803 = vpow2.f32 %v1967_v28  ;;  %v2634_v19 = vpack.c.bf16 %v1809_v53, %v1808_v46  ;;  %v1810_v28 = vld [vmem:[%s3915_s4 + $0x40] sm:$0xff] }
 0x63b   :  { %2805 = vtanh.f32 %v2696_v47 }
 0x642   :  { %v2800_v9 = vpop.eup %2799 }
 0x643   :  { %v2802_v2 = vpop.eup %2801  ;;  %v1425_v54 = vadd.f32 1.0, %v2800_v9  ;;  %v1812_v9 = vld [vmem:[%s3915_s4 + $0x50] sm:$0xff] }
 0x644   :  { %v1431_v55 = vadd.f32 1.0, %v2802_v2  ;;  %v2804_v58 = vpop.eup %2803  ;;  %v1813_v2 = vld [vmem:[%s3915_s4 + $0x58] sm:$0xff] }
 0x645   :  { %2807 = vrcp.f32 %v1425_v54  ;;  %v2806_v60 = vpop.eup %2805  ;;  %v1438_v30 = vadd.f32 1.0, %v2804_v58  ;;  %v2642_v54 = vpack.c.bf16 %v1813_v2, %v1812_v9  ;;  %v1815_v58 = vld [vmem:[%s3915_s4 + $0x68] sm:$0xff] }
 0x646   :  { %2809 = vrcp.f32 %v1431_v55  ;;  %v1814_v55 = vld [vmem:[%s3915_s4 + $0x60] sm:$0xff] }
 0x647   :  { %2811 = vrcp.f32 %v1438_v30 }
 0x64f   :  { %v2808_v4 = vpop.eup %2807 }
 0x650   :  { %v2810_v14 = vpop.eup %2809  ;;  %v1442_v59 = vmul.f32 %v2808_v4, %v2806_v60  ;;  %v2646_v60 = vpack.c.bf16 %v1815_v58, %v1814_v55  ;;  %v1816_v4 = vld [vmem:[%s3915_s4 + $0x70] sm:$0xff] }
 0x651   :  { %v1441_v63 = vmul.f32 %v2810_v14, %v3717_v27  ;;  %v2812_v18 = vpop.eup %2811  ;;  %v1817_v14 = vld [vmem:[%s3915_s4 + $0x78] sm:$0xff] }
 0x653   :  { %v3767_v37 = vadd.f32 %v1442_v59, %v1441_v63  ;;  %v2650_v59 = vpack.c.bf16 %v1817_v14, %v1816_v4 }
 0x655   :  { %2813 = vtanh.f32 %v3767_v37 }
 0x65f   :  { %v2814_v11 = vpop.eup %2813 }
 0x660   :  { %v3770_v45 = vmul.f32 %v2814_v11, %v2812_v18 }
 0x662   :  { %1968 = vst [vmem:[%s3914_s6 + $0x28] sm:$0xff] %v3770_v45  ;;  %1513 = vmatmul.mubr.f32.vlgmr.msra.gmra.mrb[12].mxu0 %v3770_v45  ;;  %1584 = vmatmul.mubr.f32.vlgmr.msra.gmra.mrb[28].mxu1 %v3770_v45 }
 0x663   :  { %2561 = vmatpush1.bf16.msra.mxu0 %v2919_v13  ;;  %2593 = vmatpush1.bf16.msra.mxu1 %v3319_v61  ;;  %v1802_v13 = vld [vmem:[%s3915_s4] sm:$0xff] }
 0x664   :  { %2563 = vmatprep.subr.bf16.mxu0 %v2941_v22  ;;  %2595 = vmatprep.subr.bf16.mxu1 %v3322_v62  ;;  %v1803_v22 = vld [vmem:[%s3915_s4 + $0x8] sm:$0xff] }
 0x665   :  { %1684 = vmatprep.mubr.f32.mxu0 %v3922_v42  ;;  %1755 = vmatprep.mubr.f32.mxu1 %v3922_v42 }
 0x667   :  { %2565 = vmatpush1.bf16.msra.mxu0 %v2952_v26  ;;  %2597 = vmatpush1.bf16.msra.mxu1 %v3341_v7  ;;  %v2622_v26 = vpack.c.bf16 %v1803_v22, %v1802_v13  ;;  %v3924_v13 = vld [vmem:[#allocation5_spill] sm:$0xff] }
 0x668   :  { %2567 = vmatprep.subr.bf16.mxu0 %v2973_v35  ;;  %2599 = vmatprep.subr.bf16.mxu1 %v3344_v8 }
 0x66b   :  { %2569 = vmatpush1.bf16.msra.mxu0 %v2985_v39  ;;  %2601 = vmatpush1.bf16.msra.mxu1 %v3361_v16 }
 0x66c   :  { %2571 = vmatprep.subr.bf16.mxu0 %v2997_v44  ;;  %2603 = vmatprep.subr.bf16.mxu1 %v3364_v17 }
 0x66f   :  { %2573 = vmatpush1.bf16.msra.mxu0 %v3018_v52  ;;  %2605 = vmatpush1.bf16.msra.mxu1 %v3381_v24 }
 0x670   :  { %2575 = vmatprep.subr.bf16.mxu0 %v3030_v57  ;;  %2607 = vmatprep.subr.bf16.mxu1 %v3384_v25 }
 0x673   :  { %2577 = vmatpush1.bf16.msra.mxu0 %v3048_v0  ;;  %2609 = vmatpush1.bf16.msra.mxu1 %v3401_v32  ;;  %v3923_v0 = vld [vmem:[#allocation4_spill] sm:$0xff] }
 0x674   :  { %2579 = vmatprep.subr.bf16.mxu0 %v3060_v6  ;;  %2611 = vmatprep.subr.bf16.mxu1 %v3404_v33 }
 0x677   :  { %2581 = vmatpush1.bf16.msra.mxu0 %v3078_v15  ;;  %2613 = vmatpush1.bf16.msra.mxu1 %v3421_v40 }
 0x678   :  { %2583 = vmatprep.subr.bf16.mxu0 %v3090_v20  ;;  %2615 = vmatprep.subr.bf16.mxu1 %v3424_v43 }
 0x67b   :  { %2585 = vmatpush1.bf16.msra.mxu0 %v3108_v29  ;;  %2617 = vmatpush1.bf16.msra.mxu1 %v3441_v49  ;;  %v1804_v49 = vld [vmem:[%s3915_s4 + $0x10] sm:$0xff] }
 0x67c   :  { %2587 = vmatprep.subr.bf16.mxu0 %v3120_v34  ;;  %2619 = vmatprep.subr.bf16.mxu1 %v3444_v50  ;;  %v1805_v50 = vld [vmem:[%s3915_s4 + $0x18] sm:$0xff] }
 0x67d   :  { %v2626_v27 = vpack.c.bf16 %v1805_v50, %v1804_v49 }
 0x67f   :  { %2589 = vmatpush1.bf16.msra.mxu0 %v3132_v41  ;;  %2621 = vmatpush1.bf16.msra.mxu1 %v3455_v31 }
 0x680   :  { %2623 = vmatprep.subr.bf16.mxu0 %v2622_v26 }
 0x735   :  { %v1514_v35 = vpop.f32.mrb[12].mxu0  ;;  %v1585_v39 = vpop.f32.mrb[28].mxu1 }
 0x736   :  { %v1590_v44 = vadd.f32 %v1514_v35, %v3503_v10  ;;  %v1516_v52 = vpop.f32.mrb[13].mxu0  ;;  %v1587_v57 = vpop.f32.mrb[29].mxu1  ;;  %v2698_v41 = vadd.f32 %v1585_v39, %v3511_v5 }
 0x737   :  { %v1591_v6 = vadd.f32 %v1516_v52, %v3923_v0  ;;  %v2699_v29 = vadd.f32 %v1587_v57, %v3513_v48 }
 0x738   :  { %v1969_v15 = vmul.f32 -1.442695, %v1590_v44 }
 0x739   :  { %v1970_v20 = vmul.f32 -1.442695, %v1591_v6  ;;  %v1971_v34 = vmul.f32 -1.442695, %v2699_v29 }
 0x73a   :  { %2815 = vpow2.f32 %v1969_v15 }
 0x73b   :  { %2817 = vpow2.f32 %v1970_v20 }
 0x73c   :  { %2819 = vpow2.f32 %v1971_v34 }
 0x73d   :  { %2821 = vtanh.f32 %v2698_v41 }
 0x744   :  { %v2816_v61 = vpop.eup %2815 }
 0x745   :  { %v2818_v62 = vpop.eup %2817  ;;  %v1597_v7 = vadd.f32 1.0, %v2816_v61 }
 0x746   :  { %v1603_v8 = vadd.f32 1.0, %v2818_v62  ;;  %v2820_v16 = vpop.eup %2819 }
 0x747   :  { %2823 = vrcp.f32 %v1597_v7  ;;  %v2822_v17 = vpop.eup %2821  ;;  %v1610_v33 = vadd.f32 1.0, %v2820_v16 }
 0x748   :  { %2825 = vrcp.f32 %v1603_v8 }
 0x749   :  { %2827 = vrcp.f32 %v1610_v33 }
 0x751   :  { %v2824_v24 = vpop.eup %2823 }
 0x752   :  { %v2826_v25 = vpop.eup %2825  ;;  %v1614_v32 = vmul.f32 %v2824_v24, %v2822_v17 }
 0x753   :  { %v1613_v40 = vmul.f32 %v2826_v25, %v3767_v37  ;;  %v2828_v31 = vpop.eup %2827 }
 0x755   :  { %v3821_v43 = vadd.f32 %v1614_v32, %v1613_v40 }
 0x757   :  { %2829 = vtanh.f32 %v3821_v43 }
 0x761   :  { %v2830_v10 = vpop.eup %2829 }
 0x762   :  { %v1617_v42 = vmul.f32 %v2830_v10, %v2828_v31 }
 0x764   :  { %1972 = vst [vmem:[%s3914_s6 + $0x30] sm:$0xff] %v1617_v42  ;;  %1685 = vmatmul.mubr.f32.vlgmr.msra.gmra.mrb[14].mxu0 %v1617_v42  ;;  %1756 = vmatmul.mubr.f32.vlgmr.msra.gmra.mrb[30].mxu1 %v1617_v42 }
 0x765   :  { %2625 = vmatpush3.bf16.msra.mxu0 %v2622_v26  ;;  %2034 = vmatprep.mubr.f32.mxu0 %v3520_v3  ;;  %v1811_v3 = vld [vmem:[%s3915_s4 + $0x48] sm:$0xff] }
 0x766   :  { %2627 = vmatprep.subr.bf16.mxu0 %v2626_v27  ;;  %v2638_v47 = vpack.c.bf16 %v1811_v3, %v1810_v28 }
 0x769   :  { %2629 = vmatpush3.bf16.msra.mxu0 %v2626_v27 }
 0x76a   :  { %2631 = vmatprep.subr.bf16.mxu0 %v2630_v21 }
 0x76d   :  { %2633 = vmatpush3.bf16.msra.mxu0 %v2630_v21 }
 0x76e   :  { %2635 = vmatprep.subr.bf16.mxu0 %v2634_v19 }
 0x771   :  { %2637 = vmatpush3.bf16.msra.mxu0 %v2634_v19 }
 0x772   :  { %2639 = vmatprep.subr.bf16.mxu0 %v2638_v47 }
 0x775   :  { %2641 = vmatpush3.bf16.msra.mxu0 %v2638_v47 }
 0x776   :  { %2643 = vmatprep.subr.bf16.mxu0 %v2642_v54 }
 0x779   :  { %2645 = vmatpush3.bf16.msra.mxu0 %v2642_v54 }
 0x77a   :  { %2647 = vmatprep.subr.bf16.mxu0 %v2646_v60 }
 0x77d   :  { %2649 = vmatpush3.bf16.msra.mxu0 %v2646_v60 }
 0x77e   :  { %2651 = vmatprep.subr.bf16.mxu0 %v2650_v59 }
 0x781   :  { %2653 = vmatpush3.bf16.msra.mxu0 %v2650_v59 }
 0x784   :  { %2035 = vmatmul.mubr.f32.vlgmr.msra.gmra.mrb[16].mxu0 %v3570_v36 }
 0x785   :  { %2037 = vmatprep.mubr.f32.mxu0 %v3620_v23 }
 0x788   :  { %2038 = vmatmul.mubr.f32.gmra.mrb[18].mxu0 %v3670_v51 }
 0x789   :  { %2040 = vmatprep.mubr.f32.mxu0 %v3720_v1 }
 0x78c   :  { %2041 = vmatmul.mubr.f32.gmra.mrb[20].mxu0 %v3770_v45 }
 0x78d   :  { %2043 = vmatprep.mubr.f32.mxu0 %v1617_v42 }
 0x837   :  { %v1686_v30 = vpop.f32.mrb[14].mxu0  ;;  %v1757_v63 = vpop.f32.mrb[30].mxu1 }
 0x838   :  { %v1762_v37 = vadd.f32 %v1686_v30, %v3507_v56  ;;  %v1688_v18 = vpop.f32.mrb[15].mxu0  ;;  %v1759_v11 = vpop.f32.mrb[31].mxu1  ;;  %v2700_v51 = vadd.f32 %v1757_v63, %v3511_v5  ;;  %v1977_v5 = vld [vmem:[%s3916_s5] ss:$0 sm:$0xff] }
 0x839   :  { %v1763_v22 = vadd.f32 %v1688_v18, %v3924_v13  ;;  %v2701_v36 = vadd.f32 %v1759_v11, %v3513_v48 }
 0x83a   :  { %v1973_v26 = vmul.f32 -1.442695, %v1762_v37 }
 0x83b   :  { %v1974_v35 = vmul.f32 -1.442695, %v1763_v22  ;;  %v1975_v23 = vmul.f32 -1.442695, %v2701_v36 }
 0x83c   :  { %2831 = vpow2.f32 %v1973_v26 }
 0x83d   :  { %2833 = vpow2.f32 %v1974_v35 }
 0x83e   :  { %2835 = vpow2.f32 %v1975_v23 }
 0x83f   :  { %2837 = vtanh.f32 %v2700_v51 }
 0x846   :  { %v2832_v1 = vpop.eup %2831 }
 0x847   :  { %v2834_v45 = vpop.eup %2833  ;;  %v1769_v39 = vadd.f32 1.0, %v2832_v1 }
 0x848   :  { %v1775_v44 = vadd.f32 1.0, %v2834_v45  ;;  %v2836_v56 = vpop.eup %2835 }
 0x849   :  { %2839 = vrcp.f32 %v1769_v39  ;;  %v2838_v52 = vpop.eup %2837  ;;  %v1782_v15 = vadd.f32 1.0, %v2836_v56 }
 0x84a   :  { %2841 = vrcp.f32 %v1775_v44 }
 0x84b   :  { %2843 = vrcp.f32 %v1782_v15 }
 0x853   :  { %v2840_v57 = vpop.eup %2839 }
 0x854   :  { %v2842_v0 = vpop.eup %2841  ;;  %v1786_v6 = vmul.f32 %v2840_v57, %v2838_v52 }
 0x855   :  { %v1785_v20 = vmul.f32 %v2842_v0, %v3821_v43  ;;  %v2844_v33 = vpop.eup %2843 }
 0x857   :  { %v1787_v48 = vadd.f32 %v1786_v6, %v1785_v20  ;;  %v2036_v29 = vpop.f32.mrb[16].mxu0 }
 0x858   :  { %v1897_v34 = vadd.f32 %v2036_v29, %v1977_v5  ;;  %v1891_v41 = vpop.f32.mrb[17].mxu0 }
 0x859   :  { %2845 = vtanh.f32 %v1787_v48  ;;  %v1892_v61 = vadd.f32 %v1977_v5, %v1891_v41 }
 0x85a   :  { %1931 = vst [vmem:[%s3917_s7 + $0x8] sm:$0xff] %v1897_v34 }
 0x85b   :  { %1930 = vst [vmem:[%s3917_s7] sm:$0xff] %v1892_v61  ;;  %v2039_v62 = vpop.f32.mrb[18].mxu0 }
 0x85c   :  { %v1907_v7 = vadd.f32 %v2039_v62, %v1977_v5  ;;  %v1901_v8 = vpop.f32.mrb[19].mxu0 }
 0x85d   :  { %v1902_v16 = vadd.f32 %v1977_v5, %v1901_v8 }
 0x85e   :  { %1933 = vst [vmem:[%s3917_s7 + $0x18] sm:$0xff] %v1907_v7 }
 0x85f   :  { %1932 = vst [vmem:[%s3917_s7 + $0x10] sm:$0xff] %v1902_v16  ;;  %v2042_v17 = vpop.f32.mrb[20].mxu0 }
 0x860   :  { %v1917_v24 = vadd.f32 %v2042_v17, %v1977_v5  ;;  %v1911_v25 = vpop.f32.mrb[21].mxu0 }
 0x861   :  { %v1912_v32 = vadd.f32 %v1977_v5, %v1911_v25 }
 0x862   :  { %1935 = vst [vmem:[%s3917_s7 + $0x28] sm:$0xff] %v1917_v24 }
 0x863   :  { %v2846_v40 = vpop.eup %2845  ;;  %1934 = vst [vmem:[%s3917_s7 + $0x20] sm:$0xff] %v1912_v32 }
 0x864   :  { %v1789_v43 = vmul.f32 %v2846_v40, %v2844_v33 }
 0x866   :  { %1976 = vst [vmem:[%s3914_s6 + $0x38] sm:$0xff] %v1789_v43  ;;  %2044 = vmatmul.mubr.f32.gmra.mrb[22].mxu0 %v1789_v43 }
 0x939   :  { %v2045_v49 = vpop.f32.mrb[22].mxu0 }
 0x93a   :  { %v1927_v50 = vadd.f32 %v2045_v49, %v1977_v5  ;;  %v1921_v31 = vpop.f32.mrb[23].mxu0 }
 0x93b   :  { %v1922_v10 = vadd.f32 %v1977_v5, %v1921_v31 }
 0x93c   :  { %1937 = vst [vmem:[%s3917_s7 + $0x38] sm:$0xff] %v1927_v50 }
 0x93d   :  { %1936 = vst [vmem:[%s3917_s7 + $0x30] sm:$0xff] %v1922_v10 }

</bundles_post_ra>
